<compile_context>
chip_gen: v5e
topology: v5e:2x2
jax: 0.10.0
libtpu: 0.0.40
codegen_flags: <defaults>
</compile_context>

<pallas_src>
import functools

import jax
import jax.numpy as jnp
from jax.experimental import pallas as pl
from jax.experimental.pallas import tpu as pltpu


# ----------------------------------------------------------------------------
# Constants (CLIP ViT-B/16 preprocessing + toy stand-in sizes)
# ----------------------------------------------------------------------------

CLIP_MEAN = jnp.array([0.48145466, 0.4578275, 0.40821073], dtype=jnp.float32)
CLIP_STD = jnp.array([0.26862954, 0.26130258, 0.27577711], dtype=jnp.float32)
EMBED_DIM = 512      # ViT-B/16 joint embedding dim
CLIP_SIZE = 32       # small stand-in for the 224 input resolution
TEXT_FEAT = 64       # toy token-feature width for the linear "text encoder"
_EPS2 = 1e-24        # (F.normalize eps = 1e-12) ** 2


# ----------------------------------------------------------------------------
# Fused Pallas kernel:
#   image matmul (K-tiled, bf16 x bf16 -> f32 acc)  +  text matmul
#   + L2-normalize + cosine distance (d_clip_loss epilogue)
# ----------------------------------------------------------------------------

def _farl_fused_kernel(img_ref, w_img_ref, bias_ref, txt_ref, w_txt_ref,
                       dist_ref, acc_ref, *, n_pred):
    k = pl.program_id(0)

    @pl.when(k == 0)
    def _():
        acc_ref[...] = jnp.zeros_like(acc_ref)

    # K-tiled image projection: bf16 operands on the MXU, f32 accumulation.
    acc_ref[...] += jnp.dot(img_ref[...], w_img_ref[...],
                            preferred_element_type=jnp.float32)

    @pl.when(k == pl.num_programs(0) - 1)
    def _():
        img_emb = acc_ref[...] + bias_ref[...]                       # (2B, E) f32

        # Tiny text "encoder" matmul, fused so it costs no extra launch.
        txt_emb = jnp.dot(txt_ref[...], w_txt_ref[...],
                          preferred_element_type=jnp.float32)        # (T, E) f32

        def l2norm(v):
            # matches F.normalize: x / max(||x||, 1e-12); rsqrt runs on the EUP.
            ss = jnp.sum(v * v, axis=-1, keepdims=True)
            return v * jax.lax.rsqrt(jnp.maximum(ss, _EPS2))

        img_n = l2norm(img_emb)
        txt_n = l2norm(txt_emb)
        pred_n = img_n[:n_pred]                                      # (B, E)
        gt_n = img_n[n_pred:]                                        # (B, E)

        others = jnp.concatenate([txt_n, gt_n], axis=0)              # (T+B, E)
        sim = jax.lax.dot_general(pred_n, others,
                                  (((1,), (1,)), ((), ())),
                                  preferred_element_type=jnp.float32)  # (B, T+B)
        dist_ref[...] = 1.0 - sim


def _pick_tk(K, E, itemsize=2, budget=4 * 1024 * 1024):
    # If the whole folded weight fits a small VMEM budget, use a single grid
    # step (no pipelining / per-step overhead).  Otherwise K-tile it.
    if K * E * itemsize <= budget:
        return K
    for cand in (2048, 1536, 1024, 512, 256, 128):
        if K % cand == 0:
            return cand
    return K


def _farl_fused(imgs_flat, w_img, bias_img, txt_feats, w_txt, *, n_pred):
    """One pallas_call producing the (B, T+B) cosine-distance matrix."""
    M, K = imgs_flat.shape
    _, E = w_img.shape
    T = txt_feats.shape[0]
    tk = _pick_tk(K, E)
    kernel = functools.partial(_farl_fused_kernel, n_pred=n_pred)
    return pl.pallas_call(
        kernel,
        out_shape=jax.ShapeDtypeStruct((n_pred, T + (M - n_pred)), jnp.float32),
        grid_spec=pltpu.PrefetchScalarGridSpec(
            num_scalar_prefetch=0,
            grid=(K // tk,),
            in_specs=[
                pl.BlockSpec((M, tk), lambda k: (0, k)),          # image LHS
                pl.BlockSpec((tk, E), lambda k: (k, 0)),          # folded w_img
                pl.BlockSpec((1, E), lambda k: (0, 0)),           # folded bias
                pl.BlockSpec((T, TEXT_FEAT), lambda k: (0, 0)),   # text feats
                pl.BlockSpec((TEXT_FEAT, E), lambda k: (0, 0)),   # w_txt
            ],
            out_specs=pl.BlockSpec((n_pred, T + (M - n_pred)), lambda k: (0, 0)),
            scratch_shapes=[pltpu.VMEM((M, E), jnp.float32)],     # f32 accumulator
        ),
        # Single (reduction) grid axis; M is too small to shard across v7x's
        # two TensorCores, so no parallel axis is exposed here.
        compiler_params=pltpu.CompilerParams(
            dimension_semantics=("arbitrary",),
            vmem_limit_bytes=32 * 1024 * 1024,
        ),
    )(imgs_flat, w_img, bias_img, txt_feats, w_txt)


# ----------------------------------------------------------------------------
# Synthetic "CLIP" model (deterministic stand-in for ViT-B/16 + FaRL checkpoint)
# ----------------------------------------------------------------------------

def make_params():
    # TODO(synk): the real CLIP ViT-B/16 image/text transformers + FaRL
    # checkpoint have no Pallas equivalent; replaced by deterministic linear
    # encoders.
    k_img, k_txt = jax.random.split(jax.random.PRNGKey(0))
    K = 3 * CLIP_SIZE * CLIP_SIZE
    w_img = 0.02 * jax.random.normal(k_img, (K, EMBED_DIM), dtype=jnp.float32)
    w_txt = 0.02 * jax.random.normal(k_txt, (TEXT_FEAT, EMBED_DIM),
                                     dtype=jnp.float32)

    # Fold CLIP preprocessing ((x+1)/2 then Normalize(mean, std)) into w_img.
    # The per-channel affine commutes through bilinear resize (linear, weights
    # sum to 1), so:
    #   flatten(resize(normalize((x+1)/2))) @ W
    #     == flatten(resize(x)) @ (scale ⊙ W)  +  bias_row @ W
    scale = 0.5 / CLIP_STD                                   # (3,)
    bias = (0.5 - CLIP_MEAN) / CLIP_STD                      # (3,)
    per_row_scale = jnp.repeat(scale, CLIP_SIZE * CLIP_SIZE)[:, None]   # (K, 1)
    per_row_bias = jnp.repeat(bias, CLIP_SIZE * CLIP_SIZE)[None, :]     # (1, K)

    w_img_folded = (w_img * per_row_scale).astype(jnp.bfloat16)  # cast once
    bias_img = per_row_bias @ w_img                              # (1, E) f32, offline

    return {
        "w_img": w_img_folded,                 # (K, E) bf16, preprocess folded in
        "b_img": bias_img.astype(jnp.float32),  # (1, E) f32
        "w_txt": w_txt.astype(jnp.bfloat16),    # (TEXT_FEAT, E) bf16
    }


@functools.lru_cache(maxsize=None)
def _prompt_features(prompt):
    # clip.tokenize + model.encode_text stand-in: deterministic token features
    # seeded from the prompt string (cached — compile-time constant per prompt).
    seed = sum(ord(c) for c in prompt) % (2 ** 31)
    return jax.random.normal(jax.random.PRNGKey(seed), (TEXT_FEAT,),
                             dtype=jnp.float32)


# ----------------------------------------------------------------------------
# One jitted step: resize -> cast -> fused Pallas kernel -> per-branch means.
# Wrapping in jax.jit collapses all the small surrounding ops into the same
# executable as the Pallas custom call (single dispatch in eager callers).
# ----------------------------------------------------------------------------

@jax.jit
def _farl_branch_means(pred_img, gt_img, txt, w_img, b_img, w_txt):
    B = pred_img.shape[0]
    imgs = jnp.concatenate([pred_img, gt_img], axis=0)            # (2B, 3, H, W)
    # TODO(synk): torchvision F1.resize stand-in (bilinear); no Pallas equivalent.
    imgs = jax.image.resize(imgs, (2 * B, 3, CLIP_SIZE, CLIP_SIZE),
                            method="bilinear")
    imgs_flat = imgs.reshape(2 * B, -1).astype(jnp.bfloat16)      # (2B, 3*S*S)

    # dist columns: [0] farlclip prompt, [1] farledit prompt, [2:2+B] gt rows.
    dist = _farl_fused(imgs_flat, w_img, b_img, txt, w_txt, n_pred=B)
    return jnp.mean(dist[:, 0]), jnp.mean(dist[:, 1]), jnp.mean(dist[:, 2:])


# ----------------------------------------------------------------------------
# Total_farlloss.forward
# ----------------------------------------------------------------------------

def total_farl_loss(args, params, pred_img, t, gt=None):
    fc, fe, fi = args["farlclip"], args["farledit"], args["farlidentity"]
    clip_on = fc["use"] and fc["min_t"] <= t <= fc["max_t"]
    edit_on = fe["use"] and fe["min_t"] <= t <= fe["max_t"]
    id_on = fi["use"] and fi["min_t"] <= t <= fi["max_t"]
    if not (clip_on or edit_on or id_on):
        return jnp.float32(0.0)

    gt_img = gt if gt is not None else pred_img  # placeholder rows if gt unused

    txt = jnp.stack([_prompt_features(fc["prompt"]),
                     _prompt_features(fe["prompt"])], axis=0).astype(jnp.bfloat16)

    # pred and gt images are encoded ONCE (batched) and reused by every branch
    # (the original re-calls forward_image per branch on identical inputs).
    clip_mean, edit_mean, id_mean = _farl_branch_means(
        pred_img, gt_img, txt, params["w_img"], params["b_img"], params["w_txt"])

    loss = jnp.float32(0.0)
    clip_loss = jnp.float32(0.0)
    id_loss = jnp.float32(0.0)
    if clip_on:
        clip_loss = clip_loss + clip_mean
        loss = loss + clip_loss * fc["lambda"]
    if edit_on:
        # NOTE: like the original module, `clip_loss` still carries the
        # farlclip contribution here (intentional double-count preserved).
        clip_loss = clip_loss + edit_mean
        loss = loss + clip_loss * fe["lambda"]
    if id_on:
        id_loss = id_loss + id_mean
        loss = loss + fi["lambda"] * id_loss
    return loss


# ----------------------------------------------------------------------------

if __name__ == "__main__":
    args = {
        "farlclip": {"use": True, "min_t": 0, "max_t": 1000,
                     "prompt": "a photo of a face", "lambda": 1.0},
        "farledit": {"use": True, "min_t": 0, "max_t": 1000,
                     "prompt": "a smiling face", "lambda": 0.5},
        "farlidentity": {"use": True, "min_t": 0, "max_t": 1000, "lambda": 2.0},
    }

    params = make_params()

    key = jax.random.PRNGKey(0)
    k1, k2 = jax.random.split(key)
    B, C, H, W = 2, 3, 16, 16
    pred_img = jax.random.uniform(k1, (B, C, H, W), jnp.float32, -1.0, 1.0)
    gt = jax.random.uniform(k2, (B, C, H, W), jnp.float32, -1.0, 1.0)
    t = 50

    loss = total_farl_loss(args, params, pred_img, t, gt=gt)
    loss = jax.block_until_ready(loss)
    assert loss.shape == () and bool(jnp.isfinite(loss))
    print("KERNEL_OK")
</pallas_src>

<mosaic_0001>
module attributes {stable_mosaic.version = 11 : i64} {
  func.func @_farl_fused_kernel(%arg0: i32, %arg1: memref<4x3072xbf16, #tpu.memory_space<vmem>>, %arg2: memref<3072x512xbf16, #tpu.memory_space<vmem>>, %arg3: memref<1x512xf32, #tpu.memory_space<vmem>>, %arg4: memref<2x64xbf16, #tpu.memory_space<vmem>>, %arg5: memref<64x512xbf16, #tpu.memory_space<vmem>>, %arg6: memref<2x4xf32, #tpu.memory_space<vmem>>, %arg7: memref<4x512xf32, #tpu.memory_space<vmem>>) attributes {dimension_semantics = [#tpu.dimension_semantics<arbitrary>], iteration_bounds = array<i64: 1>, scalar_prefetch = 0 : i64, scratch_operands = 1 : i64, tpu.core_type = #tpu.core_type<tc>, window_params = [{transform_indices = @transform_0, window_bounds = array<i64: 4, 3072>}, {transform_indices = @transform_1, window_bounds = array<i64: 3072, 512>}, {pipeline_mode = #tpu.pipeline_mode<synchronous>, transform_indices = @transform_2, window_bounds = array<i64: 1, 512>}, {pipeline_mode = #tpu.pipeline_mode<synchronous>, transform_indices = @transform_3, window_bounds = array<i64: 2, 64>}, {pipeline_mode = #tpu.pipeline_mode<synchronous>, transform_indices = @transform_4, window_bounds = array<i64: 64, 512>}, {pipeline_mode = #tpu.pipeline_mode<synchronous>, transform_indices = @transform_5, window_bounds = array<i64: 2, 4>}]} {
    %c0_i32 = arith.constant 0 : i32
    %0 = arith.cmpi eq, %arg0, %c0_i32 : i32
    %1 = arith.extui %0 : i1 to i32
    %c0_i32_0 = arith.constant 0 : i32
    %2 = arith.cmpi ne, %1, %c0_i32_0 : i32
    scf.if %2 {
      %cst_10 = arith.constant 0.000000e+00 : f32
      %12 = vector.broadcast %cst_10 : f32 to vector<4x512xf32>
      %c0_11 = arith.constant 0 : index
      %c0_12 = arith.constant 0 : index
      %13 = vector.load %arg7[%c0_11, %c0_12] : memref<4x512xf32, #tpu.memory_space<vmem>>, vector<4x512xf32>
      tpu.vector_store %arg7[%c0_11, %c0_12], %12 {strides = array<i32>} : memref<4x512xf32, #tpu.memory_space<vmem>>, vector<4x512xf32>,
    } else {
    }
    %c0 = arith.constant 0 : index
    %c0_1 = arith.constant 0 : index
    %3 = vector.load %arg7[%c0, %c0_1] : memref<4x512xf32, #tpu.memory_space<vmem>>, vector<4x512xf32>
    %c0_2 = arith.constant 0 : index
    %c0_3 = arith.constant 0 : index
    %4 = vector.load %arg1[%c0_2, %c0_3] : memref<4x3072xbf16, #tpu.memory_space<vmem>>, vector<4x3072xbf16>
    %c0_4 = arith.constant 0 : index
    %c0_5 = arith.constant 0 : index
    %5 = vector.load %arg2[%c0_4, %c0_5] : memref<3072x512xbf16, #tpu.memory_space<vmem>>, vector<3072x512xbf16>
    %cst = arith.constant dense<0.000000e+00> : vector<4x512xf32>
    %6 = tpu.matmul %4, %5, %cst {dimension_numbers = #tpu.dot_dimension_numbers<[1], [0], [0], [1], [0, 0, 1, 1], [], []>} : vector<4x3072xbf16>, vector<3072x512xbf16>, vector<4x512xf32> -> vector<4x512xf32>
    %7 = arith.addf %3, %6 : vector<4x512xf32>
    %c0_6 = arith.constant 0 : index
    %c0_7 = arith.constant 0 : index
    %8 = vector.load %arg7[%c0_6, %c0_7] : memref<4x512xf32, #tpu.memory_space<vmem>>, vector<4x512xf32>
    tpu.vector_store %arg7[%c0_6, %c0_7], %7 {strides = array<i32>} : memref<4x512xf32, #tpu.memory_space<vmem>>, vector<4x512xf32>,
    %c0_i32_8 = arith.constant 0 : i32
    %9 = arith.cmpi eq, %arg0, %c0_i32_8 : i32
    %10 = arith.extui %9 : i1 to i32
    %c0_i32_9 = arith.constant 0 : i32
    %11 = arith.cmpi ne, %10, %c0_i32_9 : i32
    scf.if %11 {
      %c0_10 = arith.constant 0 : index
      %c0_11 = arith.constant 0 : index
      %12 = vector.load %arg7[%c0_10, %c0_11] : memref<4x512xf32, #tpu.memory_space<vmem>>, vector<4x512xf32>
      %c0_12 = arith.constant 0 : index
      %c0_13 = arith.constant 0 : index
      %13 = vector.load %arg3[%c0_12, %c0_13] : memref<1x512xf32, #tpu.memory_space<vmem>>, vector<1x512xf32>
      %14 = vector.broadcast %13 : vector<1x512xf32> to vector<4x512xf32>
      %15 = arith.addf %12, %14 : vector<4x512xf32>
      %c0_14 = arith.constant 0 : index
      %c0_15 = arith.constant 0 : index
      %16 = vector.load %arg4[%c0_14, %c0_15] : memref<2x64xbf16, #tpu.memory_space<vmem>>, vector<2x64xbf16>
      %c0_16 = arith.constant 0 : index
      %c0_17 = arith.constant 0 : index
      %17 = vector.load %arg5[%c0_16, %c0_17] : memref<64x512xbf16, #tpu.memory_space<vmem>>, vector<64x512xbf16>
      %cst_18 = arith.constant dense<0.000000e+00> : vector<2x512xf32>
      %18 = tpu.matmul %16, %17, %cst_18 {dimension_numbers = #tpu.dot_dimension_numbers<[1], [0], [0], [1], [0, 0, 1, 1], [], []>} : vector<2x64xbf16>, vector<64x512xbf16>, vector<2x512xf32> -> vector<2x512xf32>
      %19 = arith.mulf %15, %15 : vector<4x512xf32>
      %cst_19 = arith.constant dense<0.000000e+00> : vector<4xf32>
      %20 = vector.multi_reduction <add>, %19, %cst_19 [1] : vector<4x512xf32> to vector<4xf32>
      %21 = vector.shape_cast %20 : vector<4xf32> to vector<4x1xf32>
      %cst_20 = arith.constant 1.000000e-24 : f32
      %22 = vector.broadcast %cst_20 : f32 to vector<4x1xf32>
      %23 = arith.maximumf %21, %22 : vector<4x1xf32>
      %24 = math.rsqrt %23 : vector<4x1xf32>
      %25 = vector.broadcast %24 : vector<4x1xf32> to vector<4x512xf32>
      %26 = arith.mulf %15, %25 : vector<4x512xf32>
      %27 = arith.mulf %18, %18 : vector<2x512xf32>
      %cst_21 = arith.constant dense<0.000000e+00> : vector<2xf32>
      %28 = vector.multi_reduction <add>, %27, %cst_21 [1] : vector<2x512xf32> to vector<2xf32>
      %29 = vector.shape_cast %28 : vector<2xf32> to vector<2x1xf32>
      %cst_22 = arith.constant 1.000000e-24 : f32
      %30 = vector.broadcast %cst_22 : f32 to vector<2x1xf32>
      %31 = arith.maximumf %29, %30 : vector<2x1xf32>
      %32 = math.rsqrt %31 : vector<2x1xf32>
      %33 = vector.broadcast %32 : vector<2x1xf32> to vector<2x512xf32>
      %34 = arith.mulf %18, %33 : vector<2x512xf32>
      %35 = vector.extract_strided_slice %26 {offsets = [0, 0], sizes = [2, 512], strides = [1, 1]} : vector<4x512xf32> to vector<2x512xf32>
      %36 = vector.extract_strided_slice %26 {offsets = [2, 0], sizes = [2, 512], strides = [1, 1]} : vector<4x512xf32> to vector<2x512xf32>
      %37 = tpu.concatenate %34, %36 in 0 : vector<2x512xf32>, vector<2x512xf32> -> vector<4x512xf32>
      %cst_23 = arith.constant dense<0.000000e+00> : vector<2x4xf32>
      %38 = tpu.matmul %35, %37, %cst_23 {dimension_numbers = #tpu.dot_dimension_numbers<[1], [1], [0], [0], [0, 0, 1, 0], [], []>} : vector<2x512xf32>, vector<4x512xf32>, vector<2x4xf32> -> vector<2x4xf32>
      %cst_24 = arith.constant 1.000000e+00 : f32
      %39 = vector.broadcast %cst_24 : f32 to vector<2x4xf32>
      %40 = arith.subf %39, %38 : vector<2x4xf32>
      %c0_25 = arith.constant 0 : index
      %c0_26 = arith.constant 0 : index
      %41 = vector.load %arg6[%c0_25, %c0_26] : memref<2x4xf32, #tpu.memory_space<vmem>>, vector<2x4xf32>
      tpu.vector_store %arg6[%c0_25, %c0_26], %40 {strides = array<i32>} : memref<2x4xf32, #tpu.memory_space<vmem>>, vector<2x4xf32>,
    } else {
    }
    return
  }
  func.func @transform_0(%arg0: i32) -> (i32, i32) {
    %c0_i32 = arith.constant 0 : i32
    %c0_i32_0 = arith.constant 0 : i32
    return %c0_i32, %arg0 : i32, i32
  }
  func.func @transform_1(%arg0: i32) -> (i32, i32) {
    %c0_i32 = arith.constant 0 : i32
    %c0_i32_0 = arith.constant 0 : i32
    return %arg0, %c0_i32 : i32, i32
  }
  func.func @transform_2(%arg0: i32) -> (i32, i32) {
    %c0_i32 = arith.constant 0 : i32
    %c0_i32_0 = arith.constant 0 : i32
    %c0_i32_1 = arith.constant 0 : i32
    return %c0_i32, %c0_i32_0 : i32, i32
  }
  func.func @transform_3(%arg0: i32) -> (i32, i32) {
    %c0_i32 = arith.constant 0 : i32
    %c0_i32_0 = arith.constant 0 : i32
    %c0_i32_1 = arith.constant 0 : i32
    return %c0_i32, %c0_i32_0 : i32, i32
  }
  func.func @transform_4(%arg0: i32) -> (i32, i32) {
    %c0_i32 = arith.constant 0 : i32
    %c0_i32_0 = arith.constant 0 : i32
    %c0_i32_1 = arith.constant 0 : i32
    return %c0_i32, %c0_i32_0 : i32, i32
  }
  func.func @transform_5(%arg0: i32) -> (i32, i32) {
    %c0_i32 = arith.constant 0 : i32
    %c0_i32_0 = arith.constant 0 : i32
    %c0_i32_1 = arith.constant 0 : i32
    return %c0_i32, %c0_i32_0 : i32, i32
  }
}

</mosaic_0001>

<bundles_post_ra>
// kernel: _farl_branch_means.1
= control target key start
LH: loop header
LB: loop body
LE: loop exit
PB: predicated region body
PF: predicated region fallthrough
CT: control target
= control target key end

     0   :  { %10 = vsyncpa [#allocation4], 0  ;;  %s10749_s0 = inlined_call_operand.vmem [shape: bf16[4,3072], index: 0, kind: input, shape index: {}]   ;;  %s10750_s1 = inlined_call_operand.hbm [shape: bf16[3072,512], index: 1, kind: input, shape index: {}]   ;;  %s10751_s2 = inlined_call_operand.hbm [shape: f32[1,512], index: 2, kind: input, shape index: {}]   ;;  %s10752_s3 = inlined_call_operand.hbm [shape: bf16[2,64], index: 3, kind: input, shape index: {}]   ;;  %s10753_s4 = inlined_call_operand.hbm [shape: bf16[64,512], index: 4, kind: input, shape index: {}]   ;;  %s10754_s5 = inlined_call_operand.vmem [shape: f32[2,4], index: 5, kind: output, shape index: {}]  }
   0x1   :  { %11 = vsyncpa [#allocation6], 0  ;;  %s33_s20 = sshll.u32 %s10751_s2, 4  ;;  %s34_s20 = int_to_ptr.hbm [resolvable:$true] %s33_s20 }
   0x2   :  { %12 = vsyncpa [#allocation9], 0  ;;  %s10446_s21 = smov [#allocation5]   ;;  %s19_s25 = sshll.u32 %s10750_s1, 4  ;;  %s20_s25 = int_to_ptr.hbm [resolvable:$true] %s19_s25 }
   0x3   :  { %s35_s22 = sshll.u32 %s10446_s21, 4  ;;  %s10447_s26 = smov [#allocation3]   ;;  %s36_s22 = int_to_ptr.vmem [resolvable:$true] %s35_s22 }
   0x4   :  { %38 = dma.hbm_to_vmem [thread:$0]  %s34_s20, 64, %s36_s22, [#allocation6]  }
   0x5   :  { %s21_s27 = sshll.u32 %s10447_s26, 4  ;;  %s10448_s28 = smov 256   ;;  %s22_s27 = int_to_ptr.vmem [resolvable:$true] %s21_s27 }
   0x6   :  { %s10449_s29 = smov 16   ;;  %s44_s2 = sshll.u32 %s10752_s3, 4  ;;  %s45_s2 = int_to_ptr.hbm [resolvable:$true] %s44_s2 }
   0x7   :  { %27 = dma.hbm_to_vmem [thread:$0]  %s20_s25, 98304, %s22_s27, [#allocation4], %s10448_s28, %s10448_s28, %s10449_s29  }
   0x8   :  { %s10450_s7 = smov [#allocation7]   ;;  %s54_s1 = sshll.u32 %s10753_s4, 4  ;;  %s55_s1 = int_to_ptr.hbm [resolvable:$true] %s54_s1 }
   0x9   :  { %s46_s8 = sshll.u32 %s10450_s7, 4  ;;  %s10451_s11 = smov [#allocation8]   ;;  %s47_s8 = int_to_ptr.vmem [resolvable:$true] %s46_s8 }
   0xa   :  { %49 = dma.hbm_to_vmem [thread:$0]  %s45_s2, 16, %s47_s8, [#allocation6]  }
   0xb   :  { %s56_s12 = sshll.u32 %s10451_s11, 4  ;;  %s57_s12 = int_to_ptr.vmem [resolvable:$true] %s56_s12 }
   0xc   :  { %62 = dma.hbm_to_vmem [thread:$0]  %s55_s1, 2048, %s57_s12, [#allocation9], %s10448_s28, %s10448_s28, %s10449_s29  }
   0xd   :  { %10440 = dma.done.wait [#allocation4], 98304  }
   0xe   :  { %10441 = vsyncadd [#allocation4], 4294868992 }
   0xf   :  { %10442 = dma.done.wait [#allocation6], 80  }
  0x10   :  { %10443 = vsyncadd [#allocation6], 4294967216 }
  0x11   :  { %10444 = dma.done.wait [#allocation9], 2048  }
  0x12   :  { %10445 = vsyncadd [#allocation9], 4294965248  ;;  %v6502_v0 = vld [vmem:[#allocation3 + $0xe0] sm:$0xf]  ;;  %v9558_v1 = vld [vmem:[#allocation3 + $0xec] sm:$0xf0] }
  0x13   :  { %v6630_v2 = vld [vmem:[#allocation3 + $0x1e0] sm:$0xf]  ;;  %v6503_v3 = vor.u32 %v9558_v1, %v6502_v0  ;;  %v9590_v4 = vld [vmem:[#allocation3 + $0x1ec] sm:$0xf0]  ;;  %vm6017_vm0 = vcmask 1043456   ;;  %vm6142_vm1 = vcmask 523264  }
  0x14   :  { %v6758_v5 = vld [vmem:[#allocation3 + $0x2e0] sm:$0xf]  ;;  %v9622_v6 = vld [vmem:[#allocation3 + $0x2ec] sm:$0xf0]  ;;  %v6631_v7 = vor.u32 %v9590_v4, %v6630_v2  ;;  %vm6245_vm2 = vcmask 1041408   ;;  %vm6379_vm9 = vcmask 25600  }
  0x15   :  { %v6759_v8 = vor.u32 %v9622_v6, %v6758_v5  ;;  %v6886_v9 = vld [vmem:[#allocation3 + $0x3e0] sm:$0xf]  ;;  %v9654_v10 = vld [vmem:[#allocation3 + $0x3ec] sm:$0xf0]  ;;  %4763 = vmatpush.bf16.msra.mxu0 %v6503_v3 }
  0x16   :  { %v6486_v11 = vld [vmem:[#allocation3 + $0xc0] sm:$0xf]  ;;  %v6887_v12 = vor.u32 %v9654_v10, %v6886_v9  ;;  %v9554_v13 = vld [vmem:[#allocation3 + $0xcc] sm:$0xf0]  ;;  %4776 = vmatpush.bf16.msra.mxu1 %v6631_v7 }
  0x17   :  { %v6614_v14 = vld [vmem:[#allocation3 + $0x1c0] sm:$0xf]  ;;  %v9586_v15 = vld [vmem:[#allocation3 + $0x1cc] sm:$0xf0]  ;;  %4789 = vmatpush.bf16.msra.mxu2 %v6759_v8  ;;  %v6487_v16 = vor.u32 %v9554_v13, %v6486_v11 }
  0x18   :  { %v6615_v17 = vor.u32 %v9586_v15, %v6614_v14  ;;  %v6742_v18 = vld [vmem:[#allocation3 + $0x2c0] sm:$0xf]  ;;  %v9618_v19 = vld [vmem:[#allocation3 + $0x2cc] sm:$0xf0]  ;;  %4802 = vmatpush.bf16.msra.mxu3 %v6887_v12 }
  0x19   :  { %v6870_v20 = vld [vmem:[#allocation3 + $0x3c0] sm:$0xf]  ;;  %v6743_v21 = vor.u32 %v9618_v19, %v6742_v18  ;;  %v9650_v22 = vld [vmem:[#allocation3 + $0x3cc] sm:$0xf0]  ;;  %4764 = vmatpush.bf16.msra.mxu0 %v6487_v16 }
  0x1a   :  { %v6470_v23 = vld [vmem:[#allocation3 + $0xa0] sm:$0xf]  ;;  %v9550_v24 = vld [vmem:[#allocation3 + $0xac] sm:$0xf0]  ;;  %v6871_v25 = vor.u32 %v9650_v22, %v6870_v20  ;;  %4777 = vmatpush.bf16.msra.mxu1 %v6615_v17 }
  0x1b   :  { %v6598_v26 = vld [vmem:[#allocation3 + $0x1a0] sm:$0xf]  ;;  %v9582_v27 = vld [vmem:[#allocation3 + $0x1ac] sm:$0xf0]  ;;  %v6471_v29 = vor.u32 %v9550_v24, %v6470_v23  ;;  %4790 = vmatpush.bf16.msra.mxu2 %v6743_v21 }
  0x1c   :  { %v6726_v28 = vld [vmem:[#allocation3 + $0x2a0] sm:$0xf]  ;;  %v9614_v30 = vld [vmem:[#allocation3 + $0x2ac] sm:$0xf0]  ;;  %v6599_v33 = vor.u32 %v9582_v27, %v6598_v26  ;;  %4803 = vmatpush.bf16.msra.mxu3 %v6871_v25 }
  0x1d   :  { %v6854_v31 = vld [vmem:[#allocation3 + $0x3a0] sm:$0xf]  ;;  %v9646_v32 = vld [vmem:[#allocation3 + $0x3ac] sm:$0xf0]  ;;  %v6727_v34 = vor.u32 %v9614_v30, %v6726_v28  ;;  %4765 = vmatpush.bf16.msra.mxu0 %v6471_v29 }
  0x1e   :  { %v6454_v35 = vld [vmem:[#allocation3 + $0x80] sm:$0xf]  ;;  %v9546_v36 = vld [vmem:[#allocation3 + $0x8c] sm:$0xf0]  ;;  %v6855_v38 = vor.u32 %v9646_v32, %v6854_v31  ;;  %4778 = vmatpush.bf16.msra.mxu1 %v6599_v33 }
  0x1f   :  { %v6582_v37 = vld [vmem:[#allocation3 + $0x180] sm:$0xf]  ;;  %v9578_v39 = vld [vmem:[#allocation3 + $0x18c] sm:$0xf0]  ;;  %v6455_v44 = vor.u32 %v9546_v36, %v6454_v35  ;;  %4791 = vmatpush.bf16.msra.mxu2 %v6727_v34 }
  0x20   :  { %v6710_v40 = vld [vmem:[#allocation3 + $0x280] sm:$0xf]  ;;  %v9610_v41 = vld [vmem:[#allocation3 + $0x28c] sm:$0xf0]  ;;  %v6583_v45 = vor.u32 %v9578_v39, %v6582_v37  ;;  %4804 = vmatpush.bf16.msra.mxu3 %v6855_v38 }
  0x21   :  { %v6838_v42 = vld [vmem:[#allocation3 + $0x380] sm:$0xf]  ;;  %v9642_v43 = vld [vmem:[#allocation3 + $0x38c] sm:$0xf0]  ;;  %v6711_v46 = vor.u32 %v9610_v41, %v6710_v40  ;;  %4766 = vmatpush.bf16.msra.mxu0 %v6455_v44 }
  0x22   :  { %v6438_v47 = vld [vmem:[#allocation3 + $0x60] sm:$0xf]  ;;  %v9542_v48 = vld [vmem:[#allocation3 + $0x6c] sm:$0xf0]  ;;  %v6839_v50 = vor.u32 %v9642_v43, %v6838_v42  ;;  %4779 = vmatpush.bf16.msra.mxu1 %v6583_v45 }
  0x23   :  { %v6566_v49 = vld [vmem:[#allocation3 + $0x160] sm:$0xf]  ;;  %v9574_v51 = vld [vmem:[#allocation3 + $0x16c] sm:$0xf0]  ;;  %v6439_v56 = vor.u32 %v9542_v48, %v6438_v47  ;;  %4792 = vmatpush.bf16.msra.mxu2 %v6711_v46 }
  0x24   :  { %v6694_v52 = vld [vmem:[#allocation3 + $0x260] sm:$0xf]  ;;  %v9606_v53 = vld [vmem:[#allocation3 + $0x26c] sm:$0xf0]  ;;  %v6567_v57 = vor.u32 %v9574_v51, %v6566_v49  ;;  %4805 = vmatpush.bf16.msra.mxu3 %v6839_v50 }
  0x25   :  { %v6822_v54 = vld [vmem:[#allocation3 + $0x360] sm:$0xf]  ;;  %v9638_v55 = vld [vmem:[#allocation3 + $0x36c] sm:$0xf0]  ;;  %v6695_v58 = vor.u32 %v9606_v53, %v6694_v52  ;;  %4767 = vmatpush.bf16.msra.mxu0 %v6439_v56 }
  0x26   :  { %v6422_v59 = vld [vmem:[#allocation3 + $0x40] sm:$0xf]  ;;  %v9538_v60 = vld [vmem:[#allocation3 + $0x4c] sm:$0xf0]  ;;  %v6823_v62 = vor.u32 %v9638_v55, %v6822_v54  ;;  %4780 = vmatpush.bf16.msra.mxu1 %v6567_v57 }
  0x27   :  { %v6550_v61 = vld [vmem:[#allocation3 + $0x140] sm:$0xf]  ;;  %v9570_v63 = vld [vmem:[#allocation3 + $0x14c] sm:$0xf0]  ;;  %v6423_v4 = vor.u32 %v9538_v60, %v6422_v59  ;;  %4793 = vmatpush.bf16.msra.mxu2 %v6695_v58  ;;  %v88_v59 = vld [vmem:[%s10749_s0] sm:$0xff] }
  0x28   :  { %v6678_v0 = vld [vmem:[#allocation3 + $0x240] sm:$0xf]  ;;  %v9602_v1 = vld [vmem:[#allocation3 + $0x24c] sm:$0xf0]  ;;  %v6551_v5 = vor.u32 %v9570_v63, %v6550_v61  ;;  %4806 = vmatpush.bf16.msra.mxu3 %v6823_v62  ;;  %863 = vst [vmem:[#allocation1] ss:$4 sm:$0xff] %v88_v59 }
  0x29   :  { %v6806_v2 = vld [vmem:[#allocation3 + $0x340] sm:$0xf]  ;;  %v9634_v3 = vld [vmem:[#allocation3 + $0x34c] sm:$0xf0]  ;;  %v6679_v6 = vor.u32 %v9602_v1, %v6678_v0  ;;  %4768 = vmatpush.bf16.msra.mxu0 %v6423_v4 }
  0x2a   :  { %v6406_v7 = vld [vmem:[#allocation3 + $0x20] sm:$0xf]  ;;  %v9534_v8 = vld [vmem:[#allocation3 + $0x2c] sm:$0xf0]  ;;  %v6807_v10 = vor.u32 %v9634_v3, %v6806_v2  ;;  %4781 = vmatpush.bf16.msra.mxu1 %v6551_v5 }
  0x2b   :  { %v6534_v9 = vld [vmem:[#allocation3 + $0x120] sm:$0xf]  ;;  %v9566_v11 = vld [vmem:[#allocation3 + $0x12c] sm:$0xf0]  ;;  %v6407_v16 = vor.u32 %v9534_v8, %v6406_v7  ;;  %4794 = vmatpush.bf16.msra.mxu2 %v6679_v6 }
  0x2c   :  { %v6662_v12 = vld [vmem:[#allocation3 + $0x220] sm:$0xf]  ;;  %v9598_v13 = vld [vmem:[#allocation3 + $0x22c] sm:$0xf0]  ;;  %v6535_v19 = vor.u32 %v9566_v11, %v6534_v9  ;;  %4807 = vmatpush.bf16.msra.mxu3 %v6807_v10 }
  0x2d   :  { %v6790_v14 = vld [vmem:[#allocation3 + $0x320] sm:$0xf]  ;;  %v9630_v15 = vld [vmem:[#allocation3 + $0x32c] sm:$0xf0]  ;;  %v6663_v20 = vor.u32 %v9598_v13, %v6662_v12  ;;  %4769 = vmatpush.bf16.msra.mxu0 %v6407_v16 }
  0x2e   :  { %v6390_v17 = vld [vmem:[#allocation3] sm:$0xf]  ;;  %v9530_v18 = vld [vmem:[#allocation3 + $0xc] sm:$0xf0]  ;;  %v6791_v24 = vor.u32 %v9630_v15, %v6790_v14  ;;  %4782 = vmatpush.bf16.msra.mxu1 %v6535_v19 }
  0x2f   :  { %v6518_v21 = vld [vmem:[#allocation3 + $0x100] sm:$0xf]  ;;  %v9562_v22 = vld [vmem:[#allocation3 + $0x10c] sm:$0xf0]  ;;  %v6391_v31 = vor.u32 %v9530_v18, %v6390_v17  ;;  %4795 = vmatpush.bf16.msra.mxu2 %v6663_v20  ;;  %v90_v20 = vld [vmem:[%s10749_s0 + $0x10] sm:$0xff] }
  0x30   :  { %v6646_v23 = vld [vmem:[#allocation3 + $0x200] sm:$0xf]  ;;  %v9594_v25 = vld [vmem:[#allocation3 + $0x20c] sm:$0xf0]  ;;  %v6519_v35 = vor.u32 %v9562_v22, %v6518_v21  ;;  %4808 = vmatpush.bf16.msra.mxu3 %v6791_v24 }
  0x31   :  { %v6774_v26 = vld [vmem:[#allocation3 + $0x300] sm:$0xf]  ;;  %v9626_v27 = vld [vmem:[#allocation3 + $0x30c] sm:$0xf0]  ;;  %v6647_v36 = vor.u32 %v9594_v25, %v6646_v23  ;;  %4770 = vmatpush.bf16.msra.mxu0 %v6391_v31 }
  0x32   :  { %v7014_v28 = vld [vmem:[#allocation3 + $0x4e0] sm:$0xf]  ;;  %v9686_v29 = vld [vmem:[#allocation3 + $0x4ec] sm:$0xf0]  ;;  %v6775_v39 = vor.u32 %v9626_v27, %v6774_v26  ;;  %4783 = vmatpush.bf16.msra.mxu1 %v6519_v35 }
  0x33   :  { %v7142_v30 = vld [vmem:[#allocation3 + $0x5e0] sm:$0xf]  ;;  %v9718_v32 = vld [vmem:[#allocation3 + $0x5ec] sm:$0xf0]  ;;  %v7015_v40 = vor.u32 %v9686_v29, %v7014_v28  ;;  %4796 = vmatpush.bf16.msra.mxu2 %v6647_v36 }
  0x34   :  { %v7270_v33 = vld [vmem:[#allocation3 + $0x6e0] sm:$0xf]  ;;  %v9750_v34 = vld [vmem:[#allocation3 + $0x6ec] sm:$0xf0]  ;;  %v7143_v41 = vor.u32 %v9718_v32, %v7142_v30  ;;  %4809 = vmatpush.bf16.msra.mxu3 %v6775_v39 }
  0x35   :  { %v7398_v37 = vld [vmem:[#allocation3 + $0x7e0] sm:$0xf]  ;;  %v9782_v38 = vld [vmem:[#allocation3 + $0x7ec] sm:$0xf0]  ;;  %v7271_v42 = vor.u32 %v9750_v34, %v7270_v33  ;;  %4815 = vmatpush.bf16.msrb.mxu0 %v7015_v40 }
  0x36   :  { %v6998_v43 = vld [vmem:[#allocation3 + $0x4c0] sm:$0xf]  ;;  %v9682_v44 = vld [vmem:[#allocation3 + $0x4cc] sm:$0xf0]  ;;  %v7399_v46 = vor.u32 %v9782_v38, %v7398_v37  ;;  %4828 = vmatpush.bf16.msrb.mxu1 %v7143_v41 }
  0x37   :  { %v7126_v45 = vld [vmem:[#allocation3 + $0x5c0] sm:$0xf]  ;;  %v9714_v47 = vld [vmem:[#allocation3 + $0x5cc] sm:$0xf0]  ;;  %v6999_v52 = vor.u32 %v9682_v44, %v6998_v43  ;;  %4841 = vmatpush.bf16.msrb.mxu2 %v7271_v42 }
  0x38   :  { %v7254_v48 = vld [vmem:[#allocation3 + $0x6c0] sm:$0xf]  ;;  %v9746_v49 = vld [vmem:[#allocation3 + $0x6cc] sm:$0xf0]  ;;  %v7127_v55 = vor.u32 %v9714_v47, %v7126_v45  ;;  %4854 = vmatpush.bf16.msrb.mxu3 %v7399_v46 }
  0x39   :  { %v7382_v50 = vld [vmem:[#allocation3 + $0x7c0] sm:$0xf]  ;;  %v9778_v51 = vld [vmem:[#allocation3 + $0x7cc] sm:$0xf0]  ;;  %v7255_v56 = vor.u32 %v9746_v49, %v7254_v48  ;;  %4816 = vmatpush.bf16.msrb.mxu0 %v6999_v52 }
  0x3a   :  { %v6982_v53 = vld [vmem:[#allocation3 + $0x4a0] sm:$0xf]  ;;  %v9678_v54 = vld [vmem:[#allocation3 + $0x4ac] sm:$0xf0]  ;;  %v7383_v60 = vor.u32 %v9778_v51, %v7382_v50  ;;  %4829 = vmatpush.bf16.msrb.mxu1 %v7127_v55 }
  0x3b   :  { %v7110_v57 = vld [vmem:[#allocation3 + $0x5a0] sm:$0xf]  ;;  %v9710_v58 = vld [vmem:[#allocation3 + $0x5ac] sm:$0xf0]  ;;  %v6983_v1 = vor.u32 %v9678_v54, %v6982_v53  ;;  %4842 = vmatpush.bf16.msrb.mxu2 %v7255_v56 }
  0x3c   :  { %v7238_v61 = vld [vmem:[#allocation3 + $0x6a0] sm:$0xf]  ;;  %v9742_v62 = vld [vmem:[#allocation3 + $0x6ac] sm:$0xf0]  ;;  %v7111_v3 = vor.u32 %v9710_v58, %v7110_v57  ;;  %4855 = vmatpush.bf16.msrb.mxu3 %v7383_v60 }
  0x3d   :  { %v7366_v63 = vld [vmem:[#allocation3 + $0x7a0] sm:$0xf]  ;;  %v9774_v0 = vld [vmem:[#allocation3 + $0x7ac] sm:$0xf0]  ;;  %v7239_v4 = vor.u32 %v9742_v62, %v7238_v61  ;;  %4817 = vmatpush.bf16.msrb.mxu0 %v6983_v1 }
  0x3e   :  { %v6966_v2 = vld [vmem:[#allocation3 + $0x480] sm:$0xf]  ;;  %v9674_v5 = vld [vmem:[#allocation3 + $0x48c] sm:$0xf0]  ;;  %v7367_v8 = vor.u32 %v9774_v0, %v7366_v63  ;;  %4830 = vmatpush.bf16.msrb.mxu1 %v7111_v3 }
  0x3f   :  { %v7094_v6 = vld [vmem:[#allocation3 + $0x580] sm:$0xf]  ;;  %v9706_v7 = vld [vmem:[#allocation3 + $0x58c] sm:$0xf0]  ;;  %v6967_v15 = vor.u32 %v9674_v5, %v6966_v2  ;;  %4843 = vmatpush.bf16.msrb.mxu2 %v7239_v4 }
  0x40   :  { %v7222_v9 = vld [vmem:[#allocation3 + $0x680] sm:$0xf]  ;;  %v9738_v10 = vld [vmem:[#allocation3 + $0x68c] sm:$0xf0]  ;;  %v7095_v21 = vor.u32 %v9706_v7, %v7094_v6  ;;  %4856 = vmatpush.bf16.msrb.mxu3 %v7367_v8 }
  0x41   :  { %v7350_v11 = vld [vmem:[#allocation3 + $0x780] sm:$0xf]  ;;  %v9770_v12 = vld [vmem:[#allocation3 + $0x78c] sm:$0xf0]  ;;  %v7223_v22 = vor.u32 %v9738_v10, %v7222_v9  ;;  %4818 = vmatpush.bf16.msrb.mxu0 %v6967_v15 }
  0x42   :  { %v6950_v13 = vld [vmem:[#allocation3 + $0x460] sm:$0xf]  ;;  %v9670_v14 = vld [vmem:[#allocation3 + $0x46c] sm:$0xf0]  ;;  %v7351_v25 = vor.u32 %v9770_v12, %v7350_v11  ;;  %4831 = vmatpush.bf16.msrb.mxu1 %v7095_v21 }
  0x43   :  { %v7078_v16 = vld [vmem:[#allocation3 + $0x560] sm:$0xf]  ;;  %v9702_v17 = vld [vmem:[#allocation3 + $0x56c] sm:$0xf0]  ;;  %v6951_v30 = vor.u32 %v9670_v14, %v6950_v13  ;;  %4844 = vmatpush.bf16.msrb.mxu2 %v7223_v22 }
  0x44   :  { %v7206_v18 = vld [vmem:[#allocation3 + $0x660] sm:$0xf]  ;;  %v9734_v19 = vld [vmem:[#allocation3 + $0x66c] sm:$0xf0]  ;;  %v7079_v31 = vor.u32 %v9702_v17, %v7078_v16  ;;  %4857 = vmatpush.bf16.msrb.mxu3 %v7351_v25 }
  0x45   :  { %v10501_v23 = vld.sshfl [vmem:[#allocation1 + $0x10] sm:$0xff pattern:$0x73625140]  ;;  %v10503_v24 = vld.sshfl [vmem:[#allocation1] sm:$0xff pattern:$0x73625140]  ;;  %v7207_v32 = vor.u32 %v9734_v19, %v7206_v18  ;;  %4819 = vmatpush.bf16.msrb.mxu0 %v6951_v30 }
  0x46   :  { %4797 = vmatmul.bf16.vlgmr.msra.gmra.mxu2 %v10501_v23  ;;  %v10506_v26 = vld.sshfl [vmem:[#allocation1 + $0x18] sm:$0xff pattern:$0x73625140]  ;;  %v10508_v27 = vld.sshfl [vmem:[#allocation1 + $0x8] sm:$0xff pattern:$0x73625140]  ;;  %4771 = vmatmul.bf16.vlgmr.msra.gmra.mxu0 %v10503_v24 }
  0x47   :  { %v7334_v28 = vld [vmem:[#allocation3 + $0x760] sm:$0xf]  ;;  %v9766_v29 = vld [vmem:[#allocation3 + $0x76c] sm:$0xf0]  ;;  %4810 = vmatmul.bf16.vlgmr.msra.gmra.mxu3 %v10506_v26  ;;  %876 = vst [vmem:[#allocation1] ss:$4 sm:$0xff] %v90_v20  ;;  %4784 = vmatmul.bf16.vlgmr.msra.gmra.mxu1 %v10508_v27 }
  0x48   :  { %v6934_v33 = vld [vmem:[#allocation3 + $0x440] sm:$0xf]  ;;  %v9666_v34 = vld [vmem:[#allocation3 + $0x44c] sm:$0xf0]  ;;  %v7335_v36 = vor.u32 %v9766_v29, %v7334_v28  ;;  %4832 = vmatpush.bf16.msrb.mxu1 %v7079_v31  ;;  %4845 = vmatpush.bf16.msrb.mxu2 %v7207_v32 }
  0x49   :  { %v7062_v35 = vld [vmem:[#allocation3 + $0x540] sm:$0xf]  ;;  %v9698_v37 = vld [vmem:[#allocation3 + $0x54c] sm:$0xf0]  ;;  %v6935_v42 = vor.u32 %v9666_v34, %v6934_v33 }
  0x4a   :  { %v7190_v38 = vld [vmem:[#allocation3 + $0x640] sm:$0xf]  ;;  %v9730_v39 = vld [vmem:[#allocation3 + $0x64c] sm:$0xf0]  ;;  %v7063_v45 = vor.u32 %v9698_v37, %v7062_v35  ;;  %4858 = vmatpush.bf16.msrb.mxu3 %v7335_v36 }
  0x4b   :  { %v7318_v40 = vld [vmem:[#allocation3 + $0x740] sm:$0xf]  ;;  %v9762_v41 = vld [vmem:[#allocation3 + $0x74c] sm:$0xf0]  ;;  %v7191_v46 = vor.u32 %v9730_v39, %v7190_v38  ;;  %4820 = vmatpush.bf16.msrb.mxu0 %v6935_v42 }
  0x4c   :  { %v6918_v43 = vld [vmem:[#allocation3 + $0x420] sm:$0xf]  ;;  %v9662_v44 = vld [vmem:[#allocation3 + $0x42c] sm:$0xf0]  ;;  %v7319_v50 = vor.u32 %v9762_v41, %v7318_v40  ;;  %4833 = vmatpush.bf16.msrb.mxu1 %v7063_v45 }
  0x4d   :  { %v7046_v47 = vld [vmem:[#allocation3 + $0x520] sm:$0xf]  ;;  %v9694_v48 = vld [vmem:[#allocation3 + $0x52c] sm:$0xf0]  ;;  %v6919_v56 = vor.u32 %v9662_v44, %v6918_v43  ;;  %4846 = vmatpush.bf16.msrb.mxu2 %v7191_v46 }
  0x4e   :  { %v7174_v49 = vld [vmem:[#allocation3 + $0x620] sm:$0xf]  ;;  %v9726_v51 = vld [vmem:[#allocation3 + $0x62c] sm:$0xf0]  ;;  %v7047_v60 = vor.u32 %v9694_v48, %v7046_v47  ;;  %4859 = vmatpush.bf16.msrb.mxu3 %v7319_v50 }
  0x4f   :  { %v7302_v52 = vld [vmem:[#allocation3 + $0x720] sm:$0xf]  ;;  %v9758_v54 = vld [vmem:[#allocation3 + $0x72c] sm:$0xf0]  ;;  %v7175_v61 = vor.u32 %v9726_v51, %v7174_v49  ;;  %4821 = vmatpush.bf16.msrb.mxu0 %v6919_v56 }
  0x50   :  { %v89_v53 = vld [vmem:[%s10749_s0 + $0x8] sm:$0xff]  ;;  %v9658_v57 = vld [vmem:[#allocation3 + $0x40c] sm:$0xf0]  ;;  %v7303_v1 = vor.u32 %v9758_v54, %v7302_v52  ;;  %4834 = vmatpush.bf16.msrb.mxu1 %v7047_v60 }
  0x51   :  { %v6902_v55 = vld [vmem:[#allocation3 + $0x400] sm:$0xf]  ;;  %866 = vst [vmem:[#allocation1 + $0x20] ss:$4 sm:$0xff] %v89_v53  ;;  %v9690_v59 = vld [vmem:[#allocation3 + $0x50c] sm:$0xf0]  ;;  %4847 = vmatpush.bf16.msrb.mxu2 %v7175_v61 }
  0x52   :  { %v7030_v58 = vld [vmem:[#allocation3 + $0x500] sm:$0xf]  ;;  %v9722_v63 = vld [vmem:[#allocation3 + $0x60c] sm:$0xf0]  ;;  %v6903_v8 = vor.u32 %v9658_v57, %v6902_v55  ;;  %4860 = vmatpush.bf16.msrb.mxu3 %v7303_v1 }
  0x53   :  { %v7158_v62 = vld [vmem:[#allocation3 + $0x600] sm:$0xf]  ;;  %v9754_v2 = vld [vmem:[#allocation3 + $0x70c] sm:$0xf0]  ;;  %v7031_v12 = vor.u32 %v9690_v59, %v7030_v58 }
  0x54   :  { %v7286_v0 = vld [vmem:[#allocation3 + $0x700] sm:$0xf]  ;;  %v9814_v4 = vld [vmem:[#allocation3 + $0x8ec] sm:$0xf0]  ;;  %v7159_v13 = vor.u32 %v9722_v63, %v7158_v62  ;;  %4822 = vmatpush.bf16.msrb.mxu0 %v6903_v8 }
  0x55   :  { %v7526_v3 = vld [vmem:[#allocation3 + $0x8e0] sm:$0xf]  ;;  %v9846_v6 = vld [vmem:[#allocation3 + $0x9ec] sm:$0xf0]  ;;  %v7287_v17 = vor.u32 %v9754_v2, %v7286_v0  ;;  %4835 = vmatpush.bf16.msrb.mxu1 %v7031_v12 }
  0x56   :  { %v7654_v5 = vld [vmem:[#allocation3 + $0x9e0] sm:$0xf]  ;;  %v9878_v9 = vld [vmem:[#allocation3 + $0xaec] sm:$0xf0]  ;;  %v7527_v18 = vor.u32 %v9814_v4, %v7526_v3  ;;  %4848 = vmatpush.bf16.msrb.mxu2 %v7159_v13 }
  0x57   :  { %v7782_v7 = vld [vmem:[#allocation3 + $0xae0] sm:$0xf]  ;;  %v9910_v11 = vld [vmem:[#allocation3 + $0xbec] sm:$0xf0]  ;;  %v7655_v25 = vor.u32 %v9846_v6, %v7654_v5  ;;  %4861 = vmatpush.bf16.msrb.mxu3 %v7287_v17 }
  0x58   :  { %v7910_v10 = vld [vmem:[#allocation3 + $0xbe0] sm:$0xf]  ;;  %v9810_v15 = vld [vmem:[#allocation3 + $0x8cc] sm:$0xf0]  ;;  %v7783_v28 = vor.u32 %v9878_v9, %v7782_v7  ;;  %4867 = vmatpush.bf16.msra.mxu0 %v7527_v18 }
  0x59   :  { %v7510_v14 = vld [vmem:[#allocation3 + $0x8c0] sm:$0xf]  ;;  %v91_v16 = vld [vmem:[%s10749_s0 + $0x18] sm:$0xff]  ;;  %v10519_v21 = vld.sshfl [vmem:[#allocation1 + $0x30] sm:$0xff pattern:$0x73625140]  ;;  %v7911_v31 = vor.u32 %v9910_v11, %v7910_v10  ;;  %4880 = vmatpush.bf16.msra.mxu1 %v7655_v25 }
  0x5a   :  { %v7638_v19 = vld [vmem:[#allocation3 + $0x9c0] sm:$0xf]  ;;  %v9842_v20 = vld [vmem:[#allocation3 + $0x9cc] sm:$0xf0]  ;;  %v7511_v36 = vor.u32 %v9810_v15, %v7510_v14  ;;  %4893 = vmatpush.bf16.msra.mxu2 %v7783_v28 }
  0x5b   :  { %v10521_v22 = vld.sshfl [vmem:[#allocation1 + $0x20] sm:$0xff pattern:$0x73625140]  ;;  %v10523_v29 = vld.sshfl [vmem:[#allocation1 + $0x38] sm:$0xff pattern:$0x73625140]  ;;  %v7639_v37 = vor.u32 %v9842_v20, %v7638_v19  ;;  %4906 = vmatpush.bf16.msra.mxu3 %v7911_v31  ;;  %4849 = vmatmul.bf16.vlgmr.msrb.gmra.mxu2 %v10519_v21 }
  0x5c   :  { %v10525_v30 = vld.sshfl [vmem:[#allocation1 + $0x28] sm:$0xff pattern:$0x73625140]  ;;  %v9874_v33 = vld [vmem:[#allocation3 + $0xacc] sm:$0xf0]  ;;  %4823 = vmatmul.bf16.vlgmr.msrb.gmra.mxu0 %v10521_v22  ;;  %4862 = vmatmul.bf16.vlgmr.msrb.gmra.mxu3 %v10523_v29 }
  0x5d   :  { %v7766_v32 = vld [vmem:[#allocation3 + $0xac0] sm:$0xf]  ;;  %878 = vst [vmem:[#allocation1 + $0x20] ss:$4 sm:$0xff] %v91_v16  ;;  %v9906_v35 = vld [vmem:[#allocation3 + $0xbcc] sm:$0xf0]  ;;  %4868 = vmatpush.bf16.msra.mxu0 %v7511_v36  ;;  %4836 = vmatmul.bf16.vlgmr.msrb.gmra.mxu1 %v10525_v30 }
  0x5e   :  { %v7894_v34 = vld [vmem:[#allocation3 + $0xbc0] sm:$0xf]  ;;  %v7767_v38 = vor.u32 %v9874_v33, %v7766_v32  ;;  %v9806_v40 = vld [vmem:[#allocation3 + $0x8ac] sm:$0xf0]  ;;  %4881 = vmatpush.bf16.msra.mxu1 %v7639_v37 }
  0x5f   :  { %v7494_v39 = vld [vmem:[#allocation3 + $0x8a0] sm:$0xf]  ;;  %v7895_v42 = vor.u32 %v9906_v35, %v7894_v34  ;;  %v9838_v43 = vld [vmem:[#allocation3 + $0x9ac] sm:$0xf0] }
  0x60   :  { %v7622_v41 = vld [vmem:[#allocation3 + $0x9a0] sm:$0xf]  ;;  %v9870_v45 = vld [vmem:[#allocation3 + $0xaac] sm:$0xf0]  ;;  %v7495_v48 = vor.u32 %v9806_v40, %v7494_v39  ;;  %4894 = vmatpush.bf16.msra.mxu2 %v7767_v38 }
  0x61   :  { %v7750_v44 = vld [vmem:[#allocation3 + $0xaa0] sm:$0xf]  ;;  %v9902_v47 = vld [vmem:[#allocation3 + $0xbac] sm:$0xf0]  ;;  %v7623_v49 = vor.u32 %v9838_v43, %v7622_v41  ;;  %4907 = vmatpush.bf16.msra.mxu3 %v7895_v42 }
  0x62   :  { %v7878_v46 = vld [vmem:[#allocation3 + $0xba0] sm:$0xf]  ;;  %v7751_v50 = vor.u32 %v9870_v45, %v7750_v44  ;;  %v9802_v52 = vld [vmem:[#allocation3 + $0x88c] sm:$0xf0]  ;;  %4869 = vmatpush.bf16.msra.mxu0 %v7495_v48 }
  0x63   :  { %v7478_v51 = vld [vmem:[#allocation3 + $0x880] sm:$0xf]  ;;  %v7879_v54 = vor.u32 %v9902_v47, %v7878_v46  ;;  %v9834_v55 = vld [vmem:[#allocation3 + $0x98c] sm:$0xf0]  ;;  %4882 = vmatpush.bf16.msra.mxu1 %v7623_v49 }
  0x64   :  { %v7606_v53 = vld [vmem:[#allocation3 + $0x980] sm:$0xf]  ;;  %v9866_v57 = vld [vmem:[#allocation3 + $0xa8c] sm:$0xf0]  ;;  %v7479_v60 = vor.u32 %v9802_v52, %v7478_v51  ;;  %4895 = vmatpush.bf16.msra.mxu2 %v7751_v50 }
  0x65   :  { %v7734_v56 = vld [vmem:[#allocation3 + $0xa80] sm:$0xf]  ;;  %v9898_v59 = vld [vmem:[#allocation3 + $0xb8c] sm:$0xf0]  ;;  %v7607_v61 = vor.u32 %v9834_v55, %v7606_v53  ;;  %4908 = vmatpush.bf16.msra.mxu3 %v7879_v54 }
  0x66   :  { %v7862_v58 = vld [vmem:[#allocation3 + $0xb80] sm:$0xf]  ;;  %v7735_v62 = vor.u32 %v9866_v57, %v7734_v56  ;;  %v9798_v0 = vld [vmem:[#allocation3 + $0x86c] sm:$0xf0]  ;;  %4870 = vmatpush.bf16.msra.mxu0 %v7479_v60 }
  0x67   :  { %v7462_v63 = vld [vmem:[#allocation3 + $0x860] sm:$0xf]  ;;  %v7863_v2 = vor.u32 %v9898_v59, %v7862_v58  ;;  %v9830_v3 = vld [vmem:[#allocation3 + $0x96c] sm:$0xf0]  ;;  %4883 = vmatpush.bf16.msra.mxu1 %v7607_v61 }
  0x68   :  { %v7590_v1 = vld [vmem:[#allocation3 + $0x960] sm:$0xf]  ;;  %v9862_v5 = vld [vmem:[#allocation3 + $0xa6c] sm:$0xf0]  ;;  %v7463_v8 = vor.u32 %v9798_v0, %v7462_v63  ;;  %4896 = vmatpush.bf16.msra.mxu2 %v7735_v62 }
  0x69   :  { %v7718_v4 = vld [vmem:[#allocation3 + $0xa60] sm:$0xf]  ;;  %v9894_v7 = vld [vmem:[#allocation3 + $0xb6c] sm:$0xf0]  ;;  %v7591_v9 = vor.u32 %v9830_v3, %v7590_v1  ;;  %4909 = vmatpush.bf16.msra.mxu3 %v7863_v2 }
  0x6a   :  { %v7846_v6 = vld [vmem:[#allocation3 + $0xb60] sm:$0xf]  ;;  %v7719_v10 = vor.u32 %v9862_v5, %v7718_v4  ;;  %v9794_v12 = vld [vmem:[#allocation3 + $0x84c] sm:$0xf0]  ;;  %4871 = vmatpush.bf16.msra.mxu0 %v7463_v8 }
  0x6b   :  { %v7446_v11 = vld [vmem:[#allocation3 + $0x840] sm:$0xf]  ;;  %v7847_v14 = vor.u32 %v9894_v7, %v7846_v6  ;;  %v9826_v15 = vld [vmem:[#allocation3 + $0x94c] sm:$0xf0]  ;;  %4884 = vmatpush.bf16.msra.mxu1 %v7591_v9 }
  0x6c   :  { %v7574_v13 = vld [vmem:[#allocation3 + $0x940] sm:$0xf]  ;;  %v9858_v17 = vld [vmem:[#allocation3 + $0xa4c] sm:$0xf0]  ;;  %v7447_v20 = vor.u32 %v9794_v12, %v7446_v11  ;;  %4897 = vmatpush.bf16.msra.mxu2 %v7719_v10 }
  0x6d   :  { %v7702_v16 = vld [vmem:[#allocation3 + $0xa40] sm:$0xf]  ;;  %v9890_v19 = vld [vmem:[#allocation3 + $0xb4c] sm:$0xf0]  ;;  %v7575_v25 = vor.u32 %v9826_v15, %v7574_v13  ;;  %4910 = vmatpush.bf16.msra.mxu3 %v7847_v14 }
  0x6e   :  { %v7830_v18 = vld [vmem:[#allocation3 + $0xb40] sm:$0xf]  ;;  %v7703_v28 = vor.u32 %v9858_v17, %v7702_v16  ;;  %v9790_v32 = vld [vmem:[#allocation3 + $0x82c] sm:$0xf0]  ;;  %4872 = vmatpush.bf16.msra.mxu0 %v7447_v20 }
  0x6f   :  { %v7430_v31 = vld [vmem:[#allocation3 + $0x820] sm:$0xf]  ;;  %v7831_v34 = vor.u32 %v9890_v19, %v7830_v18  ;;  %v9822_v35 = vld [vmem:[#allocation3 + $0x92c] sm:$0xf0]  ;;  %4885 = vmatpush.bf16.msra.mxu1 %v7575_v25 }
  0x70   :  { %v7558_v33 = vld [vmem:[#allocation3 + $0x920] sm:$0xf]  ;;  %v9854_v37 = vld [vmem:[#allocation3 + $0xa2c] sm:$0xf0]  ;;  %v7431_v40 = vor.u32 %v9790_v32, %v7430_v31  ;;  %4898 = vmatpush.bf16.msra.mxu2 %v7703_v28 }
  0x71   :  { %v7686_v36 = vld [vmem:[#allocation3 + $0xa20] sm:$0xf]  ;;  %v9886_v39 = vld [vmem:[#allocation3 + $0xb2c] sm:$0xf0]  ;;  %v7559_v43 = vor.u32 %v9822_v35, %v7558_v33  ;;  %4911 = vmatpush.bf16.msra.mxu3 %v7831_v34 }
  0x72   :  { %v7814_v38 = vld [vmem:[#allocation3 + $0xb20] sm:$0xf]  ;;  %v9786_v42 = vld [vmem:[#allocation3 + $0x80c] sm:$0xf0]  ;;  %v7687_v44 = vor.u32 %v9854_v37, %v7686_v36  ;;  %4873 = vmatpush.bf16.msra.mxu0 %v7431_v40 }
  0x73   :  { %v7414_v41 = vld [vmem:[#allocation3 + $0x800] sm:$0xf]  ;;  %v9818_v46 = vld [vmem:[#allocation3 + $0x90c] sm:$0xf0]  ;;  %v7815_v48 = vor.u32 %v9886_v39, %v7814_v38  ;;  %4886 = vmatpush.bf16.msra.mxu1 %v7559_v43 }
  0x74   :  { %v7542_v45 = vld [vmem:[#allocation3 + $0x900] sm:$0xf]  ;;  %v9850_v49 = vld [vmem:[#allocation3 + $0xa0c] sm:$0xf0]  ;;  %v7415_v55 = vor.u32 %v9786_v42, %v7414_v41  ;;  %4899 = vmatpush.bf16.msra.mxu2 %v7687_v44 }
  0x75   :  { %v7670_v47 = vld [vmem:[#allocation3 + $0xa00] sm:$0xf]  ;;  %v9882_v51 = vld [vmem:[#allocation3 + $0xb0c] sm:$0xf0]  ;;  %v7543_v59 = vor.u32 %v9818_v46, %v7542_v45  ;;  %4912 = vmatpush.bf16.msra.mxu3 %v7815_v48 }
  0x76   :  { %v7798_v50 = vld [vmem:[#allocation3 + $0xb00] sm:$0xf]  ;;  %v9942_v53 = vld [vmem:[#allocation3 + $0xcec] sm:$0xf0]  ;;  %v7671_v60 = vor.u32 %v9850_v49, %v7670_v47  ;;  %4874 = vmatpush.bf16.msra.mxu0 %v7415_v55 }
  0x77   :  { %v8038_v52 = vld [vmem:[#allocation3 + $0xce0] sm:$0xf]  ;;  %v9974_v56 = vld [vmem:[#allocation3 + $0xdec] sm:$0xf0]  ;;  %v7799_v63 = vor.u32 %v9882_v51, %v7798_v50  ;;  %4887 = vmatpush.bf16.msra.mxu1 %v7543_v59 }
  0x78   :  { %v8166_v54 = vld [vmem:[#allocation3 + $0xde0] sm:$0xf]  ;;  %v10006_v58 = vld [vmem:[#allocation3 + $0xeec] sm:$0xf0]  ;;  %v8039_v0 = vor.u32 %v9942_v53, %v8038_v52  ;;  %4900 = vmatpush.bf16.msra.mxu2 %v7671_v60 }
  0x79   :  { %v8294_v57 = vld [vmem:[#allocation3 + $0xee0] sm:$0xf]  ;;  %v10038_v62 = vld [vmem:[#allocation3 + $0xfec] sm:$0xf0]  ;;  %v8167_v1 = vor.u32 %v9974_v56, %v8166_v54  ;;  %4913 = vmatpush.bf16.msra.mxu3 %v7799_v63 }
  0x7a   :  { %v8422_v61 = vld [vmem:[#allocation3 + $0xfe0] sm:$0xf]  ;;  %v8295_v2 = vor.u32 %v10006_v58, %v8294_v57  ;;  %v10531_v3 = vld.sshfl [vmem:[#allocation1] sm:$0xff pattern:$0x73625140]  ;;  %4919 = vmatpush.bf16.msrb.mxu0 %v8039_v0 }
  0x7b   :  { %v8022_v4 = vld [vmem:[#allocation3 + $0xcc0] sm:$0xf]  ;;  %v9938_v5 = vld [vmem:[#allocation3 + $0xccc] sm:$0xf0]  ;;  %v8423_v7 = vor.u32 %v10038_v62, %v8422_v61  ;;  %4932 = vmatpush.bf16.msrb.mxu1 %v8167_v1  ;;  %4875 = vmatmul.bf16.vlgmr.msra.gmra.mxu0 %v10531_v3 }
  0x7c   :  { %v8150_v6 = vld [vmem:[#allocation3 + $0xdc0] sm:$0xf]  ;;  %v10533_v8 = vld.sshfl [vmem:[#allocation1 + $0x10] sm:$0xff pattern:$0x73625140]  ;;  %v8023_v16 = vor.u32 %v9938_v5, %v8022_v4  ;;  %4945 = vmatpush.bf16.msrb.mxu2 %v8295_v2 }
  0x7d   :  { %v9970_v9 = vld [vmem:[#allocation3 + $0xdcc] sm:$0xf0]  ;;  %v8278_v10 = vld [vmem:[#allocation3 + $0xec0] sm:$0xf]  ;;  %4958 = vmatpush.bf16.msrb.mxu3 %v8423_v7  ;;  %4901 = vmatmul.bf16.vlgmr.msra.gmra.mxu2 %v10533_v8 }
  0x7e   :  { %v10002_v11 = vld [vmem:[#allocation3 + $0xecc] sm:$0xf0]  ;;  %v8406_v12 = vld [vmem:[#allocation3 + $0xfc0] sm:$0xf]  ;;  %v8151_v17 = vor.u32 %v9970_v9, %v8150_v6  ;;  %4920 = vmatpush.bf16.msrb.mxu0 %v8023_v16 }
  0x7f   :  { %v10034_v13 = vld [vmem:[#allocation3 + $0xfcc] sm:$0xf0]  ;;  %v10535_v14 = vld.sshfl [vmem:[#allocation1 + $0x8] sm:$0xff pattern:$0x73625140]  ;;  %v8279_v18 = vor.u32 %v10002_v11, %v8278_v10 }
  0x80   :  { %v10537_v15 = vld.sshfl [vmem:[#allocation1 + $0x18] sm:$0xff pattern:$0x73625140]  ;;  %v8006_v19 = vld [vmem:[#allocation3 + $0xca0] sm:$0xf]  ;;  %v8407_v28 = vor.u32 %v10034_v13, %v8406_v12  ;;  %4888 = vmatmul.bf16.vlgmr.msra.gmra.mxu1 %v10535_v14 }
  0x81   :  { %v9934_v20 = vld [vmem:[#allocation3 + $0xcac] sm:$0xf0]  ;;  %v8134_v25 = vld [vmem:[#allocation3 + $0xda0] sm:$0xf]  ;;  %4914 = vmatmul.bf16.vlgmr.msra.gmra.mxu3 %v10537_v15  ;;  %4933 = vmatpush.bf16.msrb.mxu1 %v8151_v17 }
  0x82   :  { %v9966_v31 = vld [vmem:[#allocation3 + $0xdac] sm:$0xf0]  ;;  %v8262_v32 = vld [vmem:[#allocation3 + $0xea0] sm:$0xf]  ;;  %v8007_v36 = vor.u32 %v9934_v20, %v8006_v19  ;;  %4946 = vmatpush.bf16.msrb.mxu2 %v8279_v18  ;;  %4959 = vmatpush.bf16.msrb.mxu3 %v8407_v28 }
  0x83   :  { %v9998_v33 = vld [vmem:[#allocation3 + $0xeac] sm:$0xf0]  ;;  %v8390_v34 = vld [vmem:[#allocation3 + $0xfa0] sm:$0xf]  ;;  %v8135_v37 = vor.u32 %v9966_v31, %v8134_v25 }
  0x84   :  { %v10030_v35 = vld [vmem:[#allocation3 + $0xfac] sm:$0xf0]  ;;  %v8263_v38 = vor.u32 %v9998_v33, %v8262_v32  ;;  %v7990_v39 = vld [vmem:[#allocation3 + $0xc80] sm:$0xf]  ;;  %4921 = vmatpush.bf16.msrb.mxu0 %v8007_v36 }
  0x85   :  { %v9930_v40 = vld [vmem:[#allocation3 + $0xc8c] sm:$0xf0]  ;;  %v8118_v41 = vld [vmem:[#allocation3 + $0xd80] sm:$0xf]  ;;  %v8391_v42 = vor.u32 %v10030_v35, %v8390_v34  ;;  %4934 = vmatpush.bf16.msrb.mxu1 %v8135_v37 }
  0x86   :  { %v9962_v43 = vld [vmem:[#allocation3 + $0xd8c] sm:$0xf0]  ;;  %v8246_v44 = vld [vmem:[#allocation3 + $0xe80] sm:$0xf]  ;;  %v7991_v48 = vor.u32 %v9930_v40, %v7990_v39  ;;  %4947 = vmatpush.bf16.msrb.mxu2 %v8263_v38 }
  0x87   :  { %v9994_v45 = vld [vmem:[#allocation3 + $0xe8c] sm:$0xf0]  ;;  %v8374_v46 = vld [vmem:[#allocation3 + $0xf80] sm:$0xf]  ;;  %v8119_v49 = vor.u32 %v9962_v43, %v8118_v41  ;;  %4960 = vmatpush.bf16.msrb.mxu3 %v8391_v42 }
  0x88   :  { %v10026_v47 = vld [vmem:[#allocation3 + $0xf8c] sm:$0xf0]  ;;  %v8247_v50 = vor.u32 %v9994_v45, %v8246_v44  ;;  %v7974_v51 = vld [vmem:[#allocation3 + $0xc60] sm:$0xf]  ;;  %4922 = vmatpush.bf16.msrb.mxu0 %v7991_v48  ;;  %v92_v48 = vld [vmem:[%s10749_s0 + $0x20] sm:$0xff] }
  0x89   :  { %v9926_v52 = vld [vmem:[#allocation3 + $0xc6c] sm:$0xf0]  ;;  %v8102_v53 = vld [vmem:[#allocation3 + $0xd60] sm:$0xf]  ;;  %v8375_v54 = vor.u32 %v10026_v47, %v8374_v46  ;;  %4935 = vmatpush.bf16.msrb.mxu1 %v8119_v49  ;;  %888 = vst [vmem:[#allocation1] ss:$4 sm:$0xff] %v92_v48 }
  0x8a   :  { %v9958_v55 = vld [vmem:[#allocation3 + $0xd6c] sm:$0xf0]  ;;  %v8230_v56 = vld [vmem:[#allocation3 + $0xe60] sm:$0xf]  ;;  %v7975_v60 = vor.u32 %v9926_v52, %v7974_v51  ;;  %4948 = vmatpush.bf16.msrb.mxu2 %v8247_v50 }
  0x8b   :  { %v9990_v57 = vld [vmem:[#allocation3 + $0xe6c] sm:$0xf0]  ;;  %v8358_v58 = vld [vmem:[#allocation3 + $0xf60] sm:$0xf]  ;;  %v8103_v61 = vor.u32 %v9958_v55, %v8102_v53  ;;  %4961 = vmatpush.bf16.msrb.mxu3 %v8375_v54 }
  0x8c   :  { %v10022_v59 = vld [vmem:[#allocation3 + $0xf6c] sm:$0xf0]  ;;  %v8231_v62 = vor.u32 %v9990_v57, %v8230_v56  ;;  %v7958_v63 = vld [vmem:[#allocation3 + $0xc40] sm:$0xf]  ;;  %4923 = vmatpush.bf16.msrb.mxu0 %v7975_v60 }
  0x8d   :  { %v9922_v0 = vld [vmem:[#allocation3 + $0xc4c] sm:$0xf0]  ;;  %v8086_v1 = vld [vmem:[#allocation3 + $0xd40] sm:$0xf]  ;;  %v8359_v2 = vor.u32 %v10022_v59, %v8358_v58  ;;  %4936 = vmatpush.bf16.msrb.mxu1 %v8103_v61 }
  0x8e   :  { %v9954_v4 = vld [vmem:[#allocation3 + $0xd4c] sm:$0xf0]  ;;  %v8214_v5 = vld [vmem:[#allocation3 + $0xe40] sm:$0xf]  ;;  %v7959_v10 = vor.u32 %v9922_v0, %v7958_v63  ;;  %4949 = vmatpush.bf16.msrb.mxu2 %v8231_v62 }
  0x8f   :  { %v9986_v6 = vld [vmem:[#allocation3 + $0xe4c] sm:$0xf0]  ;;  %v8342_v7 = vld [vmem:[#allocation3 + $0xf40] sm:$0xf]  ;;  %v8087_v11 = vor.u32 %v9954_v4, %v8086_v1  ;;  %4962 = vmatpush.bf16.msrb.mxu3 %v8359_v2 }
  0x90   :  { %v10018_v9 = vld [vmem:[#allocation3 + $0xf4c] sm:$0xf0]  ;;  %v8215_v12 = vor.u32 %v9986_v6, %v8214_v5  ;;  %v7942_v13 = vld [vmem:[#allocation3 + $0xc20] sm:$0xf]  ;;  %4924 = vmatpush.bf16.msrb.mxu0 %v7959_v10 }
  0x91   :  { %v9918_v16 = vld [vmem:[#allocation3 + $0xc2c] sm:$0xf0]  ;;  %v8070_v17 = vld [vmem:[#allocation3 + $0xd20] sm:$0xf]  ;;  %v8343_v18 = vor.u32 %v10018_v9, %v8342_v7  ;;  %4937 = vmatpush.bf16.msrb.mxu1 %v8087_v11 }
  0x92   :  { %v9950_v19 = vld [vmem:[#allocation3 + $0xd2c] sm:$0xf0]  ;;  %v8198_v20 = vld [vmem:[#allocation3 + $0xe20] sm:$0xf]  ;;  %v7943_v33 = vor.u32 %v9918_v16, %v7942_v13  ;;  %4950 = vmatpush.bf16.msrb.mxu2 %v8215_v12 }
  0x93   :  { %v9982_v25 = vld [vmem:[#allocation3 + $0xe2c] sm:$0xf0]  ;;  %v8326_v28 = vld [vmem:[#allocation3 + $0xf20] sm:$0xf]  ;;  %v8071_v37 = vor.u32 %v9950_v19, %v8070_v17  ;;  %4963 = vmatpush.bf16.msrb.mxu3 %v8343_v18 }
  0x94   :  { %v10014_v31 = vld [vmem:[#allocation3 + $0xf2c] sm:$0xf0]  ;;  %v7926_v32 = vld [vmem:[#allocation3 + $0xc00] sm:$0xf]  ;;  %v8199_v38 = vor.u32 %v9982_v25, %v8198_v20  ;;  %4925 = vmatpush.bf16.msrb.mxu0 %v7943_v33 }
  0x95   :  { %v9914_v34 = vld [vmem:[#allocation3 + $0xc0c] sm:$0xf0]  ;;  %v8054_v35 = vld [vmem:[#allocation3 + $0xd00] sm:$0xf]  ;;  %v8327_v42 = vor.u32 %v10014_v31, %v8326_v28  ;;  %4938 = vmatpush.bf16.msrb.mxu1 %v8071_v37 }
  0x96   :  { %v9946_v36 = vld [vmem:[#allocation3 + $0xd0c] sm:$0xf0]  ;;  %v8182_v39 = vld [vmem:[#allocation3 + $0xe00] sm:$0xf]  ;;  %v7927_v49 = vor.u32 %v9914_v34, %v7926_v32  ;;  %4951 = vmatpush.bf16.msrb.mxu2 %v8199_v38 }
  0x97   :  { %v9978_v40 = vld [vmem:[#allocation3 + $0xe0c] sm:$0xf0]  ;;  %v8310_v41 = vld [vmem:[#allocation3 + $0xf00] sm:$0xf]  ;;  %v8055_v52 = vor.u32 %v9946_v36, %v8054_v35  ;;  %4964 = vmatpush.bf16.msrb.mxu3 %v8327_v42 }
  0x98   :  { %v10010_v43 = vld [vmem:[#allocation3 + $0xf0c] sm:$0xf0]  ;;  %v8550_v44 = vld [vmem:[#allocation3 + $0x10e0] sm:$0xf]  ;;  %v8183_v53 = vor.u32 %v9978_v40, %v8182_v39  ;;  %4926 = vmatpush.bf16.msrb.mxu0 %v7927_v49 }
  0x99   :  { %v10070_v45 = vld [vmem:[#allocation3 + $0x10ec] sm:$0xf0]  ;;  %v8678_v46 = vld [vmem:[#allocation3 + $0x11e0] sm:$0xf]  ;;  %v8311_v56 = vor.u32 %v10010_v43, %v8310_v41  ;;  %4939 = vmatpush.bf16.msrb.mxu1 %v8055_v52 }
  0x9a   :  { %v10102_v47 = vld [vmem:[#allocation3 + $0x11ec] sm:$0xf0]  ;;  %v8806_v50 = vld [vmem:[#allocation3 + $0x12e0] sm:$0xf]  ;;  %v8551_v57 = vor.u32 %v10070_v45, %v8550_v44  ;;  %4952 = vmatpush.bf16.msrb.mxu2 %v8183_v53 }
  0x9b   :  { %v10134_v51 = vld [vmem:[#allocation3 + $0x12ec] sm:$0xf0]  ;;  %v8934_v54 = vld [vmem:[#allocation3 + $0x13e0] sm:$0xf]  ;;  %v8679_v58 = vor.u32 %v10102_v47, %v8678_v46  ;;  %4965 = vmatpush.bf16.msrb.mxu3 %v8311_v56 }
  0x9c   :  { %v10166_v55 = vld [vmem:[#allocation3 + $0x13ec] sm:$0xf0]  ;;  %v8807_v59 = vor.u32 %v10134_v51, %v8806_v50  ;;  %v10546_v60 = vld.sshfl [vmem:[#allocation1 + $0x20] sm:$0xff pattern:$0x73625140]  ;;  %4971 = vmatpush.bf16.msra.mxu0 %v8551_v57 }
  0x9d   :  { %v8534_v61 = vld [vmem:[#allocation3 + $0x10c0] sm:$0xf]  ;;  %v10066_v62 = vld [vmem:[#allocation3 + $0x10cc] sm:$0xf0]  ;;  %v8935_v0 = vor.u32 %v10166_v55, %v8934_v54  ;;  %4984 = vmatpush.bf16.msra.mxu1 %v8679_v58  ;;  %4927 = vmatmul.bf16.vlgmr.msrb.gmra.mxu0 %v10546_v60 }
  0x9e   :  { %v8662_v63 = vld [vmem:[#allocation3 + $0x11c0] sm:$0xf]  ;;  %v10548_v1 = vld.sshfl [vmem:[#allocation1 + $0x30] sm:$0xff pattern:$0x73625140]  ;;  %v8535_v11 = vor.u32 %v10066_v62, %v8534_v61  ;;  %4997 = vmatpush.bf16.msra.mxu2 %v8807_v59 }
  0x9f   :  { %v10098_v2 = vld [vmem:[#allocation3 + $0x11cc] sm:$0xf0]  ;;  %v8790_v4 = vld [vmem:[#allocation3 + $0x12c0] sm:$0xf]  ;;  %5010 = vmatpush.bf16.msra.mxu3 %v8935_v0  ;;  %4953 = vmatmul.bf16.vlgmr.msrb.gmra.mxu2 %v10548_v1 }
  0xa0   :  { %v10130_v5 = vld [vmem:[#allocation3 + $0x12cc] sm:$0xf0]  ;;  %v8918_v6 = vld [vmem:[#allocation3 + $0x13c0] sm:$0xf]  ;;  %v8663_v12 = vor.u32 %v10098_v2, %v8662_v63  ;;  %4972 = vmatpush.bf16.msra.mxu0 %v8535_v11 }
  0xa1   :  { %v10162_v7 = vld [vmem:[#allocation3 + $0x13cc] sm:$0xf0]  ;;  %v10550_v9 = vld.sshfl [vmem:[#allocation1 + $0x28] sm:$0xff pattern:$0x73625140]  ;;  %v8791_v13 = vor.u32 %v10130_v5, %v8790_v4 }
  0xa2   :  { %v10552_v10 = vld.sshfl [vmem:[#allocation1 + $0x38] sm:$0xff pattern:$0x73625140]  ;;  %v8518_v16 = vld [vmem:[#allocation3 + $0x10a0] sm:$0xf]  ;;  %v8919_v19 = vor.u32 %v10162_v7, %v8918_v6  ;;  %4940 = vmatmul.bf16.vlgmr.msrb.gmra.mxu1 %v10550_v9 }
  0xa3   :  { %v10062_v17 = vld [vmem:[#allocation3 + $0x10ac] sm:$0xf0]  ;;  %v8646_v18 = vld [vmem:[#allocation3 + $0x11a0] sm:$0xf]  ;;  %4966 = vmatmul.bf16.vlgmr.msrb.gmra.mxu3 %v10552_v10  ;;  %4985 = vmatpush.bf16.msra.mxu1 %v8663_v12 }
  0xa4   :  { %v10094_v20 = vld [vmem:[#allocation3 + $0x11ac] sm:$0xf0]  ;;  %v8774_v25 = vld [vmem:[#allocation3 + $0x12a0] sm:$0xf]  ;;  %v8519_v33 = vor.u32 %v10062_v17, %v8518_v16  ;;  %4998 = vmatpush.bf16.msra.mxu2 %v8791_v13  ;;  %5011 = vmatpush.bf16.msra.mxu3 %v8919_v19 }
  0xa5   :  { %v10126_v28 = vld [vmem:[#allocation3 + $0x12ac] sm:$0xf0]  ;;  %v8902_v31 = vld [vmem:[#allocation3 + $0x13a0] sm:$0xf]  ;;  %v8647_v34 = vor.u32 %v10094_v20, %v8646_v18 }
  0xa6   :  { %v10158_v32 = vld [vmem:[#allocation3 + $0x13ac] sm:$0xf0]  ;;  %v8775_v35 = vor.u32 %v10126_v28, %v8774_v25  ;;  %v8502_v36 = vld [vmem:[#allocation3 + $0x1080] sm:$0xf]  ;;  %4973 = vmatpush.bf16.msra.mxu0 %v8519_v33 }
  0xa7   :  { %v10058_v37 = vld [vmem:[#allocation3 + $0x108c] sm:$0xf0]  ;;  %v8630_v38 = vld [vmem:[#allocation3 + $0x1180] sm:$0xf]  ;;  %v8903_v39 = vor.u32 %v10158_v32, %v8902_v31  ;;  %4986 = vmatpush.bf16.msra.mxu1 %v8647_v34 }
  0xa8   :  { %v10090_v40 = vld [vmem:[#allocation3 + $0x118c] sm:$0xf0]  ;;  %v8758_v41 = vld [vmem:[#allocation3 + $0x1280] sm:$0xf]  ;;  %v8503_v45 = vor.u32 %v10058_v37, %v8502_v36  ;;  %4999 = vmatpush.bf16.msra.mxu2 %v8775_v35 }
  0xa9   :  { %v10122_v42 = vld [vmem:[#allocation3 + $0x128c] sm:$0xf0]  ;;  %v8886_v43 = vld [vmem:[#allocation3 + $0x1380] sm:$0xf]  ;;  %v8631_v46 = vor.u32 %v10090_v40, %v8630_v38  ;;  %5012 = vmatpush.bf16.msra.mxu3 %v8903_v39 }
  0xaa   :  { %v10154_v44 = vld [vmem:[#allocation3 + $0x138c] sm:$0xf0]  ;;  %v8759_v47 = vor.u32 %v10122_v42, %v8758_v41  ;;  %v8486_v48 = vld [vmem:[#allocation3 + $0x1060] sm:$0xf]  ;;  %4974 = vmatpush.bf16.msra.mxu0 %v8503_v45 }
  0xab   :  { %v10054_v49 = vld [vmem:[#allocation3 + $0x106c] sm:$0xf0]  ;;  %v8614_v50 = vld [vmem:[#allocation3 + $0x1160] sm:$0xf]  ;;  %v8887_v51 = vor.u32 %v10154_v44, %v8886_v43  ;;  %4987 = vmatpush.bf16.msra.mxu1 %v8631_v46 }
  0xac   :  { %v10086_v52 = vld [vmem:[#allocation3 + $0x116c] sm:$0xf0]  ;;  %v8742_v53 = vld [vmem:[#allocation3 + $0x1260] sm:$0xf]  ;;  %v8487_v57 = vor.u32 %v10054_v49, %v8486_v48  ;;  %5000 = vmatpush.bf16.msra.mxu2 %v8759_v47 }
  0xad   :  { %v10118_v54 = vld [vmem:[#allocation3 + $0x126c] sm:$0xf0]  ;;  %v8870_v55 = vld [vmem:[#allocation3 + $0x1360] sm:$0xf]  ;;  %v8615_v58 = vor.u32 %v10086_v52, %v8614_v50  ;;  %5013 = vmatpush.bf16.msra.mxu3 %v8887_v51 }
  0xae   :  { %v10150_v56 = vld [vmem:[#allocation3 + $0x136c] sm:$0xf0]  ;;  %v8743_v59 = vor.u32 %v10118_v54, %v8742_v53  ;;  %v8470_v61 = vld [vmem:[#allocation3 + $0x1040] sm:$0xf]  ;;  %4975 = vmatpush.bf16.msra.mxu0 %v8487_v57 }
  0xaf   :  { %v10050_v62 = vld [vmem:[#allocation3 + $0x104c] sm:$0xf0]  ;;  %v8598_v63 = vld [vmem:[#allocation3 + $0x1140] sm:$0xf]  ;;  %v8871_v0 = vor.u32 %v10150_v56, %v8870_v55  ;;  %4988 = vmatpush.bf16.msra.mxu1 %v8615_v58 }
  0xb0   :  { %v10082_v2 = vld [vmem:[#allocation3 + $0x114c] sm:$0xf0]  ;;  %v8726_v4 = vld [vmem:[#allocation3 + $0x1240] sm:$0xf]  ;;  %v8471_v11 = vor.u32 %v10050_v62, %v8470_v61  ;;  %5001 = vmatpush.bf16.msra.mxu2 %v8743_v59 }
  0xb1   :  { %v10114_v5 = vld [vmem:[#allocation3 + $0x124c] sm:$0xf0]  ;;  %v8854_v6 = vld [vmem:[#allocation3 + $0x1340] sm:$0xf]  ;;  %v8599_v12 = vor.u32 %v10082_v2, %v8598_v63  ;;  %5014 = vmatpush.bf16.msra.mxu3 %v8871_v0 }
  0xb2   :  { %v10146_v7 = vld [vmem:[#allocation3 + $0x134c] sm:$0xf0]  ;;  %v8727_v13 = vor.u32 %v10114_v5, %v8726_v4  ;;  %v8454_v16 = vld [vmem:[#allocation3 + $0x1020] sm:$0xf]  ;;  %4976 = vmatpush.bf16.msra.mxu0 %v8471_v11 }
  0xb3   :  { %v10046_v17 = vld [vmem:[#allocation3 + $0x102c] sm:$0xf0]  ;;  %v8582_v18 = vld [vmem:[#allocation3 + $0x1120] sm:$0xf]  ;;  %v8855_v19 = vor.u32 %v10146_v7, %v8854_v6  ;;  %4989 = vmatpush.bf16.msra.mxu1 %v8599_v12 }
  0xb4   :  { %v10078_v20 = vld [vmem:[#allocation3 + $0x112c] sm:$0xf0]  ;;  %v8710_v25 = vld [vmem:[#allocation3 + $0x1220] sm:$0xf]  ;;  %v8455_v34 = vor.u32 %v10046_v17, %v8454_v16  ;;  %5002 = vmatpush.bf16.msra.mxu2 %v8727_v13 }
  0xb5   :  { %v10110_v28 = vld [vmem:[#allocation3 + $0x122c] sm:$0xf0]  ;;  %v8838_v31 = vld [vmem:[#allocation3 + $0x1320] sm:$0xf]  ;;  %v8583_v38 = vor.u32 %v10078_v20, %v8582_v18  ;;  %5015 = vmatpush.bf16.msra.mxu3 %v8855_v19 }
  0xb6   :  { %v10142_v32 = vld [vmem:[#allocation3 + $0x132c] sm:$0xf0]  ;;  %v8438_v33 = vld [vmem:[#allocation3 + $0x1000] sm:$0xf]  ;;  %v8711_v39 = vor.u32 %v10110_v28, %v8710_v25  ;;  %4977 = vmatpush.bf16.msra.mxu0 %v8455_v34 }
  0xb7   :  { %v10042_v35 = vld [vmem:[#allocation3 + $0x100c] sm:$0xf0]  ;;  %v8566_v36 = vld [vmem:[#allocation3 + $0x1100] sm:$0xf]  ;;  %v8839_v43 = vor.u32 %v10142_v32, %v8838_v31  ;;  %4990 = vmatpush.bf16.msra.mxu1 %v8583_v38 }
  0xb8   :  { %v10074_v37 = vld [vmem:[#allocation3 + $0x110c] sm:$0xf0]  ;;  %v8694_v40 = vld [vmem:[#allocation3 + $0x1200] sm:$0xf]  ;;  %v8439_v50 = vor.u32 %v10042_v35, %v8438_v33  ;;  %5003 = vmatpush.bf16.msra.mxu2 %v8711_v39 }
  0xb9   :  { %v10106_v41 = vld [vmem:[#allocation3 + $0x120c] sm:$0xf0]  ;;  %v8822_v42 = vld [vmem:[#allocation3 + $0x1300] sm:$0xf]  ;;  %v8567_v53 = vor.u32 %v10074_v37, %v8566_v36  ;;  %5016 = vmatpush.bf16.msra.mxu3 %v8839_v43 }
  0xba   :  { %v10138_v44 = vld [vmem:[#allocation3 + $0x130c] sm:$0xf0]  ;;  %v9062_v45 = vld [vmem:[#allocation3 + $0x14e0] sm:$0xf]  ;;  %v8695_v54 = vor.u32 %v10106_v41, %v8694_v40  ;;  %4978 = vmatpush.bf16.msra.mxu0 %v8439_v50 }
  0xbb   :  { %v10198_v46 = vld [vmem:[#allocation3 + $0x14ec] sm:$0xf0]  ;;  %v9190_v47 = vld [vmem:[#allocation3 + $0x15e0] sm:$0xf]  ;;  %v8823_v57 = vor.u32 %v10138_v44, %v8822_v42  ;;  %4991 = vmatpush.bf16.msra.mxu1 %v8567_v53 }
  0xbc   :  { %v10230_v48 = vld [vmem:[#allocation3 + $0x15ec] sm:$0xf0]  ;;  %v93_v49 = vld [vmem:[%s10749_s0 + $0x28] sm:$0xff]  ;;  %v9063_v58 = vor.u32 %v10198_v46, %v9062_v45  ;;  %v891_v62 = vld.sshfl [vmem:[#allocation1] sm:$0xff pattern:$0x73625140]  ;;  %5004 = vmatpush.bf16.msra.mxu2 %v8695_v54 }
  0xbd   :  { %v9318_v51 = vld [vmem:[#allocation3 + $0x16e0] sm:$0xf]  ;;  %v10262_v52 = vld [vmem:[#allocation3 + $0x16ec] sm:$0xf0]  ;;  %890 = vst [vmem:[#allocation1 + $0x20] ss:$4 sm:$0xff] %v93_v49  ;;  %v9191_v59 = vor.u32 %v10230_v48, %v9190_v47  ;;  %5017 = vmatpush.bf16.msra.mxu3 %v8823_v57  ;;  %4979 = vmatmul.bf16.vlgmr.msra.gmra.mxu0 %v891_v62 }
  0xbe   :  { %v9446_v55 = vld [vmem:[#allocation3 + $0x17e0] sm:$0xf]  ;;  %v10294_v56 = vld [vmem:[#allocation3 + $0x17ec] sm:$0xf0]  ;;  %v9319_v61 = vor.u32 %v10262_v52, %v9318_v51  ;;  %5023 = vmatpush.bf16.msrb.mxu0 %v9063_v58 }
  0xbf   :  { %v9046_v63 = vld [vmem:[#allocation3 + $0x14c0] sm:$0xf]  ;;  %v10194_v0 = vld [vmem:[#allocation3 + $0x14cc] sm:$0xf0]  ;;  %v9447_v4 = vor.u32 %v10294_v56, %v9446_v55  ;;  %5036 = vmatpush.bf16.msrb.mxu1 %v9191_v59 }
  0xc0   :  { %v9174_v2 = vld [vmem:[#allocation3 + $0x15c0] sm:$0xf]  ;;  %v893_v5 = vld.sshfl [vmem:[#allocation1 + $0x10] sm:$0xff pattern:$0x73625140]  ;;  %v9047_v18 = vor.u32 %v10194_v0, %v9046_v63  ;;  %5049 = vmatpush.bf16.msrb.mxu2 %v9319_v61 }
  0xc1   :  { %v10226_v6 = vld [vmem:[#allocation3 + $0x15cc] sm:$0xf0]  ;;  %v9302_v7 = vld [vmem:[#allocation3 + $0x16c0] sm:$0xf]  ;;  %5062 = vmatpush.bf16.msrb.mxu3 %v9447_v4  ;;  %5005 = vmatmul.bf16.vlgmr.msra.gmra.mxu2 %v893_v5 }
  0xc2   :  { %v10258_v11 = vld [vmem:[#allocation3 + $0x16cc] sm:$0xf0]  ;;  %v9430_v12 = vld [vmem:[#allocation3 + $0x17c0] sm:$0xf]  ;;  %v9175_v19 = vor.u32 %v10226_v6, %v9174_v2  ;;  %5024 = vmatpush.bf16.msrb.mxu0 %v9047_v18 }
  0xc3   :  { %v10290_v13 = vld [vmem:[#allocation3 + $0x17cc] sm:$0xf0]  ;;  %v892_v16 = vld.sshfl [vmem:[#allocation1 + $0x8] sm:$0xff pattern:$0x73625140]  ;;  %v9303_v20 = vor.u32 %v10258_v11, %v9302_v7 }
  0xc4   :  { %v894_v17 = vld.sshfl [vmem:[#allocation1 + $0x18] sm:$0xff pattern:$0x73625140]  ;;  %v9030_v25 = vld [vmem:[#allocation3 + $0x14a0] sm:$0xf]  ;;  %v9431_v32 = vor.u32 %v10290_v13, %v9430_v12  ;;  %4992 = vmatmul.bf16.vlgmr.msra.gmra.mxu1 %v892_v16 }
  0xc5   :  { %v10190_v28 = vld [vmem:[#allocation3 + $0x14ac] sm:$0xf0]  ;;  %v9158_v31 = vld [vmem:[#allocation3 + $0x15a0] sm:$0xf]  ;;  %5018 = vmatmul.bf16.vlgmr.msra.gmra.mxu3 %v894_v17  ;;  %5037 = vmatpush.bf16.msrb.mxu1 %v9175_v19  ;;  %v4772_v19 = vpop.f32.mrf.mxu0 }
  0xc6   :  { %v10222_v33 = vld [vmem:[#allocation3 + $0x15ac] sm:$0xf0]  ;;  %v9286_v34 = vld [vmem:[#allocation3 + $0x16a0] sm:$0xf]  ;;  %v9031_v38 = vor.u32 %v10190_v28, %v9030_v25  ;;  %5050 = vmatpush.bf16.msrb.mxu2 %v9303_v20  ;;  %5063 = vmatpush.bf16.msrb.mxu3 %v9431_v32 }
  0xc7   :  { %v10254_v35 = vld [vmem:[#allocation3 + $0x16ac] sm:$0xf0]  ;;  %v9414_v36 = vld [vmem:[#allocation3 + $0x17a0] sm:$0xf]  ;;  %v9159_v39 = vor.u32 %v10222_v33, %v9158_v31  ;;  %v4785_v33 = vpop.f32.mrf.mxu1 }
  0xc8   :  { %v10286_v37 = vld [vmem:[#allocation3 + $0x17ac] sm:$0xf0]  ;;  %v9287_v40 = vor.u32 %v10254_v35, %v9286_v34  ;;  %v9014_v41 = vld [vmem:[#allocation3 + $0x1480] sm:$0xf]  ;;  %5025 = vmatpush.bf16.msrb.mxu0 %v9031_v38  ;;  %v4786_v38 = vadd.f32 %v4785_v33, %v4772_v19  ;;  %v9552_v19 = vld [vmem:[#allocation3 + $0xc4] sm:$0xf] }
  0xc9   :  { %v10186_v42 = vld [vmem:[#allocation3 + $0x148c] sm:$0xf0]  ;;  %v9142_v43 = vld [vmem:[#allocation3 + $0x1580] sm:$0xf]  ;;  %v9415_v44 = vor.u32 %v10286_v37, %v9414_v36  ;;  %5038 = vmatpush.bf16.msrb.mxu1 %v9159_v39  ;;  %v9616_v33 = vld [vmem:[#allocation3 + $0x2c4] sm:$0xf] }
  0xca   :  { %v10218_v45 = vld [vmem:[#allocation3 + $0x158c] sm:$0xf0]  ;;  %v9270_v46 = vld [vmem:[#allocation3 + $0x1680] sm:$0xf]  ;;  %v9015_v50 = vor.u32 %v10186_v42, %v9014_v41  ;;  %5051 = vmatpush.bf16.msrb.mxu2 %v9287_v40 }
  0xcb   :  { %v10250_v47 = vld [vmem:[#allocation3 + $0x168c] sm:$0xf0]  ;;  %v9398_v48 = vld [vmem:[#allocation3 + $0x1780] sm:$0xf]  ;;  %v9143_v51 = vor.u32 %v10218_v45, %v9142_v43  ;;  %5064 = vmatpush.bf16.msrb.mxu3 %v9415_v44 }
  0xcc   :  { %v10282_v49 = vld [vmem:[#allocation3 + $0x178c] sm:$0xf0]  ;;  %v9271_v52 = vor.u32 %v10250_v47, %v9270_v46  ;;  %v8998_v53 = vld [vmem:[#allocation3 + $0x1460] sm:$0xf]  ;;  %5026 = vmatpush.bf16.msrb.mxu0 %v9015_v50 }
  0xcd   :  { %v10182_v54 = vld [vmem:[#allocation3 + $0x146c] sm:$0xf0]  ;;  %v9126_v55 = vld [vmem:[#allocation3 + $0x1560] sm:$0xf]  ;;  %v9399_v56 = vor.u32 %v10282_v49, %v9398_v48  ;;  %5039 = vmatpush.bf16.msrb.mxu1 %v9143_v51  ;;  %v4798_v49 = vpop.f32.mrf.mxu2 }
  0xce   :  { %v10214_v57 = vld [vmem:[#allocation3 + $0x156c] sm:$0xf0]  ;;  %v9254_v58 = vld [vmem:[#allocation3 + $0x1660] sm:$0xf]  ;;  %v8999_v63 = vor.u32 %v10182_v54, %v8998_v53  ;;  %5052 = vmatpush.bf16.msrb.mxu2 %v9271_v52  ;;  %v4799_v54 = vadd.f32 %v4798_v49, %v4786_v38  ;;  %v9612_v49 = vld [vmem:[#allocation3 + $0x2a4] sm:$0xf] }
  0xcf   :  { %v10246_v59 = vld [vmem:[#allocation3 + $0x166c] sm:$0xf0]  ;;  %v9382_v61 = vld [vmem:[#allocation3 + $0x1760] sm:$0xf]  ;;  %v9127_v0 = vor.u32 %v10214_v57, %v9126_v55  ;;  %5065 = vmatpush.bf16.msrb.mxu3 %v9399_v56  ;;  %v4811_v55 = vpop.f32.mrf.mxu3  ;;  %v9556_v56 = vld [vmem:[#allocation3 + $0xe4] sm:$0xf] }
  0xd0   :  { %v10278_v62 = vld [vmem:[#allocation3 + $0x176c] sm:$0xf0]  ;;  %v9255_v2 = vor.u32 %v10246_v59, %v9254_v58  ;;  %v8982_v4 = vld [vmem:[#allocation3 + $0x1440] sm:$0xf]  ;;  %5027 = vmatpush.bf16.msrb.mxu0 %v8999_v63  ;;  %v6504_v57 = vld [vmem:[#allocation3 + $0xf0] sm:$0xf0] }
  0xd1   :  { %v10178_v5 = vld [vmem:[#allocation3 + $0x144c] sm:$0xf0]  ;;  %v9110_v6 = vld [vmem:[#allocation3 + $0x1540] sm:$0xf]  ;;  %v9383_v7 = vor.u32 %v10278_v62, %v9382_v61  ;;  %5040 = vmatpush.bf16.msrb.mxu1 %v9127_v0  ;;  %v9588_v58 = vld [vmem:[#allocation3 + $0x1e4] sm:$0xf]  ;;  %v10561_v0 = vadd.f32 %v4811_v55, %v4799_v54 }
  0xd2   :  { %v10210_v11 = vld [vmem:[#allocation3 + $0x154c] sm:$0xf0]  ;;  %v9238_v12 = vld [vmem:[#allocation3 + $0x1640] sm:$0xf]  ;;  %v8983_v18 = vor.u32 %v10178_v5, %v8982_v4  ;;  %5053 = vmatpush.bf16.msrb.mxu2 %v9255_v2  ;;  %v6632_v61 = vld [vmem:[#allocation3 + $0x1f0] sm:$0xf0]  ;;  %v4774_v2 = vpop.f32.mrf.mxu0 }
  0xd3   :  { %v10242_v13 = vld [vmem:[#allocation3 + $0x164c] sm:$0xf0]  ;;  %v9366_v16 = vld [vmem:[#allocation3 + $0x1740] sm:$0xf]  ;;  %v9111_v20 = vor.u32 %v10210_v11, %v9110_v6  ;;  %5066 = vmatpush.bf16.msrb.mxu3 %v9383_v7  ;;  %v9620_v62 = vld [vmem:[#allocation3 + $0x2e4] sm:$0xf]  ;;  %v4787_v11 = vpop.f32.mrf.mxu1 }
  0xd4   :  { %v10274_v17 = vld [vmem:[#allocation3 + $0x174c] sm:$0xf0]  ;;  %v9239_v25 = vor.u32 %v10242_v13, %v9238_v12  ;;  %v8966_v28 = vld [vmem:[#allocation3 + $0x1420] sm:$0xf]  ;;  %5028 = vmatpush.bf16.msrb.mxu0 %v8983_v18  ;;  %v6760_v63 = vld [vmem:[#allocation3 + $0x2f0] sm:$0xf0]  ;;  %v6507_v13 = vor.u32 %v9556_v56, %v6504_v57 }
  0xd5   :  { %v10174_v31 = vld [vmem:[#allocation3 + $0x142c] sm:$0xf0]  ;;  %v9094_v32 = vld [vmem:[#allocation3 + $0x1520] sm:$0xf]  ;;  %v9367_v34 = vor.u32 %v10274_v17, %v9366_v16  ;;  %5041 = vmatpush.bf16.msrb.mxu1 %v9111_v20  ;;  %v9652_v6 = vld [vmem:[#allocation3 + $0x3e4] sm:$0xf]  ;;  %v6635_v16 = vor.u32 %v9588_v58, %v6632_v61  ;;  %v6763_v17 = vor.u32 %v9620_v62, %v6760_v63 }
  0xd6   :  { %v10206_v35 = vld [vmem:[#allocation3 + $0x152c] sm:$0xf0]  ;;  %v9222_v36 = vld [vmem:[#allocation3 + $0x1620] sm:$0xf]  ;;  %v8967_v41 = vor.u32 %v10174_v31, %v8966_v28  ;;  %5054 = vmatpush.bf16.msrb.mxu2 %v9239_v25  ;;  %v6888_v7 = vld [vmem:[#allocation3 + $0x3f0] sm:$0xf0] }
  0xd7   :  { %v10238_v37 = vld [vmem:[#allocation3 + $0x162c] sm:$0xf0]  ;;  %v9350_v39 = vld [vmem:[#allocation3 + $0x1720] sm:$0xf]  ;;  %v9095_v44 = vor.u32 %v10206_v35, %v9094_v32  ;;  %5067 = vmatpush.bf16.msrb.mxu3 %v9367_v34  ;;  %v6488_v20 = vld [vmem:[#allocation3 + $0xd0] sm:$0xf0]  ;;  %v6891_v28 = vor.u32 %v9652_v6, %v6888_v7 }
  0xd8   :  { %v10270_v40 = vld [vmem:[#allocation3 + $0x172c] sm:$0xf0]  ;;  %v8950_v42 = vld [vmem:[#allocation3 + $0x1400] sm:$0xf]  ;;  %v9223_v45 = vor.u32 %v10238_v37, %v9222_v36  ;;  %5029 = vmatpush.bf16.msrb.mxu0 %v8967_v41  ;;  %v9584_v25 = vld [vmem:[#allocation3 + $0x1c4] sm:$0xf]  ;;  %v4800_v37 = vpop.f32.mrf.mxu2  ;;  %v4813_v41 = vpop.f32.mrf.mxu3 }
  0xd9   :  { %v10170_v43 = vld [vmem:[#allocation3 + $0x140c] sm:$0xf0]  ;;  %v9078_v46 = vld [vmem:[#allocation3 + $0x1500] sm:$0xf]  ;;  %v9351_v50 = vor.u32 %v10270_v40, %v9350_v39  ;;  %5042 = vmatpush.bf16.msrb.mxu1 %v9095_v44  ;;  %v6616_v32 = vld [vmem:[#allocation3 + $0x1d0] sm:$0xf0]  ;;  %v6491_v40 = vor.u32 %v9552_v19, %v6488_v20 }
  0xda   :  { %v10202_v47 = vld [vmem:[#allocation3 + $0x150c] sm:$0xf0]  ;;  %v9206_v48 = vld [vmem:[#allocation3 + $0x1600] sm:$0xf]  ;;  %v8951_v59 = vor.u32 %v10170_v43, %v8950_v42  ;;  %5055 = vmatpush.bf16.msrb.mxu2 %v9223_v45  ;;  %v6744_v34 = vld [vmem:[#allocation3 + $0x2d0] sm:$0xf0]  ;;  %v6619_v42 = vor.u32 %v9584_v25, %v6616_v32  ;;  %v4824_v6 = vpop.f32.mrf.mxu0 }
  0xdb   :  { %v10234_v51 = vld [vmem:[#allocation3 + $0x160c] sm:$0xf0]  ;;  %v9334_v52 = vld [vmem:[#allocation3 + $0x1700] sm:$0xf]  ;;  %v9079_v4 = vor.u32 %v10202_v47, %v9078_v46  ;;  %5068 = vmatpush.bf16.msrb.mxu3 %v9351_v50  ;;  %v9648_v35 = vld [vmem:[#allocation3 + $0x3c4] sm:$0xf]  ;;  %v6747_v43 = vor.u32 %v9616_v33, %v6744_v34 }
  0xdc   :  { %v10266_v53 = vld [vmem:[#allocation3 + $0x170c] sm:$0xf0]  ;;  %v9207_v5 = vor.u32 %v10234_v51, %v9206_v48  ;;  %v895_v18 = vld.sshfl [vmem:[#allocation1 + $0x20] sm:$0xff pattern:$0x73625140]  ;;  %5030 = vmatpush.bf16.msrb.mxu0 %v8951_v59 }
  0xdd   :  { %v9335_v12 = vor.u32 %v10266_v53, %v9334_v52  ;;  %v897_v31 = vld.sshfl [vmem:[#allocation1 + $0x30] sm:$0xff pattern:$0x73625140]  ;;  %5043 = vmatpush.bf16.msrb.mxu1 %v9079_v4  ;;  %v6872_v36 = vld [vmem:[#allocation3 + $0x3d0] sm:$0xf0] }
  0xde   :  { %5056 = vmatpush.bf16.msrb.mxu2 %v9207_v5  ;;  %v896_v38 = vld.sshfl [vmem:[#allocation1 + $0x28] sm:$0xff pattern:$0x73625140]  ;;  %v898_v39 = vld.sshfl [vmem:[#allocation1 + $0x38] sm:$0xff pattern:$0x73625140]  ;;  %v6875_v47 = vor.u32 %v9648_v35, %v6872_v36 }
  0xdf   :  { %5069 = vmatpush.bf16.msrb.mxu3 %v9335_v12  ;;  %v9548_v44 = vld [vmem:[#allocation3 + $0xa4] sm:$0xf]  ;;  %v6472_v45 = vld [vmem:[#allocation3 + $0xb0] sm:$0xf0]  ;;  %5031 = vmatmul.bf16.vlgmr.msrb.gmra.mxu0 %v895_v18  ;;  %v4837_v18 = vpop.f32.mrf.mxu1 }
  0xe0   :  { %5075 = vmatpush.bf16.msra.mxu0 %v6507_v13  ;;  %v9580_v46 = vld [vmem:[#allocation3 + $0x1a4] sm:$0xf]  ;;  %v6600_v48 = vld [vmem:[#allocation3 + $0x1b0] sm:$0xf0]  ;;  %5044 = vmatmul.bf16.vlgmr.msrb.gmra.mxu1 %v896_v38  ;;  %v6475_v53 = vor.u32 %v9548_v44, %v6472_v45  ;;  %v4863_v45 = vpop.f32.mrf.mxu3 }
  0xe1   :  { %5088 = vmatpush.bf16.msra.mxu1 %v6635_v16  ;;  %v6728_v50 = vld [vmem:[#allocation3 + $0x2b0] sm:$0xf0]  ;;  %5057 = vmatmul.bf16.vlgmr.msrb.gmra.mxu2 %v897_v31  ;;  %v9644_v51 = vld [vmem:[#allocation3 + $0x3a4] sm:$0xf]  ;;  %v6603_v54 = vor.u32 %v9580_v46, %v6600_v48 }
  0xe2   :  { %5101 = vmatpush.bf16.msra.mxu2 %v6763_v17  ;;  %v6856_v52 = vld [vmem:[#allocation3 + $0x3b0] sm:$0xf0]  ;;  %5070 = vmatmul.bf16.vlgmr.msrb.gmra.mxu3 %v898_v39  ;;  %v6731_v55 = vor.u32 %v9612_v49, %v6728_v50  ;;  %v9544_v56 = vld [vmem:[#allocation3 + $0x84] sm:$0xf]  ;;  %v4825_v17 = vadd.f32 %v4824_v6, %v10561_v0  ;;  %v4826_v50 = vpop.f32.mrf.mxu0 }
  0xe3   :  { %5114 = vmatpush.bf16.msra.mxu3 %v6891_v28  ;;  %v6456_v57 = vld [vmem:[#allocation3 + $0x90] sm:$0xf0]  ;;  %v9576_v58 = vld [vmem:[#allocation3 + $0x184] sm:$0xf]  ;;  %v6859_v59 = vor.u32 %v9644_v51, %v6856_v52 }
  0xe4   :  { %5076 = vmatpush.bf16.msra.mxu0 %v6491_v40  ;;  %v6584_v61 = vld [vmem:[#allocation3 + $0x190] sm:$0xf0]  ;;  %v9608_v62 = vld [vmem:[#allocation3 + $0x284] sm:$0xf]  ;;  %v6459_v5 = vor.u32 %v9544_v56, %v6456_v57  ;;  %v4838_v33 = vadd.f32 %v4837_v18, %v4825_v17  ;;  %v4850_v40 = vpop.f32.mrf.mxu2 }
  0xe5   :  { %5089 = vmatpush.bf16.msra.mxu1 %v6619_v42  ;;  %v6712_v63 = vld [vmem:[#allocation3 + $0x290] sm:$0xf0]  ;;  %v9640_v2 = vld [vmem:[#allocation3 + $0x384] sm:$0xf]  ;;  %v6587_v7 = vor.u32 %v9576_v58, %v6584_v61 }
  0xe6   :  { %5102 = vmatpush.bf16.msra.mxu2 %v6747_v43  ;;  %v6840_v4 = vld [vmem:[#allocation3 + $0x390] sm:$0xf0]  ;;  %v6715_v11 = vor.u32 %v9608_v62, %v6712_v63  ;;  %v9540_v12 = vld [vmem:[#allocation3 + $0x64] sm:$0xf]  ;;  %v4851_v44 = vadd.f32 %v4850_v40, %v4838_v33 }
  0xe7   :  { %5115 = vmatpush.bf16.msra.mxu3 %v6875_v47  ;;  %v6440_v13 = vld [vmem:[#allocation3 + $0x70] sm:$0xf0]  ;;  %v9572_v16 = vld [vmem:[#allocation3 + $0x164] sm:$0xf]  ;;  %v6843_v19 = vor.u32 %v9640_v2, %v6840_v4  ;;  %v4839_v56 = vpop.f32.mrf.mxu1 }
  0xe8   :  { %5077 = vmatpush.bf16.msra.mxu0 %v6475_v53  ;;  %v6568_v20 = vld [vmem:[#allocation3 + $0x170] sm:$0xf0]  ;;  %v9604_v25 = vld [vmem:[#allocation3 + $0x264] sm:$0xf]  ;;  %v6443_v34 = vor.u32 %v9540_v12, %v6440_v13  ;;  %v10564_v49 = vadd.f32 %v4863_v45, %v4851_v44 }
  0xe9   :  { %5090 = vmatpush.bf16.msra.mxu1 %v6603_v54  ;;  %v6696_v28 = vld [vmem:[#allocation3 + $0x270] sm:$0xf0]  ;;  %v9636_v31 = vld [vmem:[#allocation3 + $0x364] sm:$0xf]  ;;  %v6571_v35 = vor.u32 %v9572_v16, %v6568_v20 }
  0xea   :  { %5103 = vmatpush.bf16.msra.mxu2 %v6731_v55  ;;  %v6824_v32 = vld [vmem:[#allocation3 + $0x370] sm:$0xf0]  ;;  %v6699_v36 = vor.u32 %v9604_v25, %v6696_v28  ;;  %v9536_v37 = vld [vmem:[#allocation3 + $0x44] sm:$0xf]  ;;  %v4865_v25 = vpop.f32.mrf.mxu3 }
  0xeb   :  { %5116 = vmatpush.bf16.msra.mxu3 %v6859_v59  ;;  %v6424_v38 = vld [vmem:[#allocation3 + $0x50] sm:$0xf0]  ;;  %v9568_v39 = vld [vmem:[#allocation3 + $0x144] sm:$0xf]  ;;  %v6827_v0 = vor.u32 %v9636_v31, %v6824_v32 }
  0xec   :  { %5078 = vmatpush.bf16.msra.mxu0 %v6459_v5  ;;  %v6552_v41 = vld [vmem:[#allocation3 + $0x150] sm:$0xf0]  ;;  %v9600_v42 = vld [vmem:[#allocation3 + $0x244] sm:$0xf]  ;;  %v6427_v48 = vor.u32 %v9536_v37, %v6424_v38  ;;  %v4852_v16 = vpop.f32.mrf.mxu2 }
  0xed   :  { %5091 = vmatpush.bf16.msra.mxu1 %v6587_v7  ;;  %v6680_v43 = vld [vmem:[#allocation3 + $0x250] sm:$0xf0]  ;;  %v9632_v46 = vld [vmem:[#allocation3 + $0x344] sm:$0xf]  ;;  %v6555_v51 = vor.u32 %v9568_v39, %v6552_v41 }
  0xee   :  { %5104 = vmatpush.bf16.msra.mxu2 %v6715_v11  ;;  %v6808_v47 = vld [vmem:[#allocation3 + $0x350] sm:$0xf0]  ;;  %v6683_v52 = vor.u32 %v9600_v42, %v6680_v43  ;;  %v9532_v53 = vld [vmem:[#allocation3 + $0x24] sm:$0xf] }
  0xef   :  { %5117 = vmatpush.bf16.msra.mxu3 %v6843_v19  ;;  %v6408_v54 = vld [vmem:[#allocation3 + $0x30] sm:$0xf0]  ;;  %v9564_v55 = vld [vmem:[#allocation3 + $0x124] sm:$0xf]  ;;  %v6811_v57 = vor.u32 %v9632_v46, %v6808_v47 }
  0xf0   :  { %5079 = vmatpush.bf16.msra.mxu0 %v6443_v34  ;;  %v6536_v58 = vld [vmem:[#allocation3 + $0x130] sm:$0xf0]  ;;  %v9596_v59 = vld [vmem:[#allocation3 + $0x224] sm:$0xf]  ;;  %v6411_v2 = vor.u32 %v9532_v53, %v6408_v54 }
  0xf1   :  { %5092 = vmatpush.bf16.msra.mxu1 %v6571_v35  ;;  %v6664_v61 = vld [vmem:[#allocation3 + $0x230] sm:$0xf0]  ;;  %v9628_v62 = vld [vmem:[#allocation3 + $0x324] sm:$0xf]  ;;  %v6539_v6 = vor.u32 %v9564_v55, %v6536_v58 }
  0xf2   :  { %5105 = vmatpush.bf16.msra.mxu2 %v6699_v36  ;;  %v6792_v63 = vld [vmem:[#allocation3 + $0x330] sm:$0xf0]  ;;  %v9528_v4 = vld [vmem:[#allocation3 + $0x4] sm:$0xf]  ;;  %v6667_v7 = vor.u32 %v9596_v59, %v6664_v61 }
  0xf3   :  { %5118 = vmatpush.bf16.msra.mxu3 %v6827_v0  ;;  %v6392_v5 = vld [vmem:[#allocation3 + $0x10] sm:$0xf0]  ;;  %v9560_v11 = vld [vmem:[#allocation3 + $0x104] sm:$0xf]  ;;  %v6795_v17 = vor.u32 %v9628_v62, %v6792_v63 }
  0xf4   :  { %5080 = vmatpush.bf16.msra.mxu0 %v6427_v48  ;;  %v6520_v12 = vld [vmem:[#allocation3 + $0x110] sm:$0xf0]  ;;  %v9592_v13 = vld [vmem:[#allocation3 + $0x204] sm:$0xf]  ;;  %v6395_v33 = vor.u32 %v9528_v4, %v6392_v5 }
  0xf5   :  { %5093 = vmatpush.bf16.msra.mxu1 %v6555_v51  ;;  %v6648_v18 = vld [vmem:[#allocation3 + $0x210] sm:$0xf0]  ;;  %v9624_v19 = vld [vmem:[#allocation3 + $0x304] sm:$0xf]  ;;  %v6523_v37 = vor.u32 %v9560_v11, %v6520_v12 }
  0xf6   :  { %5106 = vmatpush.bf16.msra.mxu2 %v6683_v52  ;;  %v6776_v20 = vld [vmem:[#allocation3 + $0x310] sm:$0xf0]  ;;  %v9684_v28 = vld [vmem:[#allocation3 + $0x4e4] sm:$0xf]  ;;  %v6651_v38 = vor.u32 %v9592_v13, %v6648_v18 }
  0xf7   :  { %5119 = vmatpush.bf16.msra.mxu3 %v6811_v57  ;;  %v7016_v31 = vld [vmem:[#allocation3 + $0x4f0] sm:$0xf0]  ;;  %v9716_v32 = vld [vmem:[#allocation3 + $0x5e4] sm:$0xf]  ;;  %v6779_v0 = vor.u32 %v9624_v19, %v6776_v20 }
  0xf8   :  { %5081 = vmatpush.bf16.msra.mxu0 %v6411_v2  ;;  %v7144_v34 = vld [vmem:[#allocation3 + $0x5f0] sm:$0xf0]  ;;  %v9748_v35 = vld [vmem:[#allocation3 + $0x6e4] sm:$0xf]  ;;  %v7019_v41 = vor.u32 %v9684_v28, %v7016_v31  ;;  %v4876_v25 = vpop.f32.mrf.mxu0 }
  0xf9   :  { %v7272_v36 = vld [vmem:[#allocation3 + $0x6f0] sm:$0xf0]  ;;  %5094 = vmatpush.bf16.msra.mxu1 %v6539_v6  ;;  %v9780_v39 = vld [vmem:[#allocation3 + $0x7e4] sm:$0xf]  ;;  %v7147_v42 = vor.u32 %v9716_v32, %v7144_v34  ;;  %v4877_v32 = vadd.f32 %v4876_v25, %v10564_v49 }
  0xfa   :  { %5107 = vmatpush.bf16.msra.mxu2 %v6667_v7  ;;  %v7400_v40 = vld [vmem:[#allocation3 + $0x7f0] sm:$0xf0]  ;;  %v7275_v43 = vor.u32 %v9748_v35, %v7272_v36  ;;  %v9680_v44 = vld [vmem:[#allocation3 + $0x4c4] sm:$0xf] }
  0xfb   :  { %5120 = vmatpush.bf16.msra.mxu3 %v6795_v17  ;;  %v7000_v45 = vld [vmem:[#allocation3 + $0x4d0] sm:$0xf0]  ;;  %v9712_v46 = vld [vmem:[#allocation3 + $0x5c4] sm:$0xf]  ;;  %v7403_v47 = vor.u32 %v9780_v39, %v7400_v40 }
  0xfc   :  { %5082 = vmatpush.bf16.msra.mxu0 %v6395_v33  ;;  %v7128_v48 = vld [vmem:[#allocation3 + $0x5d0] sm:$0xf0]  ;;  %v9744_v50 = vld [vmem:[#allocation3 + $0x6c4] sm:$0xf]  ;;  %v7003_v54 = vor.u32 %v9680_v44, %v7000_v45 }
  0xfd   :  { %v7256_v51 = vld [vmem:[#allocation3 + $0x6d0] sm:$0xf0]  ;;  %5095 = vmatpush.bf16.msra.mxu1 %v6523_v37  ;;  %v9776_v52 = vld [vmem:[#allocation3 + $0x7c4] sm:$0xf]  ;;  %v7131_v55 = vor.u32 %v9712_v46, %v7128_v48  ;;  %v4889_v34 = vpop.f32.mrf.mxu1 }
  0xfe   :  { %5108 = vmatpush.bf16.msra.mxu2 %v6651_v38  ;;  %v7384_v53 = vld [vmem:[#allocation3 + $0x7d0] sm:$0xf0]  ;;  %v7259_v56 = vor.u32 %v9744_v50, %v7256_v51  ;;  %v9676_v57 = vld [vmem:[#allocation3 + $0x4a4] sm:$0xf] }
  0xff   :  { %5121 = vmatpush.bf16.msra.mxu3 %v6779_v0  ;;  %v6984_v58 = vld [vmem:[#allocation3 + $0x4b0] sm:$0xf0]  ;;  %v9708_v59 = vld [vmem:[#allocation3 + $0x5a4] sm:$0xf]  ;;  %v7387_v61 = vor.u32 %v9776_v52, %v7384_v53  ;;  %5083 = vmatmul.bf16.vlgmr.msra.gmra.mxu0 %v10503_v24  ;;  %v4890_v0 = vadd.f32 %v4889_v34, %v4877_v32 }
 0x100   :  { %5127 = vmatpush.bf16.msrb.mxu0 %v7019_v41  ;;  %v7112_v62 = vld [vmem:[#allocation3 + $0x5b0] sm:$0xf0]  ;;  %v9740_v63 = vld [vmem:[#allocation3 + $0x6a4] sm:$0xf]  ;;  %v6987_v6 = vor.u32 %v9676_v57, %v6984_v58  ;;  %5096 = vmatmul.bf16.vlgmr.msra.gmra.mxu1 %v10508_v27  ;;  %v4902_v53 = vpop.f32.mrf.mxu2 }
 0x101   :  { %5140 = vmatpush.bf16.msrb.mxu1 %v7147_v42  ;;  %v7240_v2 = vld [vmem:[#allocation3 + $0x6b0] sm:$0xf0]  ;;  %5109 = vmatmul.bf16.vlgmr.msra.gmra.mxu2 %v10501_v23  ;;  %v9772_v4 = vld [vmem:[#allocation3 + $0x7a4] sm:$0xf]  ;;  %v7115_v7 = vor.u32 %v9708_v59, %v7112_v62  ;;  %v4903_v57 = vadd.f32 %v4902_v53, %v4890_v0  ;;  %v4878_v62 = vpop.f32.mrf.mxu0 }
 0x102   :  { %5153 = vmatpush.bf16.msrb.mxu2 %v7275_v43  ;;  %v7368_v5 = vld [vmem:[#allocation3 + $0x7b0] sm:$0xf0]  ;;  %5122 = vmatmul.bf16.vlgmr.msra.gmra.mxu3 %v10506_v26  ;;  %v7243_v11 = vor.u32 %v9740_v63, %v7240_v2  ;;  %v9672_v12 = vld [vmem:[#allocation3 + $0x484] sm:$0xf] }
 0x103   :  { %5166 = vmatpush.bf16.msrb.mxu3 %v7403_v47  ;;  %v6968_v13 = vld [vmem:[#allocation3 + $0x490] sm:$0xf0]  ;;  %v9704_v16 = vld [vmem:[#allocation3 + $0x584] sm:$0xf]  ;;  %v7371_v17 = vor.u32 %v9772_v4, %v7368_v5 }
 0x104   :  { %5128 = vmatpush.bf16.msrb.mxu0 %v7003_v54  ;;  %v7096_v18 = vld [vmem:[#allocation3 + $0x590] sm:$0xf0]  ;;  %v9736_v19 = vld [vmem:[#allocation3 + $0x684] sm:$0xf]  ;;  %v6971_v33 = vor.u32 %v9672_v12, %v6968_v13  ;;  %v4915_v58 = vpop.f32.mrf.mxu3 }
 0x105   :  { %5141 = vmatpush.bf16.msrb.mxu1 %v7131_v55  ;;  %v7224_v20 = vld [vmem:[#allocation3 + $0x690] sm:$0xf0]  ;;  %v9768_v28 = vld [vmem:[#allocation3 + $0x784] sm:$0xf]  ;;  %v7099_v35 = vor.u32 %v9704_v16, %v7096_v18  ;;  %v4891_v2 = vpop.f32.mrf.mxu1  ;;  %v10571_v4 = vadd.f32 %v4915_v58, %v4903_v57 }
 0x106   :  { %5154 = vmatpush.bf16.msrb.mxu2 %v7259_v56  ;;  %v7352_v31 = vld [vmem:[#allocation3 + $0x790] sm:$0xf0]  ;;  %v7227_v36 = vor.u32 %v9736_v19, %v7224_v20  ;;  %v9668_v37 = vld [vmem:[#allocation3 + $0x464] sm:$0xf] }
 0x107   :  { %5167 = vmatpush.bf16.msrb.mxu3 %v7387_v61  ;;  %v6952_v38 = vld [vmem:[#allocation3 + $0x470] sm:$0xf0]  ;;  %v9700_v39 = vld [vmem:[#allocation3 + $0x564] sm:$0xf]  ;;  %v7355_v40 = vor.u32 %v9768_v28, %v7352_v31 }
 0x108   :  { %5129 = vmatpush.bf16.msrb.mxu0 %v6987_v6  ;;  %v7080_v41 = vld [vmem:[#allocation3 + $0x570] sm:$0xf0]  ;;  %v9732_v42 = vld [vmem:[#allocation3 + $0x664] sm:$0xf]  ;;  %v6955_v46 = vor.u32 %v9668_v37, %v6952_v38  ;;  %v4904_v0 = vpop.f32.mrf.mxu2 }
 0x109   :  { %5142 = vmatpush.bf16.msrb.mxu1 %v7115_v7  ;;  %v7208_v43 = vld [vmem:[#allocation3 + $0x670] sm:$0xf0]  ;;  %v9764_v44 = vld [vmem:[#allocation3 + $0x764] sm:$0xf]  ;;  %v7083_v49 = vor.u32 %v9700_v39, %v7080_v41 }
 0x10a   :  { %5155 = vmatpush.bf16.msrb.mxu2 %v7243_v11  ;;  %v7336_v45 = vld [vmem:[#allocation3 + $0x770] sm:$0xf0]  ;;  %v7211_v47 = vor.u32 %v9732_v42, %v7208_v43  ;;  %v9664_v48 = vld [vmem:[#allocation3 + $0x444] sm:$0xf] }
 0x10b   :  { %5168 = vmatpush.bf16.msrb.mxu3 %v7371_v17  ;;  %v6936_v50 = vld [vmem:[#allocation3 + $0x450] sm:$0xf0]  ;;  %v9696_v51 = vld [vmem:[#allocation3 + $0x544] sm:$0xf]  ;;  %v7339_v52 = vor.u32 %v9764_v44, %v7336_v45 }
 0x10c   :  { %5130 = vmatpush.bf16.msrb.mxu0 %v6971_v33  ;;  %v7064_v54 = vld [vmem:[#allocation3 + $0x550] sm:$0xf0]  ;;  %v9728_v55 = vld [vmem:[#allocation3 + $0x644] sm:$0xf]  ;;  %v6939_v63 = vor.u32 %v9664_v48, %v6936_v50  ;;  %v4917_v44 = vpop.f32.mrf.mxu3 }
 0x10d   :  { %5143 = vmatpush.bf16.msrb.mxu1 %v7099_v35  ;;  %v7192_v56 = vld [vmem:[#allocation3 + $0x650] sm:$0xf0]  ;;  %v9760_v59 = vld [vmem:[#allocation3 + $0x744] sm:$0xf]  ;;  %v7067_v5 = vor.u32 %v9696_v51, %v7064_v54 }
 0x10e   :  { %5156 = vmatpush.bf16.msrb.mxu2 %v7227_v36  ;;  %v7320_v61 = vld [vmem:[#allocation3 + $0x750] sm:$0xf0]  ;;  %v7195_v6 = vor.u32 %v9728_v55, %v7192_v56  ;;  %v9660_v7 = vld [vmem:[#allocation3 + $0x424] sm:$0xf] }
 0x10f   :  { %5169 = vmatpush.bf16.msrb.mxu3 %v7355_v40  ;;  %v6920_v11 = vld [vmem:[#allocation3 + $0x430] sm:$0xf0]  ;;  %v9692_v12 = vld [vmem:[#allocation3 + $0x524] sm:$0xf]  ;;  %v7323_v13 = vor.u32 %v9760_v59, %v7320_v61 }
 0x110   :  { %5131 = vmatpush.bf16.msrb.mxu0 %v6955_v46  ;;  %v7048_v16 = vld [vmem:[#allocation3 + $0x530] sm:$0xf0]  ;;  %v9724_v17 = vld [vmem:[#allocation3 + $0x624] sm:$0xf]  ;;  %v6923_v25 = vor.u32 %v9660_v7, %v6920_v11 }
 0x111   :  { %5144 = vmatpush.bf16.msrb.mxu1 %v7083_v49  ;;  %v7176_v18 = vld [vmem:[#allocation3 + $0x630] sm:$0xf0]  ;;  %v9756_v19 = vld [vmem:[#allocation3 + $0x724] sm:$0xf]  ;;  %v7051_v32 = vor.u32 %v9692_v12, %v7048_v16 }
 0x112   :  { %5157 = vmatpush.bf16.msrb.mxu2 %v7211_v47  ;;  %v7304_v20 = vld [vmem:[#allocation3 + $0x730] sm:$0xf0]  ;;  %v9656_v28 = vld [vmem:[#allocation3 + $0x404] sm:$0xf]  ;;  %v7179_v33 = vor.u32 %v9724_v17, %v7176_v18 }
 0x113   :  { %5170 = vmatpush.bf16.msrb.mxu3 %v7339_v52  ;;  %v6904_v31 = vld [vmem:[#allocation3 + $0x410] sm:$0xf0]  ;;  %v9688_v34 = vld [vmem:[#allocation3 + $0x504] sm:$0xf]  ;;  %v7307_v37 = vor.u32 %v9756_v19, %v7304_v20 }
 0x114   :  { %5132 = vmatpush.bf16.msrb.mxu0 %v6939_v63  ;;  %v7032_v35 = vld [vmem:[#allocation3 + $0x510] sm:$0xf0]  ;;  %v9720_v36 = vld [vmem:[#allocation3 + $0x604] sm:$0xf]  ;;  %v6907_v45 = vor.u32 %v9656_v28, %v6904_v31 }
 0x115   :  { %5145 = vmatpush.bf16.msrb.mxu1 %v7067_v5  ;;  %v7160_v38 = vld [vmem:[#allocation3 + $0x610] sm:$0xf0]  ;;  %v9752_v39 = vld [vmem:[#allocation3 + $0x704] sm:$0xf]  ;;  %v7035_v48 = vor.u32 %v9688_v34, %v7032_v35 }
 0x116   :  { %5158 = vmatpush.bf16.msrb.mxu2 %v7195_v6  ;;  %v7288_v40 = vld [vmem:[#allocation3 + $0x710] sm:$0xf0]  ;;  %v9812_v41 = vld [vmem:[#allocation3 + $0x8e4] sm:$0xf]  ;;  %v7163_v50 = vor.u32 %v9720_v36, %v7160_v38 }
 0x117   :  { %5171 = vmatpush.bf16.msrb.mxu3 %v7323_v13  ;;  %v7528_v42 = vld [vmem:[#allocation3 + $0x8f0] sm:$0xf0]  ;;  %v9844_v43 = vld [vmem:[#allocation3 + $0x9e4] sm:$0xf]  ;;  %v7291_v53 = vor.u32 %v9752_v39, %v7288_v40 }
 0x118   :  { %5133 = vmatpush.bf16.msrb.mxu0 %v6923_v25  ;;  %v7656_v46 = vld [vmem:[#allocation3 + $0x9f0] sm:$0xf0]  ;;  %v9876_v49 = vld [vmem:[#allocation3 + $0xae4] sm:$0xf]  ;;  %v7531_v54 = vor.u32 %v9812_v41, %v7528_v42 }
 0x119   :  { %v7784_v47 = vld [vmem:[#allocation3 + $0xaf0] sm:$0xf0]  ;;  %5146 = vmatpush.bf16.msrb.mxu1 %v7051_v32  ;;  %v9908_v51 = vld [vmem:[#allocation3 + $0xbe4] sm:$0xf]  ;;  %v7659_v55 = vor.u32 %v9844_v43, %v7656_v46 }
 0x11a   :  { %5159 = vmatpush.bf16.msrb.mxu2 %v7179_v33  ;;  %v7912_v52 = vld [vmem:[#allocation3 + $0xbf0] sm:$0xf0]  ;;  %v7787_v56 = vor.u32 %v9876_v49, %v7784_v47  ;;  %v9808_v57 = vld [vmem:[#allocation3 + $0x8c4] sm:$0xf]  ;;  %v4928_v41 = vpop.f32.mrf.mxu0 }
 0x11b   :  { %5172 = vmatpush.bf16.msrb.mxu3 %v7307_v37  ;;  %v7512_v58 = vld [vmem:[#allocation3 + $0x8d0] sm:$0xf0]  ;;  %v9840_v59 = vld [vmem:[#allocation3 + $0x9c4] sm:$0xf]  ;;  %v7915_v61 = vor.u32 %v9908_v51, %v7912_v52  ;;  %v4929_v44 = vadd.f32 %v4928_v41, %v10571_v4 }
 0x11c   :  { %5134 = vmatpush.bf16.msrb.mxu0 %v6907_v45  ;;  %v7640_v62 = vld [vmem:[#allocation3 + $0x9d0] sm:$0xf0]  ;;  %v9872_v63 = vld [vmem:[#allocation3 + $0xac4] sm:$0xf]  ;;  %v7515_v7 = vor.u32 %v9808_v57, %v7512_v58 }
 0x11d   :  { %v7768_v2 = vld [vmem:[#allocation3 + $0xad0] sm:$0xf0]  ;;  %5147 = vmatpush.bf16.msrb.mxu1 %v7035_v48  ;;  %v9904_v5 = vld [vmem:[#allocation3 + $0xbc4] sm:$0xf]  ;;  %v7643_v11 = vor.u32 %v9840_v59, %v7640_v62 }
 0x11e   :  { %5160 = vmatpush.bf16.msrb.mxu2 %v7163_v50  ;;  %v7896_v6 = vld [vmem:[#allocation3 + $0xbd0] sm:$0xf0]  ;;  %v7771_v12 = vor.u32 %v9872_v63, %v7768_v2  ;;  %v9804_v13 = vld [vmem:[#allocation3 + $0x8a4] sm:$0xf] }
 0x11f   :  { %5173 = vmatpush.bf16.msrb.mxu3 %v7291_v53  ;;  %v7496_v16 = vld [vmem:[#allocation3 + $0x8b0] sm:$0xf0]  ;;  %v9836_v17 = vld [vmem:[#allocation3 + $0x9a4] sm:$0xf]  ;;  %v7899_v18 = vor.u32 %v9904_v5, %v7896_v6  ;;  %5135 = vmatmul.bf16.vlgmr.msrb.gmra.mxu0 %v10521_v22  ;;  %v4941_v46 = vpop.f32.mrf.mxu1 }
 0x120   :  { %5179 = vmatpush.bf16.msra.mxu0 %v7531_v54  ;;  %v7624_v19 = vld [vmem:[#allocation3 + $0x9b0] sm:$0xf0]  ;;  %v9868_v20 = vld [vmem:[#allocation3 + $0xaa4] sm:$0xf]  ;;  %v7499_v32 = vor.u32 %v9804_v13, %v7496_v16  ;;  %5148 = vmatmul.bf16.vlgmr.msrb.gmra.mxu1 %v10525_v30  ;;  %v4942_v53 = vadd.f32 %v4941_v46, %v4929_v44 }
 0x121   :  { %5192 = vmatpush.bf16.msra.mxu1 %v7659_v55  ;;  %5161 = vmatmul.bf16.vlgmr.msrb.gmra.mxu2 %v10519_v21  ;;  %v7752_v25 = vld [vmem:[#allocation3 + $0xab0] sm:$0xf0]  ;;  %v9900_v28 = vld [vmem:[#allocation3 + $0xba4] sm:$0xf]  ;;  %v7627_v33 = vor.u32 %v9836_v17, %v7624_v19 }
 0x122   :  { %5205 = vmatpush.bf16.msra.mxu2 %v7787_v56  ;;  %5174 = vmatmul.bf16.vlgmr.msrb.gmra.mxu3 %v10523_v29  ;;  %v7880_v31 = vld [vmem:[#allocation3 + $0xbb0] sm:$0xf0]  ;;  %v7755_v34 = vor.u32 %v9868_v20, %v7752_v25  ;;  %v9800_v35 = vld [vmem:[#allocation3 + $0x884] sm:$0xf]  ;;  %v4954_v6 = vpop.f32.mrf.mxu2  ;;  %v4930_v19 = vpop.f32.mrf.mxu0 }
 0x123   :  { %5218 = vmatpush.bf16.msra.mxu3 %v7915_v61  ;;  %v7480_v36 = vld [vmem:[#allocation3 + $0x890] sm:$0xf0]  ;;  %v9832_v37 = vld [vmem:[#allocation3 + $0x984] sm:$0xf]  ;;  %v7883_v38 = vor.u32 %v9900_v28, %v7880_v31  ;;  %v4955_v13 = vadd.f32 %v4954_v6, %v4942_v53 }
 0x124   :  { %5180 = vmatpush.bf16.msra.mxu0 %v7515_v7  ;;  %v7608_v39 = vld [vmem:[#allocation3 + $0x990] sm:$0xf0]  ;;  %v9864_v40 = vld [vmem:[#allocation3 + $0xa84] sm:$0xf]  ;;  %v7483_v45 = vor.u32 %v9800_v35, %v7480_v36 }
 0x125   :  { %5193 = vmatpush.bf16.msra.mxu1 %v7643_v11  ;;  %v7736_v0 = vld [vmem:[#allocation3 + $0xa90] sm:$0xf0]  ;;  %v9896_v42 = vld [vmem:[#allocation3 + $0xb84] sm:$0xf]  ;;  %v7611_v49 = vor.u32 %v9832_v37, %v7608_v39 }
 0x126   :  { %5206 = vmatpush.bf16.msra.mxu2 %v7771_v12  ;;  %v7864_v43 = vld [vmem:[#allocation3 + $0xb90] sm:$0xf0]  ;;  %v7739_v47 = vor.u32 %v9864_v40, %v7736_v0  ;;  %v9796_v48 = vld [vmem:[#allocation3 + $0x864] sm:$0xf]  ;;  %v4967_v16 = vpop.f32.mrf.mxu3 }
 0x127   :  { %5219 = vmatpush.bf16.msra.mxu3 %v7899_v18  ;;  %v7464_v50 = vld [vmem:[#allocation3 + $0x870] sm:$0xf0]  ;;  %v9828_v51 = vld [vmem:[#allocation3 + $0x964] sm:$0xf]  ;;  %v7867_v52 = vor.u32 %v9896_v42, %v7864_v43  ;;  %v4943_v25 = vpop.f32.mrf.mxu1  ;;  %v10578_v28 = vadd.f32 %v4967_v16, %v4955_v13 }
 0x128   :  { %5181 = vmatpush.bf16.msra.mxu0 %v7499_v32  ;;  %v7592_v54 = vld [vmem:[#allocation3 + $0x970] sm:$0xf0]  ;;  %v9860_v55 = vld [vmem:[#allocation3 + $0xa64] sm:$0xf]  ;;  %v7467_v59 = vor.u32 %v9796_v48, %v7464_v50 }
 0x129   :  { %5194 = vmatpush.bf16.msra.mxu1 %v7627_v33  ;;  %v7720_v56 = vld [vmem:[#allocation3 + $0xa70] sm:$0xf0]  ;;  %v9892_v57 = vld [vmem:[#allocation3 + $0xb64] sm:$0xf]  ;;  %v7595_v4 = vor.u32 %v9828_v51, %v7592_v54 }
 0x12a   :  { %5207 = vmatpush.bf16.msra.mxu2 %v7755_v34  ;;  %v7848_v58 = vld [vmem:[#allocation3 + $0xb70] sm:$0xf0]  ;;  %v7723_v61 = vor.u32 %v9860_v55, %v7720_v56  ;;  %v9792_v62 = vld [vmem:[#allocation3 + $0x844] sm:$0xf]  ;;  %v4956_v53 = vpop.f32.mrf.mxu2 }
 0x12b   :  { %5220 = vmatpush.bf16.msra.mxu3 %v7883_v38  ;;  %v7448_v63 = vld [vmem:[#allocation3 + $0x850] sm:$0xf0]  ;;  %v9824_v2 = vld [vmem:[#allocation3 + $0x944] sm:$0xf]  ;;  %v7851_v5 = vor.u32 %v9892_v57, %v7848_v58 }
 0x12c   :  { %5182 = vmatpush.bf16.msra.mxu0 %v7483_v45  ;;  %v7576_v7 = vld [vmem:[#allocation3 + $0x950] sm:$0xf0]  ;;  %v9856_v11 = vld [vmem:[#allocation3 + $0xa44] sm:$0xf]  ;;  %v7451_v20 = vor.u32 %v9792_v62, %v7448_v63 }
 0x12d   :  { %5195 = vmatpush.bf16.msra.mxu1 %v7611_v49  ;;  %v7704_v12 = vld [vmem:[#allocation3 + $0xa50] sm:$0xf0]  ;;  %v9888_v17 = vld [vmem:[#allocation3 + $0xb44] sm:$0xf]  ;;  %v7579_v31 = vor.u32 %v9824_v2, %v7576_v7 }
 0x12e   :  { %5208 = vmatpush.bf16.msra.mxu2 %v7739_v47  ;;  %v7832_v18 = vld [vmem:[#allocation3 + $0xb50] sm:$0xf0]  ;;  %v7707_v32 = vor.u32 %v9856_v11, %v7704_v12  ;;  %v9788_v33 = vld [vmem:[#allocation3 + $0x824] sm:$0xf]  ;;  %v4969_v57 = vpop.f32.mrf.mxu3 }
 0x12f   :  { %5221 = vmatpush.bf16.msra.mxu3 %v7867_v52  ;;  %v7432_v34 = vld [vmem:[#allocation3 + $0x830] sm:$0xf0]  ;;  %v9820_v35 = vld [vmem:[#allocation3 + $0x924] sm:$0xf]  ;;  %v7835_v36 = vor.u32 %v9888_v17, %v7832_v18 }
 0x130   :  { %5183 = vmatpush.bf16.msra.mxu0 %v7467_v59  ;;  %v7560_v37 = vld [vmem:[#allocation3 + $0x930] sm:$0xf0]  ;;  %v9852_v38 = vld [vmem:[#allocation3 + $0xa24] sm:$0xf]  ;;  %v7435_v41 = vor.u32 %v9788_v33, %v7432_v34 }
 0x131   :  { %5196 = vmatpush.bf16.msra.mxu1 %v7595_v4  ;;  %v7688_v39 = vld [vmem:[#allocation3 + $0xa30] sm:$0xf0]  ;;  %v9884_v40 = vld [vmem:[#allocation3 + $0xb24] sm:$0xf]  ;;  %v7563_v44 = vor.u32 %v9820_v35, %v7560_v37 }
 0x132   :  { %5209 = vmatpush.bf16.msra.mxu2 %v7723_v61  ;;  %v7816_v0 = vld [vmem:[#allocation3 + $0xb30] sm:$0xf0]  ;;  %v9784_v42 = vld [vmem:[#allocation3 + $0x804] sm:$0xf]  ;;  %v7691_v45 = vor.u32 %v9852_v38, %v7688_v39 }
 0x133   :  { %5222 = vmatpush.bf16.msra.mxu3 %v7851_v5  ;;  %v7416_v43 = vld [vmem:[#allocation3 + $0x810] sm:$0xf0]  ;;  %v9816_v46 = vld [vmem:[#allocation3 + $0x904] sm:$0xf]  ;;  %v7819_v48 = vor.u32 %v9884_v40, %v7816_v0 }
 0x134   :  { %5184 = vmatpush.bf16.msra.mxu0 %v7451_v20  ;;  %v7544_v49 = vld [vmem:[#allocation3 + $0x910] sm:$0xf0]  ;;  %v9848_v47 = vld [vmem:[#allocation3 + $0xa04] sm:$0xf]  ;;  %v7419_v58 = vor.u32 %v9784_v42, %v7416_v43 }
 0x135   :  { %5197 = vmatpush.bf16.msra.mxu1 %v7579_v31  ;;  %v7672_v50 = vld [vmem:[#allocation3 + $0xa10] sm:$0xf0]  ;;  %v9880_v51 = vld [vmem:[#allocation3 + $0xb04] sm:$0xf]  ;;  %v7547_v62 = vor.u32 %v9816_v46, %v7544_v49 }
 0x136   :  { %5210 = vmatpush.bf16.msra.mxu2 %v7707_v32  ;;  %v7800_v52 = vld [vmem:[#allocation3 + $0xb10] sm:$0xf0]  ;;  %v9940_v54 = vld [vmem:[#allocation3 + $0xce4] sm:$0xf]  ;;  %v7675_v63 = vor.u32 %v9848_v47, %v7672_v50 }
 0x137   :  { %5223 = vmatpush.bf16.msra.mxu3 %v7835_v36  ;;  %v8040_v55 = vld [vmem:[#allocation3 + $0xcf0] sm:$0xf0]  ;;  %v9972_v56 = vld [vmem:[#allocation3 + $0xde4] sm:$0xf]  ;;  %v7803_v6 = vor.u32 %v9880_v51, %v7800_v52 }
 0x138   :  { %5185 = vmatpush.bf16.msra.mxu0 %v7435_v41  ;;  %v8168_v59 = vld [vmem:[#allocation3 + $0xdf0] sm:$0xf0]  ;;  %v10004_v4 = vld [vmem:[#allocation3 + $0xee4] sm:$0xf]  ;;  %v8043_v7 = vor.u32 %v9940_v54, %v8040_v55 }
 0x139   :  { %v8296_v61 = vld [vmem:[#allocation3 + $0xef0] sm:$0xf0]  ;;  %5198 = vmatpush.bf16.msra.mxu1 %v7563_v44  ;;  %v10036_v2 = vld [vmem:[#allocation3 + $0xfe4] sm:$0xf]  ;;  %v8171_v11 = vor.u32 %v9972_v56, %v8168_v59 }
 0x13a   :  { %5211 = vmatpush.bf16.msra.mxu2 %v7691_v45  ;;  %v8424_v5 = vld [vmem:[#allocation3 + $0xff0] sm:$0xf0]  ;;  %v8299_v12 = vor.u32 %v10004_v4, %v8296_v61  ;;  %v9936_v13 = vld [vmem:[#allocation3 + $0xcc4] sm:$0xf]  ;;  %v4980_v54 = vpop.f32.mrf.mxu0 }
 0x13b   :  { %5224 = vmatpush.bf16.msra.mxu3 %v7819_v48  ;;  %v8024_v16 = vld [vmem:[#allocation3 + $0xcd0] sm:$0xf0]  ;;  %v9968_v17 = vld [vmem:[#allocation3 + $0xdc4] sm:$0xf]  ;;  %v8427_v18 = vor.u32 %v10036_v2, %v8424_v5  ;;  %v4981_v57 = vadd.f32 %v4980_v54, %v10578_v28 }
 0x13c   :  { %5186 = vmatpush.bf16.msra.mxu0 %v7419_v58  ;;  %v8152_v19 = vld [vmem:[#allocation3 + $0xdd0] sm:$0xf0]  ;;  %v10000_v20 = vld [vmem:[#allocation3 + $0xec4] sm:$0xf]  ;;  %v8027_v33 = vor.u32 %v9936_v13, %v8024_v16 }
 0x13d   :  { %v8280_v25 = vld [vmem:[#allocation3 + $0xed0] sm:$0xf0]  ;;  %5199 = vmatpush.bf16.msra.mxu1 %v7547_v62  ;;  %v10032_v31 = vld [vmem:[#allocation3 + $0xfc4] sm:$0xf]  ;;  %v8155_v34 = vor.u32 %v9968_v17, %v8152_v19 }
 0x13e   :  { %5212 = vmatpush.bf16.msra.mxu2 %v7675_v63  ;;  %v8408_v32 = vld [vmem:[#allocation3 + $0xfd0] sm:$0xf0]  ;;  %v8283_v35 = vor.u32 %v10000_v20, %v8280_v25  ;;  %v9932_v36 = vld [vmem:[#allocation3 + $0xca4] sm:$0xf] }
 0x13f   :  { %5225 = vmatpush.bf16.msra.mxu3 %v7803_v6  ;;  %v8008_v37 = vld [vmem:[#allocation3 + $0xcb0] sm:$0xf0]  ;;  %v9964_v38 = vld [vmem:[#allocation3 + $0xda4] sm:$0xf]  ;;  %5187 = vmatmul.bf16.vlgmr.msra.gmra.mxu0 %v10531_v3  ;;  %v8411_v39 = vor.u32 %v10032_v31, %v8408_v32 }
 0x140   :  { %5231 = vmatpush.bf16.msrb.mxu0 %v8043_v7  ;;  %v8136_v40 = vld [vmem:[#allocation3 + $0xdb0] sm:$0xf0]  ;;  %v9996_v0 = vld [vmem:[#allocation3 + $0xea4] sm:$0xf]  ;;  %5200 = vmatmul.bf16.vlgmr.msra.gmra.mxu1 %v10535_v14  ;;  %v8011_v44 = vor.u32 %v9932_v36, %v8008_v37 }
 0x141   :  { %5244 = vmatpush.bf16.msrb.mxu1 %v8171_v11  ;;  %v8264_v41 = vld [vmem:[#allocation3 + $0xeb0] sm:$0xf0]  ;;  %5213 = vmatmul.bf16.vlgmr.msra.gmra.mxu2 %v10533_v8  ;;  %v10028_v42 = vld [vmem:[#allocation3 + $0xfa4] sm:$0xf]  ;;  %v8139_v45 = vor.u32 %v9964_v38, %v8136_v40  ;;  %v4993_v59 = vpop.f32.mrf.mxu1 }
 0x142   :  { %5257 = vmatpush.bf16.msrb.mxu2 %v8299_v12  ;;  %v8392_v43 = vld [vmem:[#allocation3 + $0xfb0] sm:$0xf0]  ;;  %5226 = vmatmul.bf16.vlgmr.msra.gmra.mxu3 %v10537_v15  ;;  %v8267_v46 = vor.u32 %v9996_v0, %v8264_v41  ;;  %v9928_v49 = vld [vmem:[#allocation3 + $0xc84] sm:$0xf]  ;;  %v4994_v6 = vadd.f32 %v4993_v59, %v4981_v57  ;;  %v4982_v40 = vpop.f32.mrf.mxu0 }
 0x143   :  { %5270 = vmatpush.bf16.msrb.mxu3 %v8427_v18  ;;  %v7992_v47 = vld [vmem:[#allocation3 + $0xc90] sm:$0xf0]  ;;  %v9960_v48 = vld [vmem:[#allocation3 + $0xd84] sm:$0xf]  ;;  %v8395_v50 = vor.u32 %v10028_v42, %v8392_v43 }
 0x144   :  { %5232 = vmatpush.bf16.msrb.mxu0 %v8027_v33  ;;  %v8120_v51 = vld [vmem:[#allocation3 + $0xd90] sm:$0xf0]  ;;  %v9992_v52 = vld [vmem:[#allocation3 + $0xe84] sm:$0xf]  ;;  %v7995_v58 = vor.u32 %v9928_v49, %v7992_v47  ;;  %v5006_v32 = vpop.f32.mrf.mxu2 }
 0x145   :  { %5245 = vmatpush.bf16.msrb.mxu1 %v8155_v34  ;;  %v8248_v53 = vld [vmem:[#allocation3 + $0xe90] sm:$0xf0]  ;;  %v10024_v55 = vld [vmem:[#allocation3 + $0xf84] sm:$0xf]  ;;  %v8123_v4 = vor.u32 %v9960_v48, %v8120_v51  ;;  %v5007_v36 = vadd.f32 %v5006_v32, %v4994_v6 }
 0x146   :  { %5258 = vmatpush.bf16.msrb.mxu2 %v8283_v35  ;;  %v8376_v56 = vld [vmem:[#allocation3 + $0xf90] sm:$0xf0]  ;;  %v8251_v61 = vor.u32 %v9992_v52, %v8248_v53  ;;  %v9924_v62 = vld [vmem:[#allocation3 + $0xc64] sm:$0xf] }
 0x147   :  { %5271 = vmatpush.bf16.msrb.mxu3 %v8411_v39  ;;  %v7976_v63 = vld [vmem:[#allocation3 + $0xc70] sm:$0xf0]  ;;  %v9956_v2 = vld [vmem:[#allocation3 + $0xd64] sm:$0xf]  ;;  %v8379_v5 = vor.u32 %v10024_v55, %v8376_v56 }
 0x148   :  { %5233 = vmatpush.bf16.msrb.mxu0 %v8011_v44  ;;  %v8104_v7 = vld [vmem:[#allocation3 + $0xd70] sm:$0xf0]  ;;  %v9988_v11 = vld [vmem:[#allocation3 + $0xe64] sm:$0xf]  ;;  %v7979_v17 = vor.u32 %v9924_v62, %v7976_v63  ;;  %v5019_v37 = vpop.f32.mrf.mxu3 }
 0x149   :  { %5246 = vmatpush.bf16.msrb.mxu1 %v8139_v45  ;;  %v8232_v12 = vld [vmem:[#allocation3 + $0xe70] sm:$0xf0]  ;;  %v10020_v13 = vld [vmem:[#allocation3 + $0xf64] sm:$0xf]  ;;  %v8107_v28 = vor.u32 %v9956_v2, %v8104_v7  ;;  %v4995_v41 = vpop.f32.mrf.mxu1  ;;  %v10585_v42 = vadd.f32 %v5019_v37, %v5007_v36 }
 0x14a   :  { %5259 = vmatpush.bf16.msrb.mxu2 %v8267_v46  ;;  %v8360_v16 = vld [vmem:[#allocation3 + $0xf70] sm:$0xf0]  ;;  %v8235_v18 = vor.u32 %v9988_v11, %v8232_v12  ;;  %v9920_v19 = vld [vmem:[#allocation3 + $0xc44] sm:$0xf] }
 0x14b   :  { %5272 = vmatpush.bf16.msrb.mxu3 %v8395_v50  ;;  %v7960_v20 = vld [vmem:[#allocation3 + $0xc50] sm:$0xf0]  ;;  %v9952_v25 = vld [vmem:[#allocation3 + $0xd44] sm:$0xf]  ;;  %v8363_v31 = vor.u32 %v10020_v13, %v8360_v16 }
 0x14c   :  { %5234 = vmatpush.bf16.msrb.mxu0 %v7995_v58  ;;  %v8088_v33 = vld [vmem:[#allocation3 + $0xd50] sm:$0xf0]  ;;  %v9984_v34 = vld [vmem:[#allocation3 + $0xe44] sm:$0xf]  ;;  %v7963_v0 = vor.u32 %v9920_v19, %v7960_v20  ;;  %v5008_v6 = vpop.f32.mrf.mxu2 }
 0x14d   :  { %5247 = vmatpush.bf16.msrb.mxu1 %v8123_v4  ;;  %v8216_v35 = vld [vmem:[#allocation3 + $0xe50] sm:$0xf0]  ;;  %v10016_v38 = vld [vmem:[#allocation3 + $0xf44] sm:$0xf]  ;;  %v8091_v43 = vor.u32 %v9952_v25, %v8088_v33 }
 0x14e   :  { %5260 = vmatpush.bf16.msrb.mxu2 %v8251_v61  ;;  %v8344_v39 = vld [vmem:[#allocation3 + $0xf50] sm:$0xf0]  ;;  %v8219_v44 = vor.u32 %v9984_v34, %v8216_v35  ;;  %v9916_v45 = vld [vmem:[#allocation3 + $0xc24] sm:$0xf] }
 0x14f   :  { %5273 = vmatpush.bf16.msrb.mxu3 %v8379_v5  ;;  %v7944_v46 = vld [vmem:[#allocation3 + $0xc30] sm:$0xf0]  ;;  %v9948_v49 = vld [vmem:[#allocation3 + $0xd24] sm:$0xf]  ;;  %v8347_v47 = vor.u32 %v10016_v38, %v8344_v39 }
 0x150   :  { %5235 = vmatpush.bf16.msrb.mxu0 %v7979_v17  ;;  %v8072_v48 = vld [vmem:[#allocation3 + $0xd30] sm:$0xf0]  ;;  %v9980_v50 = vld [vmem:[#allocation3 + $0xe24] sm:$0xf]  ;;  %v7947_v54 = vor.u32 %v9916_v45, %v7944_v46  ;;  %v5021_v13 = vpop.f32.mrf.mxu3 }
 0x151   :  { %5248 = vmatpush.bf16.msrb.mxu1 %v8107_v28  ;;  %v8200_v51 = vld [vmem:[#allocation3 + $0xe30] sm:$0xf0]  ;;  %v10012_v52 = vld [vmem:[#allocation3 + $0xf24] sm:$0xf]  ;;  %v8075_v57 = vor.u32 %v9948_v49, %v8072_v48 }
 0x152   :  { %5261 = vmatpush.bf16.msrb.mxu2 %v8235_v18  ;;  %v8328_v53 = vld [vmem:[#allocation3 + $0xf30] sm:$0xf0]  ;;  %v9912_v55 = vld [vmem:[#allocation3 + $0xc04] sm:$0xf]  ;;  %v8203_v58 = vor.u32 %v9980_v50, %v8200_v51 }
 0x153   :  { %5274 = vmatpush.bf16.msrb.mxu3 %v8363_v31  ;;  %v7928_v56 = vld [vmem:[#allocation3 + $0xc10] sm:$0xf0]  ;;  %v9944_v59 = vld [vmem:[#allocation3 + $0xd04] sm:$0xf]  ;;  %v8331_v62 = vor.u32 %v10012_v52, %v8328_v53 }
 0x154   :  { %5236 = vmatpush.bf16.msrb.mxu0 %v7963_v0  ;;  %v8056_v4 = vld [vmem:[#allocation3 + $0xd10] sm:$0xf0]  ;;  %v9976_v61 = vld [vmem:[#allocation3 + $0xe04] sm:$0xf]  ;;  %v7931_v16 = vor.u32 %v9912_v55, %v7928_v56 }
 0x155   :  { %5249 = vmatpush.bf16.msrb.mxu1 %v8091_v43  ;;  %v8184_v63 = vld [vmem:[#allocation3 + $0xe10] sm:$0xf0]  ;;  %v10008_v2 = vld [vmem:[#allocation3 + $0xf04] sm:$0xf]  ;;  %v8059_v19 = vor.u32 %v9944_v59, %v8056_v4 }
 0x156   :  { %5262 = vmatpush.bf16.msrb.mxu2 %v8219_v44  ;;  %v8312_v5 = vld [vmem:[#allocation3 + $0xf10] sm:$0xf0]  ;;  %v10068_v7 = vld [vmem:[#allocation3 + $0x10e4] sm:$0xf]  ;;  %v8187_v20 = vor.u32 %v9976_v61, %v8184_v63 }
 0x157   :  { %5275 = vmatpush.bf16.msrb.mxu3 %v8347_v47  ;;  %v8552_v11 = vld [vmem:[#allocation3 + $0x10f0] sm:$0xf0]  ;;  %v10100_v12 = vld [vmem:[#allocation3 + $0x11e4] sm:$0xf]  ;;  %v8315_v32 = vor.u32 %v10008_v2, %v8312_v5 }
 0x158   :  { %5237 = vmatpush.bf16.msrb.mxu0 %v7947_v54  ;;  %v8680_v17 = vld [vmem:[#allocation3 + $0x11f0] sm:$0xf0]  ;;  %v10132_v28 = vld [vmem:[#allocation3 + $0x12e4] sm:$0xf]  ;;  %v8555_v33 = vor.u32 %v10068_v7, %v8552_v11 }
 0x159   :  { %v8808_v18 = vld [vmem:[#allocation3 + $0x12f0] sm:$0xf0]  ;;  %5250 = vmatpush.bf16.msrb.mxu1 %v8075_v57  ;;  %v10164_v25 = vld [vmem:[#allocation3 + $0x13e4] sm:$0xf]  ;;  %v8683_v34 = vor.u32 %v10100_v12, %v8680_v17 }
 0x15a   :  { %5263 = vmatpush.bf16.msrb.mxu2 %v8203_v58  ;;  %v8936_v31 = vld [vmem:[#allocation3 + $0x13f0] sm:$0xf0]  ;;  %v8811_v35 = vor.u32 %v10132_v28, %v8808_v18  ;;  %v10064_v36 = vld [vmem:[#allocation3 + $0x10c4] sm:$0xf] }
 0x15b   :  { %5276 = vmatpush.bf16.msrb.mxu3 %v8331_v62  ;;  %v8536_v37 = vld [vmem:[#allocation3 + $0x10d0] sm:$0xf0]  ;;  %v10096_v38 = vld [vmem:[#allocation3 + $0x11c4] sm:$0xf]  ;;  %v8939_v39 = vor.u32 %v10164_v25, %v8936_v31 }
 0x15c   :  { %5238 = vmatpush.bf16.msrb.mxu0 %v7931_v16  ;;  %v8664_v40 = vld [vmem:[#allocation3 + $0x11d0] sm:$0xf0]  ;;  %v10128_v0 = vld [vmem:[#allocation3 + $0x12c4] sm:$0xf]  ;;  %v8539_v45 = vor.u32 %v10064_v36, %v8536_v37  ;;  %v5032_v7 = vpop.f32.mrf.mxu0 }
 0x15d   :  { %v8792_v41 = vld [vmem:[#allocation3 + $0x12d0] sm:$0xf0]  ;;  %5251 = vmatpush.bf16.msrb.mxu1 %v8059_v19  ;;  %v10160_v43 = vld [vmem:[#allocation3 + $0x13c4] sm:$0xf]  ;;  %v8667_v46 = vor.u32 %v10096_v38, %v8664_v40  ;;  %v5033_v13 = vadd.f32 %v5032_v7, %v10585_v42  ;;  %v5045_v17 = vpop.f32.mrf.mxu1 }
 0x15e   :  { %5264 = vmatpush.bf16.msrb.mxu2 %v8187_v20  ;;  %v8920_v44 = vld [vmem:[#allocation3 + $0x13d0] sm:$0xf0]  ;;  %v8795_v49 = vor.u32 %v10128_v0, %v8792_v41  ;;  %v10060_v47 = vld [vmem:[#allocation3 + $0x10a4] sm:$0xf] }
 0x15f   :  { %5277 = vmatpush.bf16.msrb.mxu3 %v8315_v32  ;;  %v8520_v48 = vld [vmem:[#allocation3 + $0x10b0] sm:$0xf0]  ;;  %v10092_v50 = vld [vmem:[#allocation3 + $0x11a4] sm:$0xf]  ;;  %5239 = vmatmul.bf16.vlgmr.msrb.gmra.mxu0 %v10546_v60  ;;  %v8923_v51 = vor.u32 %v10160_v43, %v8920_v44  ;;  %v5046_v32 = vadd.f32 %v5045_v17, %v5033_v13 }
 0x160   :  { %5283 = vmatpush.bf16.msra.mxu0 %v8555_v33  ;;  %v8648_v52 = vld [vmem:[#allocation3 + $0x11b0] sm:$0xf0]  ;;  %v10124_v53 = vld [vmem:[#allocation3 + $0x12a4] sm:$0xf]  ;;  %5252 = vmatmul.bf16.vlgmr.msrb.gmra.mxu1 %v10550_v9  ;;  %v8523_v57 = vor.u32 %v10060_v47, %v8520_v48 }
 0x161   :  { %5296 = vmatpush.bf16.msra.mxu1 %v8683_v34  ;;  %v8776_v54 = vld [vmem:[#allocation3 + $0x12b0] sm:$0xf0]  ;;  %5265 = vmatmul.bf16.vlgmr.msrb.gmra.mxu2 %v10548_v1  ;;  %v10156_v55 = vld [vmem:[#allocation3 + $0x13a4] sm:$0xf]  ;;  %v8651_v58 = vor.u32 %v10092_v50, %v8648_v52 }
 0x162   :  { %5309 = vmatpush.bf16.msra.mxu2 %v8811_v35  ;;  %v8904_v56 = vld [vmem:[#allocation3 + $0x13b0] sm:$0xf0]  ;;  %5278 = vmatmul.bf16.vlgmr.msrb.gmra.mxu3 %v10552_v10  ;;  %v8779_v59 = vor.u32 %v10124_v53, %v8776_v54  ;;  %v10056_v4 = vld [vmem:[#allocation3 + $0x1084] sm:$0xf] }
 0x163   :  { %5322 = vmatpush.bf16.msra.mxu3 %v8939_v39  ;;  %v8504_v61 = vld [vmem:[#allocation3 + $0x1090] sm:$0xf0]  ;;  %v10088_v62 = vld [vmem:[#allocation3 + $0x1184] sm:$0xf]  ;;  %v8907_v63 = vor.u32 %v10156_v55, %v8904_v56 }
 0x164   :  { %5284 = vmatpush.bf16.msra.mxu0 %v8539_v45  ;;  %v8632_v2 = vld [vmem:[#allocation3 + $0x1190] sm:$0xf0]  ;;  %v10120_v5 = vld [vmem:[#allocation3 + $0x1284] sm:$0xf]  ;;  %v8507_v16 = vor.u32 %v10056_v4, %v8504_v61  ;;  %v5058_v44 = vpop.f32.mrf.mxu2  ;;  %v5034_v52 = vpop.f32.mrf.mxu0 }
 0x165   :  { %5297 = vmatpush.bf16.msra.mxu1 %v8667_v46  ;;  %v8760_v6 = vld [vmem:[#allocation3 + $0x1290] sm:$0xf0]  ;;  %v10152_v11 = vld [vmem:[#allocation3 + $0x1384] sm:$0xf]  ;;  %v8635_v28 = vor.u32 %v10088_v62, %v8632_v2  ;;  %v5059_v47 = vadd.f32 %v5058_v44, %v5046_v32  ;;  %v5071_v48 = vpop.f32.mrf.mxu3  ;;  %v5047_v54 = vpop.f32.mrf.mxu1 }
 0x166   :  { %5310 = vmatpush.bf16.msra.mxu2 %v8795_v49  ;;  %v8888_v12 = vld [vmem:[#allocation3 + $0x1390] sm:$0xf0]  ;;  %v8763_v18 = vor.u32 %v10120_v5, %v8760_v6  ;;  %v10052_v19 = vld [vmem:[#allocation3 + $0x1064] sm:$0xf] }
 0x167   :  { %5323 = vmatpush.bf16.msra.mxu3 %v8923_v51  ;;  %v8488_v20 = vld [vmem:[#allocation3 + $0x1070] sm:$0xf0]  ;;  %v10084_v25 = vld [vmem:[#allocation3 + $0x1164] sm:$0xf]  ;;  %v8891_v31 = vor.u32 %v10152_v11, %v8888_v12  ;;  %v10592_v55 = vadd.f32 %v5071_v48, %v5059_v47 }
 0x168   :  { %5285 = vmatpush.bf16.msra.mxu0 %v8523_v57  ;;  %v8616_v33 = vld [vmem:[#allocation3 + $0x1170] sm:$0xf0]  ;;  %v10116_v34 = vld [vmem:[#allocation3 + $0x1264] sm:$0xf]  ;;  %v8491_v38 = vor.u32 %v10052_v19, %v8488_v20 }
 0x169   :  { %5298 = vmatpush.bf16.msra.mxu1 %v8651_v58  ;;  %v8744_v35 = vld [vmem:[#allocation3 + $0x1270] sm:$0xf0]  ;;  %v10148_v36 = vld [vmem:[#allocation3 + $0x1364] sm:$0xf]  ;;  %v8619_v42 = vor.u32 %v10084_v25, %v8616_v33 }
 0x16a   :  { %5311 = vmatpush.bf16.msra.mxu2 %v8779_v59  ;;  %v8872_v37 = vld [vmem:[#allocation3 + $0x1370] sm:$0xf0]  ;;  %v8747_v39 = vor.u32 %v10116_v34, %v8744_v35  ;;  %v10048_v40 = vld [vmem:[#allocation3 + $0x1044] sm:$0xf] }
 0x16b   :  { %5324 = vmatpush.bf16.msra.mxu3 %v8907_v63  ;;  %v8472_v0 = vld [vmem:[#allocation3 + $0x1050] sm:$0xf0]  ;;  %v10080_v41 = vld [vmem:[#allocation3 + $0x1144] sm:$0xf]  ;;  %v8875_v43 = vor.u32 %v10148_v36, %v8872_v37 }
 0x16c   :  { %5286 = vmatpush.bf16.msra.mxu0 %v8507_v16  ;;  %v8600_v45 = vld [vmem:[#allocation3 + $0x1150] sm:$0xf0]  ;;  %v10112_v46 = vld [vmem:[#allocation3 + $0x1244] sm:$0xf]  ;;  %v8475_v53 = vor.u32 %v10048_v40, %v8472_v0  ;;  %v5060_v32 = vpop.f32.mrf.mxu2 }
 0x16d   :  { %5299 = vmatpush.bf16.msra.mxu1 %v8635_v28  ;;  %v8728_v49 = vld [vmem:[#allocation3 + $0x1250] sm:$0xf0]  ;;  %v10144_v50 = vld [vmem:[#allocation3 + $0x1344] sm:$0xf]  ;;  %v8603_v56 = vor.u32 %v10080_v41, %v8600_v45  ;;  %v5073_v36 = vpop.f32.mrf.mxu3 }
 0x16e   :  { %5312 = vmatpush.bf16.msra.mxu2 %v8763_v18  ;;  %v8856_v51 = vld [vmem:[#allocation3 + $0x1350] sm:$0xf0]  ;;  %v8731_v57 = vor.u32 %v10112_v46, %v8728_v49  ;;  %v10044_v58 = vld [vmem:[#allocation3 + $0x1024] sm:$0xf] }
 0x16f   :  { %5325 = vmatpush.bf16.msra.mxu3 %v8891_v31  ;;  %v8456_v59 = vld [vmem:[#allocation3 + $0x1030] sm:$0xf0]  ;;  %v10076_v4 = vld [vmem:[#allocation3 + $0x1124] sm:$0xf]  ;;  %v8859_v61 = vor.u32 %v10144_v50, %v8856_v51 }
 0x170   :  { %5287 = vmatpush.bf16.msra.mxu0 %v8491_v38  ;;  %v8584_v62 = vld [vmem:[#allocation3 + $0x1130] sm:$0xf0]  ;;  %v10108_v63 = vld [vmem:[#allocation3 + $0x1224] sm:$0xf]  ;;  %v8459_v7 = vor.u32 %v10044_v58, %v8456_v59 }
 0x171   :  { %5300 = vmatpush.bf16.msra.mxu1 %v8619_v42  ;;  %v8712_v2 = vld [vmem:[#allocation3 + $0x1230] sm:$0xf0]  ;;  %v10140_v5 = vld [vmem:[#allocation3 + $0x1324] sm:$0xf]  ;;  %v8587_v13 = vor.u32 %v10076_v4, %v8584_v62 }
 0x172   :  { %5313 = vmatpush.bf16.msra.mxu2 %v8747_v39  ;;  %v8840_v6 = vld [vmem:[#allocation3 + $0x1330] sm:$0xf0]  ;;  %v10040_v11 = vld [vmem:[#allocation3 + $0x1004] sm:$0xf]  ;;  %v8715_v16 = vor.u32 %v10108_v63, %v8712_v2 }
 0x173   :  { %5326 = vmatpush.bf16.msra.mxu3 %v8875_v43  ;;  %v8440_v12 = vld [vmem:[#allocation3 + $0x1010] sm:$0xf0]  ;;  %v10072_v17 = vld [vmem:[#allocation3 + $0x1104] sm:$0xf]  ;;  %v8843_v19 = vor.u32 %v10140_v5, %v8840_v6 }
 0x174   :  { %5288 = vmatpush.bf16.msra.mxu0 %v8475_v53  ;;  %v8568_v28 = vld [vmem:[#allocation3 + $0x1110] sm:$0xf0]  ;;  %v10104_v18 = vld [vmem:[#allocation3 + $0x1204] sm:$0xf]  ;;  %v8443_v37 = vor.u32 %v10040_v11, %v8440_v12 }
 0x175   :  { %5301 = vmatpush.bf16.msra.mxu1 %v8603_v56  ;;  %v8696_v20 = vld [vmem:[#allocation3 + $0x1210] sm:$0xf0]  ;;  %v10136_v25 = vld [vmem:[#allocation3 + $0x1304] sm:$0xf]  ;;  %v8571_v40 = vor.u32 %v10072_v17, %v8568_v28 }
 0x176   :  { %5314 = vmatpush.bf16.msra.mxu2 %v8731_v57  ;;  %v8824_v31 = vld [vmem:[#allocation3 + $0x1310] sm:$0xf0]  ;;  %v10196_v33 = vld [vmem:[#allocation3 + $0x14e4] sm:$0xf]  ;;  %v8699_v0 = vor.u32 %v10104_v18, %v8696_v20 }
 0x177   :  { %5327 = vmatpush.bf16.msra.mxu3 %v8859_v61  ;;  %v9064_v34 = vld [vmem:[#allocation3 + $0x14f0] sm:$0xf0]  ;;  %v10228_v35 = vld [vmem:[#allocation3 + $0x15e4] sm:$0xf]  ;;  %v8827_v44 = vor.u32 %v10136_v25, %v8824_v31 }
 0x178   :  { %5289 = vmatpush.bf16.msra.mxu0 %v8459_v7  ;;  %v9192_v38 = vld [vmem:[#allocation3 + $0x15f0] sm:$0xf0]  ;;  %v10260_v42 = vld [vmem:[#allocation3 + $0x16e4] sm:$0xf]  ;;  %v9067_v45 = vor.u32 %v10196_v33, %v9064_v34 }
 0x179   :  { %v9320_v39 = vld [vmem:[#allocation3 + $0x16f0] sm:$0xf0]  ;;  %5302 = vmatpush.bf16.msra.mxu1 %v8587_v13  ;;  %v10292_v41 = vld [vmem:[#allocation3 + $0x17e4] sm:$0xf]  ;;  %v9195_v46 = vor.u32 %v10228_v35, %v9192_v38 }
 0x17a   :  { %5315 = vmatpush.bf16.msra.mxu2 %v8715_v16  ;;  %v9448_v43 = vld [vmem:[#allocation3 + $0x17f0] sm:$0xf0]  ;;  %v9323_v49 = vor.u32 %v10260_v42, %v9320_v39  ;;  %v10192_v47 = vld [vmem:[#allocation3 + $0x14c4] sm:$0xf] }
 0x17b   :  { %5328 = vmatpush.bf16.msra.mxu3 %v8843_v19  ;;  %v9048_v48 = vld [vmem:[#allocation3 + $0x14d0] sm:$0xf0]  ;;  %v10224_v50 = vld [vmem:[#allocation3 + $0x15c4] sm:$0xf]  ;;  %v9451_v51 = vor.u32 %v10292_v41, %v9448_v43 }
 0x17c   :  { %5290 = vmatpush.bf16.msra.mxu0 %v8443_v37  ;;  %v9176_v52 = vld [vmem:[#allocation3 + $0x15d0] sm:$0xf0]  ;;  %v10256_v53 = vld [vmem:[#allocation3 + $0x16c4] sm:$0xf]  ;;  %v9051_v58 = vor.u32 %v10192_v47, %v9048_v48  ;;  %v5084_v39 = vpop.f32.mrf.mxu0 }
 0x17d   :  { %v9304_v54 = vld [vmem:[#allocation3 + $0x16d0] sm:$0xf0]  ;;  %5303 = vmatpush.bf16.msra.mxu1 %v8571_v40  ;;  %v10288_v56 = vld [vmem:[#allocation3 + $0x17c4] sm:$0xf]  ;;  %v9179_v59 = vor.u32 %v10224_v50, %v9176_v52 }
 0x17e   :  { %5316 = vmatpush.bf16.msra.mxu2 %v8699_v0  ;;  %v9432_v57 = vld [vmem:[#allocation3 + $0x17d0] sm:$0xf0]  ;;  %v9307_v4 = vor.u32 %v10256_v53, %v9304_v54  ;;  %v10188_v61 = vld [vmem:[#allocation3 + $0x14a4] sm:$0xf] }
 0x17f   :  { %5329 = vmatpush.bf16.msra.mxu3 %v8827_v44  ;;  %v9032_v62 = vld [vmem:[#allocation3 + $0x14b0] sm:$0xf0]  ;;  %v10220_v63 = vld [vmem:[#allocation3 + $0x15a4] sm:$0xf]  ;;  %v9435_v5 = vor.u32 %v10288_v56, %v9432_v57 }
 0x180   :  { %5335 = vmatpush.bf16.msrb.mxu0 %v9067_v45  ;;  %v10594_v2 = vld.sshfl [vmem:[#allocation1] sm:$0xff pattern:$0x73625140]  ;;  %v9160_v6 = vld [vmem:[#allocation3 + $0x15b0] sm:$0xf0]  ;;  %v9035_v18 = vor.u32 %v10188_v61, %v9032_v62  ;;  %v5097_v45 = vpop.f32.mrf.mxu1 }
 0x181   :  { %5348 = vmatpush.bf16.msrb.mxu1 %v9195_v46  ;;  %5291 = vmatmul.bf16.vlgmr.msra.gmra.mxu0 %v10594_v2  ;;  %v10252_v7 = vld [vmem:[#allocation3 + $0x16a4] sm:$0xf]  ;;  %v9288_v11 = vld [vmem:[#allocation3 + $0x16b0] sm:$0xf0]  ;;  %v9163_v19 = vor.u32 %v10220_v63, %v9160_v6  ;;  %v5098_v50 = vadd.f32 %v5097_v45, %v5084_v39 }
 0x182   :  { %5361 = vmatpush.bf16.msrb.mxu2 %v9323_v49  ;;  %v10324_v12 = vld.sshfl [vmem:[#allocation1 + $0x10] sm:$0xff pattern:$0x73625140]  ;;  %v10597_v13 = vld.sshfl [vmem:[#allocation1 + $0x8] sm:$0xff pattern:$0x73625140]  ;;  %v9291_v20 = vor.u32 %v10252_v7, %v9288_v11 }
 0x183   :  { %5374 = vmatpush.bf16.msrb.mxu3 %v9451_v51  ;;  %5317 = vmatmul.bf16.vlgmr.msra.gmra.mxu2 %v10324_v12  ;;  %v10284_v16 = vld [vmem:[#allocation3 + $0x17a4] sm:$0xf]  ;;  %v9416_v17 = vld [vmem:[#allocation3 + $0x17b0] sm:$0xf0] }
 0x184   :  { %5304 = vmatmul.bf16.vlgmr.msra.gmra.mxu1 %v10597_v13  ;;  %v10326_v28 = vld.sshfl [vmem:[#allocation1 + $0x18] sm:$0xff pattern:$0x73625140]  ;;  %5336 = vmatpush.bf16.msrb.mxu0 %v9051_v58  ;;  %v10184_v25 = vld [vmem:[#allocation3 + $0x1484] sm:$0xf]  ;;  %v9419_v33 = vor.u32 %v10284_v16, %v9416_v17 }
 0x185   :  { %5330 = vmatmul.bf16.vlgmr.msra.gmra.mxu3 %v10326_v28  ;;  %5349 = vmatpush.bf16.msrb.mxu1 %v9179_v59  ;;  %v9016_v31 = vld [vmem:[#allocation3 + $0x1490] sm:$0xf0]  ;;  %v10216_v32 = vld [vmem:[#allocation3 + $0x1584] sm:$0xf]  ;;  %v5123_v7 = vpop.f32.mrf.mxu3  ;;  %v5086_v28 = vpop.f32.mrf.mxu0 }
 0x186   :  { %5362 = vmatpush.bf16.msrb.mxu2 %v9307_v4  ;;  %v9144_v34 = vld [vmem:[#allocation3 + $0x1590] sm:$0xf0]  ;;  %v10248_v35 = vld [vmem:[#allocation3 + $0x1684] sm:$0xf]  ;;  %v9019_v42 = vor.u32 %v10184_v25, %v9016_v31  ;;  %v5110_v4 = vpop.f32.mrf.mxu2  ;;  %v6622_v28 = vld [vmem:[#allocation3 + $0x1c8] sm:$0xf] }
 0x187   :  { %5375 = vmatpush.bf16.msrb.mxu3 %v9435_v5  ;;  %v9272_v36 = vld [vmem:[#allocation3 + $0x1690] sm:$0xf0]  ;;  %v10280_v37 = vld [vmem:[#allocation3 + $0x1784] sm:$0xf]  ;;  %v9147_v40 = vor.u32 %v10216_v32, %v9144_v34  ;;  %v5111_v6 = vadd.f32 %v5110_v4, %v5098_v50 }
 0x188   :  { %v9400_v38 = vld [vmem:[#allocation3 + $0x1790] sm:$0xf0]  ;;  %5337 = vmatpush.bf16.msrb.mxu0 %v9035_v18  ;;  %v9275_v0 = vor.u32 %v10248_v35, %v9272_v36  ;;  %v10180_v41 = vld [vmem:[#allocation3 + $0x1464] sm:$0xf]  ;;  %v5099_v32 = vpop.f32.mrf.mxu1 }
 0x189   :  { %5350 = vmatpush.bf16.msrb.mxu1 %v9163_v19  ;;  %v9000_v43 = vld [vmem:[#allocation3 + $0x1470] sm:$0xf0]  ;;  %v10212_v44 = vld [vmem:[#allocation3 + $0x1564] sm:$0xf]  ;;  %v9403_v46 = vor.u32 %v10280_v37, %v9400_v38  ;;  %v10600_v17 = vadd.f32 %v5123_v7, %v5111_v6  ;;  %v9651_v32 = vld [vmem:[#allocation3 + $0x3d4] sm:$0xf0] }
 0x18a   :  { %5363 = vmatpush.bf16.msrb.mxu2 %v9291_v20  ;;  %v9128_v49 = vld [vmem:[#allocation3 + $0x1570] sm:$0xf0]  ;;  %v10244_v47 = vld [vmem:[#allocation3 + $0x1664] sm:$0xf]  ;;  %v9003_v53 = vor.u32 %v10180_v41, %v9000_v43 }
 0x18b   :  { %5376 = vmatpush.bf16.msrb.mxu3 %v9419_v33  ;;  %v9256_v48 = vld [vmem:[#allocation3 + $0x1670] sm:$0xf0]  ;;  %v10276_v51 = vld [vmem:[#allocation3 + $0x1764] sm:$0xf]  ;;  %v9131_v54 = vor.u32 %v10212_v44, %v9128_v49 }
 0x18c   :  { %v9384_v52 = vld [vmem:[#allocation3 + $0x1770] sm:$0xf0]  ;;  %5338 = vmatpush.bf16.msrb.mxu0 %v9019_v42  ;;  %v9259_v56 = vor.u32 %v10244_v47, %v9256_v48  ;;  %v10176_v57 = vld [vmem:[#allocation3 + $0x1444] sm:$0xf] }
 0x18d   :  { %5351 = vmatpush.bf16.msrb.mxu1 %v9147_v40  ;;  %v8984_v58 = vld [vmem:[#allocation3 + $0x1450] sm:$0xf0]  ;;  %v10208_v59 = vld [vmem:[#allocation3 + $0x1544] sm:$0xf]  ;;  %v9387_v61 = vor.u32 %v10276_v51, %v9384_v52  ;;  %v5125_v51 = vpop.f32.mrf.mxu3  ;;  %v6510_v52 = vld [vmem:[#allocation3 + $0xe8] sm:$0xf] }
 0x18e   :  { %5364 = vmatpush.bf16.msrb.mxu2 %v9275_v0  ;;  %v9112_v62 = vld [vmem:[#allocation3 + $0x1550] sm:$0xf0]  ;;  %v10240_v63 = vld [vmem:[#allocation3 + $0x1644] sm:$0xf]  ;;  %v8987_v16 = vor.u32 %v10176_v57, %v8984_v58  ;;  %v9591_v57 = vld [vmem:[#allocation3 + $0x1f4] sm:$0xf0] }
 0x18f   :  { %5377 = vmatpush.bf16.msrb.mxu3 %v9403_v46  ;;  %v9240_v5 = vld [vmem:[#allocation3 + $0x1650] sm:$0xf0]  ;;  %v10272_v11 = vld [vmem:[#allocation3 + $0x1744] sm:$0xf]  ;;  %v9115_v18 = vor.u32 %v10208_v59, %v9112_v62  ;;  %v5112_v46 = vpop.f32.mrf.mxu2  ;;  %v6766_v58 = vld [vmem:[#allocation3 + $0x2e8] sm:$0xf] }
 0x190   :  { %v9368_v12 = vld [vmem:[#allocation3 + $0x1750] sm:$0xf0]  ;;  %5339 = vmatpush.bf16.msrb.mxu0 %v9003_v53  ;;  %v9243_v19 = vor.u32 %v10240_v63, %v9240_v5  ;;  %v10172_v20 = vld [vmem:[#allocation3 + $0x1424] sm:$0xf]  ;;  %v9559_v53 = vld [vmem:[#allocation3 + $0xf4] sm:$0xf0] }
 0x191   :  { %5352 = vmatpush.bf16.msrb.mxu1 %v9131_v54  ;;  %v8968_v25 = vld [vmem:[#allocation3 + $0x1430] sm:$0xf0]  ;;  %v10204_v31 = vld [vmem:[#allocation3 + $0x1524] sm:$0xf]  ;;  %v9371_v33 = vor.u32 %v10272_v11, %v9368_v12  ;;  %v6638_v54 = vld [vmem:[#allocation3 + $0x1e8] sm:$0xf]  ;;  %v6511_v6 = vor.u32 %v9559_v53, %v6510_v52 }
 0x192   :  { %5365 = vmatpush.bf16.msrb.mxu2 %v9259_v56  ;;  %v9096_v34 = vld [vmem:[#allocation3 + $0x1530] sm:$0xf0]  ;;  %v10236_v35 = vld [vmem:[#allocation3 + $0x1624] sm:$0xf]  ;;  %v8971_v42 = vor.u32 %v10172_v20, %v8968_v25  ;;  %v9623_v59 = vld [vmem:[#allocation3 + $0x2f4] sm:$0xf0]  ;;  %v6639_v7 = vor.u32 %v9591_v57, %v6638_v54 }
 0x193   :  { %5378 = vmatpush.bf16.msrb.mxu3 %v9387_v61  ;;  %v9224_v36 = vld [vmem:[#allocation3 + $0x1630] sm:$0xf0]  ;;  %v10268_v37 = vld [vmem:[#allocation3 + $0x1724] sm:$0xf]  ;;  %v9099_v0 = vor.u32 %v10204_v31, %v9096_v34  ;;  %v6894_v62 = vld [vmem:[#allocation3 + $0x3e8] sm:$0xf]  ;;  %v6767_v11 = vor.u32 %v9623_v59, %v6766_v58 }
 0x194   :  { %v9352_v38 = vld [vmem:[#allocation3 + $0x1730] sm:$0xf0]  ;;  %5340 = vmatpush.bf16.msrb.mxu0 %v8987_v16  ;;  %v10168_v39 = vld [vmem:[#allocation3 + $0x1404] sm:$0xf]  ;;  %v9227_v41 = vor.u32 %v10236_v35, %v9224_v36  ;;  %v9655_v63 = vld [vmem:[#allocation3 + $0x3f4] sm:$0xf0] }
 0x195   :  { %v8952_v40 = vld [vmem:[#allocation3 + $0x1410] sm:$0xf0]  ;;  %5353 = vmatpush.bf16.msrb.mxu1 %v9115_v18  ;;  %v10200_v43 = vld [vmem:[#allocation3 + $0x1504] sm:$0xf]  ;;  %v9355_v49 = vor.u32 %v10268_v37, %v9352_v38  ;;  %v6494_v12 = vld [vmem:[#allocation3 + $0xc8] sm:$0xf]  ;;  %v6895_v18 = vor.u32 %v9655_v63, %v6894_v62 }
 0x196   :  { %5366 = vmatpush.bf16.msrb.mxu2 %v9243_v19  ;;  %v9080_v44 = vld [vmem:[#allocation3 + $0x1510] sm:$0xf0]  ;;  %v10232_v45 = vld [vmem:[#allocation3 + $0x1604] sm:$0xf]  ;;  %v8955_v56 = vor.u32 %v10168_v39, %v8952_v40  ;;  %v9555_v16 = vld [vmem:[#allocation3 + $0xd4] sm:$0xf0] }
 0x197   :  { %5379 = vmatpush.bf16.msrb.mxu3 %v9371_v33  ;;  %v9208_v47 = vld [vmem:[#allocation3 + $0x1610] sm:$0xf0]  ;;  %v10264_v48 = vld [vmem:[#allocation3 + $0x1704] sm:$0xf]  ;;  %v9083_v4 = vor.u32 %v10200_v43, %v9080_v44  ;;  %v9587_v19 = vld [vmem:[#allocation3 + $0x1d4] sm:$0xf0]  ;;  %v6495_v33 = vor.u32 %v9555_v16, %v6494_v12 }
 0x198   :  { %v9336_v50 = vld [vmem:[#allocation3 + $0x1710] sm:$0xf0]  ;;  %5341 = vmatpush.bf16.msrb.mxu0 %v8971_v42  ;;  %v9211_v61 = vor.u32 %v10232_v45, %v9208_v47  ;;  %v6750_v20 = vld [vmem:[#allocation3 + $0x2c8] sm:$0xf]  ;;  %v9619_v25 = vld [vmem:[#allocation3 + $0x2d4] sm:$0xf0]  ;;  %v6623_v34 = vor.u32 %v9587_v19, %v6622_v28 }
 0x199   :  { %5354 = vmatpush.bf16.msrb.mxu1 %v9099_v0  ;;  %v9339_v5 = vor.u32 %v10264_v48, %v9336_v50  ;;  %v6878_v31 = vld [vmem:[#allocation3 + $0x3c8] sm:$0xf]  ;;  %v6751_v35 = vor.u32 %v9619_v25, %v6750_v20  ;;  %v9551_v37 = vld [vmem:[#allocation3 + $0xb4] sm:$0xf0] }
 0x19a   :  { %5367 = vmatpush.bf16.msrb.mxu2 %v9227_v41  ;;  %v6478_v36 = vld [vmem:[#allocation3 + $0xa8] sm:$0xf]  ;;  %v10327_v42 = vld.sshfl [vmem:[#allocation1 + $0x20] sm:$0xff pattern:$0x73625140]  ;;  %v6879_v39 = vor.u32 %v9651_v32, %v6878_v31 }
 0x19b   :  { %5380 = vmatpush.bf16.msrb.mxu3 %v9355_v49  ;;  %v6606_v38 = vld [vmem:[#allocation3 + $0x1a8] sm:$0xf]  ;;  %v9583_v40 = vld [vmem:[#allocation3 + $0x1b4] sm:$0xf0]  ;;  %v6479_v47 = vor.u32 %v9551_v37, %v6478_v36 }
 0x19c   :  { %5342 = vmatpush.bf16.msrb.mxu0 %v8955_v56  ;;  %v6734_v0 = vld [vmem:[#allocation3 + $0x2a8] sm:$0xf]  ;;  %v9615_v41 = vld [vmem:[#allocation3 + $0x2b4] sm:$0xf0]  ;;  %v6607_v48 = vor.u32 %v9583_v40, %v6606_v38  ;;  %v5136_v62 = vpop.f32.mrf.mxu0 }
 0x19d   :  { %5355 = vmatpush.bf16.msrb.mxu1 %v9083_v4  ;;  %v10328_v43 = vld.sshfl [vmem:[#allocation1 + $0x30] sm:$0xff pattern:$0x73625140]  ;;  %v10329_v44 = vld.sshfl [vmem:[#allocation1 + $0x28] sm:$0xff pattern:$0x73625140]  ;;  %v6735_v50 = vor.u32 %v9615_v41, %v6734_v0  ;;  %v5137_v12 = vadd.f32 %v5136_v62, %v10600_v17  ;;  %v5149_v16 = vpop.f32.mrf.mxu1 }
 0x19e   :  { %5368 = vmatpush.bf16.msrb.mxu2 %v9211_v61  ;;  %v6862_v45 = vld [vmem:[#allocation3 + $0x3a8] sm:$0xf]  ;;  %v9647_v46 = vld [vmem:[#allocation3 + $0x3b4] sm:$0xf0] }
 0x19f   :  { %5381 = vmatpush.bf16.msrb.mxu3 %v9339_v5  ;;  %5343 = vmatmul.bf16.vlgmr.msrb.gmra.mxu0 %v10327_v42  ;;  %v10330_v49 = vld.sshfl [vmem:[#allocation1 + $0x38] sm:$0xff pattern:$0x73625140]  ;;  %v6462_v51 = vld [vmem:[#allocation3 + $0x88] sm:$0xf]  ;;  %v6863_v54 = vor.u32 %v9647_v46, %v6862_v45  ;;  %v5150_v32 = vadd.f32 %v5149_v16, %v5137_v12 }
 0x1a0   :  { %5387 = vmatpush.bf16.msra.mxu0 %v6511_v6  ;;  %5356 = vmatmul.bf16.vlgmr.msrb.gmra.mxu1 %v10329_v44  ;;  %v9547_v52 = vld [vmem:[#allocation3 + $0x94] sm:$0xf0]  ;;  %v6590_v53 = vld [vmem:[#allocation3 + $0x188] sm:$0xf] }
 0x1a1   :  { %5400 = vmatpush.bf16.msra.mxu1 %v6639_v7  ;;  %5369 = vmatmul.bf16.vlgmr.msrb.gmra.mxu2 %v10328_v43  ;;  %v9579_v56 = vld [vmem:[#allocation3 + $0x194] sm:$0xf0]  ;;  %v6718_v57 = vld [vmem:[#allocation3 + $0x288] sm:$0xf]  ;;  %v6463_v61 = vor.u32 %v9547_v52, %v6462_v51 }
 0x1a2   :  { %5413 = vmatpush.bf16.msra.mxu2 %v6767_v11  ;;  %5382 = vmatmul.bf16.vlgmr.msrb.gmra.mxu3 %v10330_v49  ;;  %v9611_v58 = vld [vmem:[#allocation3 + $0x294] sm:$0xf0]  ;;  %v6846_v59 = vld [vmem:[#allocation3 + $0x388] sm:$0xf]  ;;  %v6591_v63 = vor.u32 %v9579_v56, %v6590_v53 }
 0x1a3   :  { %5426 = vmatpush.bf16.msra.mxu3 %v6895_v18  ;;  %v9643_v4 = vld [vmem:[#allocation3 + $0x394] sm:$0xf0]  ;;  %v6719_v5 = vor.u32 %v9611_v58, %v6718_v57  ;;  %v6446_v6 = vld [vmem:[#allocation3 + $0x68] sm:$0xf] }
 0x1a4   :  { %5388 = vmatpush.bf16.msra.mxu0 %v6495_v33  ;;  %v9543_v7 = vld [vmem:[#allocation3 + $0x74] sm:$0xf0]  ;;  %v6574_v11 = vld [vmem:[#allocation3 + $0x168] sm:$0xf]  ;;  %v6847_v28 = vor.u32 %v9643_v4, %v6846_v59  ;;  %v5162_v42 = vpop.f32.mrf.mxu2 }
 0x1a5   :  { %5401 = vmatpush.bf16.msra.mxu1 %v6623_v34  ;;  %v9575_v18 = vld [vmem:[#allocation3 + $0x174] sm:$0xf0]  ;;  %v6702_v19 = vld [vmem:[#allocation3 + $0x268] sm:$0xf]  ;;  %v6447_v33 = vor.u32 %v9543_v7, %v6446_v6  ;;  %v5163_v41 = vadd.f32 %v5162_v42, %v5150_v32  ;;  %v5175_v43 = vpop.f32.mrf.mxu3 }
 0x1a6   :  { %5414 = vmatpush.bf16.msra.mxu2 %v6751_v35  ;;  %v9607_v20 = vld [vmem:[#allocation3 + $0x274] sm:$0xf0]  ;;  %v6830_v25 = vld [vmem:[#allocation3 + $0x368] sm:$0xf]  ;;  %v6575_v34 = vor.u32 %v9575_v18, %v6574_v11 }
 0x1a7   :  { %5427 = vmatpush.bf16.msra.mxu3 %v6879_v39  ;;  %v9639_v31 = vld [vmem:[#allocation3 + $0x374] sm:$0xf0]  ;;  %v6703_v35 = vor.u32 %v9607_v20, %v6702_v19  ;;  %v6430_v36 = vld [vmem:[#allocation3 + $0x48] sm:$0xf]  ;;  %v10603_v49 = vadd.f32 %v5175_v43, %v5163_v41 }
 0x1a8   :  { %5389 = vmatpush.bf16.msra.mxu0 %v6479_v47  ;;  %v9539_v37 = vld [vmem:[#allocation3 + $0x54] sm:$0xf0]  ;;  %v6558_v38 = vld [vmem:[#allocation3 + $0x148] sm:$0xf]  ;;  %v6831_v17 = vor.u32 %v9639_v31, %v6830_v25  ;;  %v5138_v47 = vpop.f32.mrf.mxu0 }
 0x1a9   :  { %5402 = vmatpush.bf16.msra.mxu1 %v6607_v48  ;;  %v9571_v39 = vld [vmem:[#allocation3 + $0x154] sm:$0xf0]  ;;  %v6686_v40 = vld [vmem:[#allocation3 + $0x248] sm:$0xf]  ;;  %v6431_v46 = vor.u32 %v9539_v37, %v6430_v36 }
 0x1aa   :  { %5415 = vmatpush.bf16.msra.mxu2 %v6735_v50  ;;  %v9603_v0 = vld [vmem:[#allocation3 + $0x254] sm:$0xf0]  ;;  %v6814_v44 = vld [vmem:[#allocation3 + $0x348] sm:$0xf]  ;;  %v6559_v48 = vor.u32 %v9571_v39, %v6558_v38 }
 0x1ab   :  { %5428 = vmatpush.bf16.msra.mxu3 %v6863_v54  ;;  %v9635_v45 = vld [vmem:[#allocation3 + $0x354] sm:$0xf0]  ;;  %v6687_v50 = vor.u32 %v9603_v0, %v6686_v40  ;;  %v6414_v51 = vld [vmem:[#allocation3 + $0x28] sm:$0xf]  ;;  %v5151_v54 = vpop.f32.mrf.mxu1 }
 0x1ac   :  { %5390 = vmatpush.bf16.msra.mxu0 %v6463_v61  ;;  %v9535_v52 = vld [vmem:[#allocation3 + $0x34] sm:$0xf0]  ;;  %v6542_v53 = vld [vmem:[#allocation3 + $0x128] sm:$0xf]  ;;  %v6815_v56 = vor.u32 %v9635_v45, %v6814_v44 }
 0x1ad   :  { %5403 = vmatpush.bf16.msra.mxu1 %v6591_v63  ;;  %v9567_v57 = vld [vmem:[#allocation3 + $0x134] sm:$0xf0]  ;;  %v6670_v58 = vld [vmem:[#allocation3 + $0x228] sm:$0xf]  ;;  %v6415_v62 = vor.u32 %v9535_v52, %v6414_v51  ;;  %v5177_v31 = vpop.f32.mrf.mxu3 }
 0x1ae   :  { %5416 = vmatpush.bf16.msra.mxu2 %v6719_v5  ;;  %v9599_v59 = vld [vmem:[#allocation3 + $0x234] sm:$0xf0]  ;;  %v6798_v4 = vld [vmem:[#allocation3 + $0x328] sm:$0xf]  ;;  %v6543_v6 = vor.u32 %v9567_v57, %v6542_v53 }
 0x1af   :  { %5429 = vmatpush.bf16.msra.mxu3 %v6847_v28  ;;  %v9631_v61 = vld [vmem:[#allocation3 + $0x334] sm:$0xf0]  ;;  %v6398_v63 = vld [vmem:[#allocation3 + $0x8] sm:$0xf]  ;;  %v6671_v7 = vor.u32 %v9599_v59, %v6670_v58  ;;  %v5164_v28 = vpop.f32.mrf.mxu2 }
 0x1b0   :  { %5391 = vmatpush.bf16.msra.mxu0 %v6447_v33  ;;  %v9531_v5 = vld [vmem:[#allocation3 + $0x14] sm:$0xf0]  ;;  %v6526_v11 = vld [vmem:[#allocation3 + $0x108] sm:$0xf]  ;;  %v6799_v18 = vor.u32 %v9631_v61, %v6798_v4 }
 0x1b1   :  { %5404 = vmatpush.bf16.msra.mxu1 %v6575_v34  ;;  %v9563_v12 = vld [vmem:[#allocation3 + $0x114] sm:$0xf0]  ;;  %v6654_v16 = vld [vmem:[#allocation3 + $0x208] sm:$0xf] }
 0x1b2   :  { %5417 = vmatpush.bf16.msra.mxu2 %v6703_v35  ;;  %v9595_v19 = vld [vmem:[#allocation3 + $0x214] sm:$0xf0]  ;;  %v6782_v20 = vld [vmem:[#allocation3 + $0x308] sm:$0xf]  ;;  %v6399_v35 = vor.u32 %v9531_v5, %v6398_v63  ;;  %v6527_v42 = vor.u32 %v9563_v12, %v6526_v11 }
 0x1b3   :  { %5430 = vmatpush.bf16.msra.mxu3 %v6831_v17  ;;  %v9627_v25 = vld [vmem:[#allocation3 + $0x314] sm:$0xf0]  ;;  %v7022_v32 = vld [vmem:[#allocation3 + $0x4e8] sm:$0xf]  ;;  %v6655_v17 = vor.u32 %v9595_v19, %v6654_v16 }
 0x1b4   :  { %5392 = vmatpush.bf16.msra.mxu0 %v6431_v46  ;;  %v9687_v33 = vld [vmem:[#allocation3 + $0x4f4] sm:$0xf0]  ;;  %v7150_v34 = vld [vmem:[#allocation3 + $0x5e8] sm:$0xf]  ;;  %v6783_v0 = vor.u32 %v9627_v25, %v6782_v20 }
 0x1b5   :  { %5405 = vmatpush.bf16.msra.mxu1 %v6559_v48  ;;  %v9719_v36 = vld [vmem:[#allocation3 + $0x5f4] sm:$0xf0]  ;;  %v7278_v37 = vld [vmem:[#allocation3 + $0x6e8] sm:$0xf]  ;;  %v7023_v41 = vor.u32 %v9687_v33, %v7022_v32 }
 0x1b6   :  { %5418 = vmatpush.bf16.msra.mxu2 %v6687_v50  ;;  %v9751_v38 = vld [vmem:[#allocation3 + $0x6f4] sm:$0xf0]  ;;  %v7406_v39 = vld [vmem:[#allocation3 + $0x7e8] sm:$0xf]  ;;  %v7151_v43 = vor.u32 %v9719_v36, %v7150_v34 }
 0x1b7   :  { %5431 = vmatpush.bf16.msra.mxu3 %v6815_v56  ;;  %v9783_v40 = vld [vmem:[#allocation3 + $0x7f4] sm:$0xf0]  ;;  %v7279_v44 = vor.u32 %v9751_v38, %v7278_v37  ;;  %v7006_v45 = vld [vmem:[#allocation3 + $0x4c8] sm:$0xf] }
 0x1b8   :  { %5393 = vmatpush.bf16.msra.mxu0 %v6415_v62  ;;  %v9683_v46 = vld [vmem:[#allocation3 + $0x4d4] sm:$0xf0]  ;;  %v7134_v47 = vld [vmem:[#allocation3 + $0x5c8] sm:$0xf]  ;;  %v7407_v48 = vor.u32 %v9783_v40, %v7406_v39 }
 0x1b9   :  { %5406 = vmatpush.bf16.msra.mxu1 %v6543_v6  ;;  %v9715_v50 = vld [vmem:[#allocation3 + $0x5d4] sm:$0xf0]  ;;  %v7262_v51 = vld [vmem:[#allocation3 + $0x6c8] sm:$0xf]  ;;  %v7007_v56 = vor.u32 %v9683_v46, %v7006_v45 }
 0x1ba   :  { %5419 = vmatpush.bf16.msra.mxu2 %v6671_v7  ;;  %v9747_v52 = vld [vmem:[#allocation3 + $0x6d4] sm:$0xf0]  ;;  %v7390_v53 = vld [vmem:[#allocation3 + $0x7c8] sm:$0xf]  ;;  %v7135_v57 = vor.u32 %v9715_v50, %v7134_v47 }
 0x1bb   :  { %5432 = vmatpush.bf16.msra.mxu3 %v6799_v18  ;;  %v9779_v54 = vld [vmem:[#allocation3 + $0x7d4] sm:$0xf0]  ;;  %v7263_v58 = vor.u32 %v9747_v52, %v7262_v51  ;;  %v6990_v59 = vld [vmem:[#allocation3 + $0x4a8] sm:$0xf] }
 0x1bc   :  { %5394 = vmatpush.bf16.msra.mxu0 %v6399_v35  ;;  %v9679_v4 = vld [vmem:[#allocation3 + $0x4b4] sm:$0xf0]  ;;  %v7118_v61 = vld [vmem:[#allocation3 + $0x5a8] sm:$0xf]  ;;  %v7391_v62 = vor.u32 %v9779_v54, %v7390_v53  ;;  %v5188_v34 = vpop.f32.mrf.mxu0 }
 0x1bd   :  { %5407 = vmatpush.bf16.msra.mxu1 %v6527_v42  ;;  %v9711_v63 = vld [vmem:[#allocation3 + $0x5b4] sm:$0xf0]  ;;  %v7246_v5 = vld [vmem:[#allocation3 + $0x6a8] sm:$0xf]  ;;  %v6991_v12 = vor.u32 %v9679_v4, %v6990_v59  ;;  %v5189_v37 = vadd.f32 %v5188_v34, %v10603_v49  ;;  %v5201_v42 = vpop.f32.mrf.mxu1 }
 0x1be   :  { %5420 = vmatpush.bf16.msra.mxu2 %v6655_v17  ;;  %v9743_v6 = vld [vmem:[#allocation3 + $0x6b4] sm:$0xf0]  ;;  %v7374_v7 = vld [vmem:[#allocation3 + $0x7a8] sm:$0xf]  ;;  %v7119_v16 = vor.u32 %v9711_v63, %v7118_v61 }
 0x1bf   :  { %5433 = vmatpush.bf16.msra.mxu3 %v6783_v0  ;;  %v9775_v11 = vld [vmem:[#allocation3 + $0x7b4] sm:$0xf0]  ;;  %5395 = vmatmul.bf16.vlgmr.msra.gmra.mxu0 %v10503_v24  ;;  %v7247_v28 = vor.u32 %v9743_v6, %v7246_v5  ;;  %v6974_v18 = vld [vmem:[#allocation3 + $0x488] sm:$0xf] }
 0x1c0   :  { %5439 = vmatpush.bf16.msrb.mxu0 %v7023_v41  ;;  %5408 = vmatmul.bf16.vlgmr.msra.gmra.mxu1 %v10508_v27  ;;  %v9675_v19 = vld [vmem:[#allocation3 + $0x494] sm:$0xf0]  ;;  %v7102_v20 = vld [vmem:[#allocation3 + $0x588] sm:$0xf]  ;;  %v7375_v25 = vor.u32 %v9775_v11, %v7374_v7 }
 0x1c1   :  { %5452 = vmatpush.bf16.msrb.mxu1 %v7151_v43  ;;  %5421 = vmatmul.bf16.vlgmr.msra.gmra.mxu2 %v10501_v23  ;;  %v9707_v31 = vld [vmem:[#allocation3 + $0x594] sm:$0xf0]  ;;  %v7230_v32 = vld [vmem:[#allocation3 + $0x688] sm:$0xf]  ;;  %v6975_v38 = vor.u32 %v9675_v19, %v6974_v18 }
 0x1c2   :  { %5465 = vmatpush.bf16.msrb.mxu2 %v7279_v44  ;;  %5434 = vmatmul.bf16.vlgmr.msra.gmra.mxu3 %v10506_v26  ;;  %v9739_v33 = vld [vmem:[#allocation3 + $0x694] sm:$0xf0]  ;;  %v7358_v35 = vld [vmem:[#allocation3 + $0x788] sm:$0xf]  ;;  %v7103_v17 = vor.u32 %v9707_v31, %v7102_v20  ;;  %v5202_v44 = vadd.f32 %v5201_v42, %v5189_v37 }
 0x1c3   :  { %5478 = vmatpush.bf16.msrb.mxu3 %v7407_v48  ;;  %v9771_v36 = vld [vmem:[#allocation3 + $0x794] sm:$0xf0]  ;;  %v7231_v39 = vor.u32 %v9739_v33, %v7230_v32  ;;  %v6958_v40 = vld [vmem:[#allocation3 + $0x468] sm:$0xf] }
 0x1c4   :  { %5440 = vmatpush.bf16.msrb.mxu0 %v7007_v56  ;;  %v9671_v0 = vld [vmem:[#allocation3 + $0x474] sm:$0xf0]  ;;  %v7086_v41 = vld [vmem:[#allocation3 + $0x568] sm:$0xf]  ;;  %v7359_v43 = vor.u32 %v9771_v36, %v7358_v35  ;;  %v5190_v7 = vpop.f32.mrf.mxu0 }
 0x1c5   :  { %5453 = vmatpush.bf16.msrb.mxu1 %v7135_v57  ;;  %v9703_v45 = vld [vmem:[#allocation3 + $0x574] sm:$0xf0]  ;;  %v7214_v46 = vld [vmem:[#allocation3 + $0x668] sm:$0xf]  ;;  %v6959_v51 = vor.u32 %v9671_v0, %v6958_v40  ;;  %v5227_v63 = vpop.f32.mrf.mxu3 }
 0x1c6   :  { %5466 = vmatpush.bf16.msrb.mxu2 %v7263_v58  ;;  %v9735_v47 = vld [vmem:[#allocation3 + $0x674] sm:$0xf0]  ;;  %v7342_v48 = vld [vmem:[#allocation3 + $0x768] sm:$0xf]  ;;  %v7087_v49 = vor.u32 %v9703_v45, %v7086_v41  ;;  %v5214_v58 = vpop.f32.mrf.mxu2 }
 0x1c7   :  { %5479 = vmatpush.bf16.msrb.mxu3 %v7391_v62  ;;  %v9767_v50 = vld [vmem:[#allocation3 + $0x774] sm:$0xf0]  ;;  %v7215_v52 = vor.u32 %v9735_v47, %v7214_v46  ;;  %v6942_v53 = vld [vmem:[#allocation3 + $0x448] sm:$0xf]  ;;  %v5215_v62 = vadd.f32 %v5214_v58, %v5202_v44 }
 0x1c8   :  { %5441 = vmatpush.bf16.msrb.mxu0 %v6991_v12  ;;  %v9667_v54 = vld [vmem:[#allocation3 + $0x454] sm:$0xf0]  ;;  %v7070_v56 = vld [vmem:[#allocation3 + $0x548] sm:$0xf]  ;;  %v7343_v57 = vor.u32 %v9767_v50, %v7342_v48  ;;  %v5203_v12 = vpop.f32.mrf.mxu1 }
 0x1c9   :  { %5454 = vmatpush.bf16.msrb.mxu1 %v7119_v16  ;;  %v9699_v59 = vld [vmem:[#allocation3 + $0x554] sm:$0xf0]  ;;  %v7198_v4 = vld [vmem:[#allocation3 + $0x648] sm:$0xf]  ;;  %v6943_v11 = vor.u32 %v9667_v54, %v6942_v53  ;;  %v10610_v16 = vadd.f32 %v5227_v63, %v5215_v62 }
 0x1ca   :  { %5467 = vmatpush.bf16.msrb.mxu2 %v7247_v28  ;;  %v9731_v61 = vld [vmem:[#allocation3 + $0x654] sm:$0xf0]  ;;  %v7326_v5 = vld [vmem:[#allocation3 + $0x748] sm:$0xf]  ;;  %v7071_v28 = vor.u32 %v9699_v59, %v7070_v56 }
 0x1cb   :  { %5480 = vmatpush.bf16.msrb.mxu3 %v7375_v25  ;;  %v9763_v6 = vld [vmem:[#allocation3 + $0x754] sm:$0xf0]  ;;  %v7199_v18 = vor.u32 %v9731_v61, %v7198_v4  ;;  %v6926_v19 = vld [vmem:[#allocation3 + $0x428] sm:$0xf] }
 0x1cc   :  { %5442 = vmatpush.bf16.msrb.mxu0 %v6975_v38  ;;  %v9663_v20 = vld [vmem:[#allocation3 + $0x434] sm:$0xf0]  ;;  %v7054_v25 = vld [vmem:[#allocation3 + $0x528] sm:$0xf]  ;;  %v7327_v31 = vor.u32 %v9763_v6, %v7326_v5 }
 0x1cd   :  { %5455 = vmatpush.bf16.msrb.mxu1 %v7103_v17  ;;  %v9695_v32 = vld [vmem:[#allocation3 + $0x534] sm:$0xf0]  ;;  %v7182_v33 = vld [vmem:[#allocation3 + $0x628] sm:$0xf]  ;;  %v6927_v37 = vor.u32 %v9663_v20, %v6926_v19 }
 0x1ce   :  { %5468 = vmatpush.bf16.msrb.mxu2 %v7231_v39  ;;  %v9727_v34 = vld [vmem:[#allocation3 + $0x634] sm:$0xf0]  ;;  %v7310_v35 = vld [vmem:[#allocation3 + $0x728] sm:$0xf]  ;;  %v7055_v17 = vor.u32 %v9695_v32, %v7054_v25  ;;  %v5216_v47 = vpop.f32.mrf.mxu2 }
 0x1cf   :  { %5481 = vmatpush.bf16.msrb.mxu3 %v7359_v43  ;;  %v9759_v36 = vld [vmem:[#allocation3 + $0x734] sm:$0xf0]  ;;  %v6910_v38 = vld [vmem:[#allocation3 + $0x408] sm:$0xf]  ;;  %v7183_v39 = vor.u32 %v9727_v34, %v7182_v33 }
 0x1d0   :  { %5443 = vmatpush.bf16.msrb.mxu0 %v6959_v51  ;;  %v9659_v42 = vld [vmem:[#allocation3 + $0x414] sm:$0xf0]  ;;  %v7038_v40 = vld [vmem:[#allocation3 + $0x508] sm:$0xf]  ;;  %v7311_v43 = vor.u32 %v9759_v36, %v7310_v35 }
 0x1d1   :  { %5456 = vmatpush.bf16.msrb.mxu1 %v7087_v49  ;;  %v9691_v0 = vld [vmem:[#allocation3 + $0x514] sm:$0xf0]  ;;  %v7166_v41 = vld [vmem:[#allocation3 + $0x608] sm:$0xf]  ;;  %v5229_v49 = vpop.f32.mrf.mxu3 }
 0x1d2   :  { %5469 = vmatpush.bf16.msrb.mxu2 %v7215_v52  ;;  %v9723_v44 = vld [vmem:[#allocation3 + $0x614] sm:$0xf0]  ;;  %v7294_v45 = vld [vmem:[#allocation3 + $0x708] sm:$0xf]  ;;  %v6911_v52 = vor.u32 %v9659_v42, %v6910_v38 }
 0x1d3   :  { %5482 = vmatpush.bf16.msrb.mxu3 %v7343_v57  ;;  %v9755_v46 = vld [vmem:[#allocation3 + $0x714] sm:$0xf0]  ;;  %v7534_v48 = vld [vmem:[#allocation3 + $0x8e8] sm:$0xf]  ;;  %v7039_v57 = vor.u32 %v9691_v0, %v7038_v40  ;;  %v7167_v58 = vor.u32 %v9723_v44, %v7166_v41 }
 0x1d4   :  { %5444 = vmatpush.bf16.msrb.mxu0 %v6943_v11  ;;  %v9815_v50 = vld [vmem:[#allocation3 + $0x8f4] sm:$0xf0]  ;;  %v7662_v51 = vld [vmem:[#allocation3 + $0x9e8] sm:$0xf]  ;;  %v7295_v61 = vor.u32 %v9755_v46, %v7294_v45 }
 0x1d5   :  { %5457 = vmatpush.bf16.msrb.mxu1 %v7071_v28  ;;  %v9847_v53 = vld [vmem:[#allocation3 + $0x9f4] sm:$0xf0]  ;;  %v7790_v54 = vld [vmem:[#allocation3 + $0xae8] sm:$0xf]  ;;  %v7535_v62 = vor.u32 %v9815_v50, %v7534_v48 }
 0x1d6   :  { %5470 = vmatpush.bf16.msrb.mxu2 %v7199_v18  ;;  %v9879_v56 = vld [vmem:[#allocation3 + $0xaf4] sm:$0xf0]  ;;  %v7918_v59 = vld [vmem:[#allocation3 + $0xbe8] sm:$0xf]  ;;  %v7663_v63 = vor.u32 %v9847_v53, %v7662_v51 }
 0x1d7   :  { %5483 = vmatpush.bf16.msrb.mxu3 %v7327_v31  ;;  %v9911_v4 = vld [vmem:[#allocation3 + $0xbf4] sm:$0xf0]  ;;  %v7791_v5 = vor.u32 %v9879_v56, %v7790_v54  ;;  %v7518_v6 = vld [vmem:[#allocation3 + $0x8c8] sm:$0xf] }
 0x1d8   :  { %5445 = vmatpush.bf16.msrb.mxu0 %v6927_v37  ;;  %v9811_v7 = vld [vmem:[#allocation3 + $0x8d4] sm:$0xf0]  ;;  %v7646_v11 = vld [vmem:[#allocation3 + $0x9c8] sm:$0xf]  ;;  %v7919_v12 = vor.u32 %v9911_v4, %v7918_v59 }
 0x1d9   :  { %5458 = vmatpush.bf16.msrb.mxu1 %v7055_v17  ;;  %v9843_v28 = vld [vmem:[#allocation3 + $0x9d4] sm:$0xf0]  ;;  %v7774_v18 = vld [vmem:[#allocation3 + $0xac8] sm:$0xf]  ;;  %v7519_v31 = vor.u32 %v9811_v7, %v7518_v6 }
 0x1da   :  { %5471 = vmatpush.bf16.msrb.mxu2 %v7183_v39  ;;  %v9875_v19 = vld [vmem:[#allocation3 + $0xad4] sm:$0xf0]  ;;  %v7902_v20 = vld [vmem:[#allocation3 + $0xbc8] sm:$0xf]  ;;  %v7647_v32 = vor.u32 %v9843_v28, %v7646_v11 }
 0x1db   :  { %5484 = vmatpush.bf16.msrb.mxu3 %v7311_v43  ;;  %v9907_v25 = vld [vmem:[#allocation3 + $0xbd4] sm:$0xf0]  ;;  %v7775_v33 = vor.u32 %v9875_v19, %v7774_v18  ;;  %v7502_v34 = vld [vmem:[#allocation3 + $0x8a8] sm:$0xf] }
 0x1dc   :  { %5446 = vmatpush.bf16.msrb.mxu0 %v6911_v52  ;;  %v9807_v35 = vld [vmem:[#allocation3 + $0x8b4] sm:$0xf0]  ;;  %v7630_v36 = vld [vmem:[#allocation3 + $0x9a8] sm:$0xf]  ;;  %v7903_v37 = vor.u32 %v9907_v25, %v7902_v20  ;;  %v10616_v49 = vpop.f32.mrf.mxu0 }
 0x1dd   :  { %5459 = vmatpush.bf16.msrb.mxu1 %v7039_v57  ;;  %v9839_v38 = vld [vmem:[#allocation3 + $0x9b4] sm:$0xf0]  ;;  %v7758_v42 = vld [vmem:[#allocation3 + $0xaa8] sm:$0xf]  ;;  %v7503_v0 = vor.u32 %v9807_v35, %v7502_v34  ;;  %v10618_v56 = vpop.f32.mrf.mxu1 }
 0x1de   :  { %5472 = vmatpush.bf16.msrb.mxu2 %v7167_v58  ;;  %v9871_v17 = vld [vmem:[#allocation3 + $0xab4] sm:$0xf0]  ;;  %v7886_v39 = vld [vmem:[#allocation3 + $0xba8] sm:$0xf]  ;;  %v7631_v41 = vor.u32 %v9839_v38, %v7630_v36 }
 0x1df   :  { %5485 = vmatpush.bf16.msrb.mxu3 %v7295_v61  ;;  %5447 = vmatmul.bf16.vlgmr.msrb.gmra.mxu0 %v10521_v22  ;;  %v9903_v40 = vld [vmem:[#allocation3 + $0xbb4] sm:$0xf0]  ;;  %v7759_v43 = vor.u32 %v9871_v17, %v7758_v42  ;;  %v7486_v44 = vld [vmem:[#allocation3 + $0x888] sm:$0xf] }
 0x1e0   :  { %5491 = vmatpush.bf16.msra.mxu0 %v7535_v62  ;;  %5460 = vmatmul.bf16.vlgmr.msrb.gmra.mxu1 %v10525_v30  ;;  %v9803_v45 = vld [vmem:[#allocation3 + $0x894] sm:$0xf0]  ;;  %v7614_v46 = vld [vmem:[#allocation3 + $0x988] sm:$0xf]  ;;  %v7887_v47 = vor.u32 %v9903_v40, %v7886_v39 }
 0x1e1   :  { %5504 = vmatpush.bf16.msra.mxu1 %v7663_v63  ;;  %5473 = vmatmul.bf16.vlgmr.msrb.gmra.mxu2 %v10519_v21  ;;  %v9835_v48 = vld [vmem:[#allocation3 + $0x994] sm:$0xf0]  ;;  %v7742_v50 = vld [vmem:[#allocation3 + $0xa88] sm:$0xf]  ;;  %v7487_v54 = vor.u32 %v9803_v45, %v7486_v44 }
 0x1e2   :  { %5517 = vmatpush.bf16.msra.mxu2 %v7791_v5  ;;  %5486 = vmatmul.bf16.vlgmr.msrb.gmra.mxu3 %v10523_v29  ;;  %v9867_v51 = vld [vmem:[#allocation3 + $0xa94] sm:$0xf0]  ;;  %v7870_v52 = vld [vmem:[#allocation3 + $0xb88] sm:$0xf]  ;;  %v7615_v57 = vor.u32 %v9835_v48, %v7614_v46 }
 0x1e3   :  { %5530 = vmatpush.bf16.msra.mxu3 %v7919_v12  ;;  %v9899_v53 = vld [vmem:[#allocation3 + $0xb94] sm:$0xf0]  ;;  %v7743_v58 = vor.u32 %v9867_v51, %v7742_v50  ;;  %v7470_v59 = vld [vmem:[#allocation3 + $0x868] sm:$0xf] }
 0x1e4   :  { %5492 = vmatpush.bf16.msra.mxu0 %v7519_v31  ;;  %v9799_v4 = vld [vmem:[#allocation3 + $0x874] sm:$0xf0]  ;;  %v7598_v61 = vld [vmem:[#allocation3 + $0x968] sm:$0xf]  ;;  %v7871_v62 = vor.u32 %v9899_v53, %v7870_v52  ;;  %v5242_v42 = vpop.f32.mrf.mxu0 }
 0x1e5   :  { %5505 = vmatpush.bf16.msra.mxu1 %v7647_v32  ;;  %v9831_v63 = vld [vmem:[#allocation3 + $0x974] sm:$0xf0]  ;;  %v7726_v5 = vld [vmem:[#allocation3 + $0xa68] sm:$0xf]  ;;  %v7471_v12 = vor.u32 %v9799_v4, %v7470_v59  ;;  %v10620_v32 = vpop.f32.mrf.mxu2  ;;  %v10622_v36 = vpop.f32.mrf.mxu3 }
 0x1e6   :  { %5518 = vmatpush.bf16.msra.mxu2 %v7775_v33  ;;  %v9863_v6 = vld [vmem:[#allocation3 + $0xa74] sm:$0xf0]  ;;  %v7854_v7 = vld [vmem:[#allocation3 + $0xb68] sm:$0xf]  ;;  %v7599_v28 = vor.u32 %v9831_v63, %v7598_v61  ;;  %v5255_v39 = vpop.f32.mrf.mxu1 }
 0x1e7   :  { %5531 = vmatpush.bf16.msra.mxu3 %v7903_v37  ;;  %v9895_v11 = vld [vmem:[#allocation3 + $0xb74] sm:$0xf0]  ;;  %v7727_v18 = vor.u32 %v9863_v6, %v7726_v5  ;;  %v7454_v19 = vld [vmem:[#allocation3 + $0x848] sm:$0xf] }
 0x1e8   :  { %5493 = vmatpush.bf16.msra.mxu0 %v7503_v0  ;;  %v9795_v20 = vld [vmem:[#allocation3 + $0x854] sm:$0xf0]  ;;  %v7582_v25 = vld [vmem:[#allocation3 + $0x948] sm:$0xf]  ;;  %v7855_v31 = vor.u32 %v9895_v11, %v7854_v7 }
 0x1e9   :  { %5506 = vmatpush.bf16.msra.mxu1 %v7631_v41  ;;  %v9827_v33 = vld [vmem:[#allocation3 + $0x954] sm:$0xf0]  ;;  %v7710_v34 = vld [vmem:[#allocation3 + $0xa48] sm:$0xf]  ;;  %v7455_v17 = vor.u32 %v9795_v20, %v7454_v19 }
 0x1ea   :  { %5519 = vmatpush.bf16.msra.mxu2 %v7759_v43  ;;  %v9859_v35 = vld [vmem:[#allocation3 + $0xa54] sm:$0xf0]  ;;  %v7838_v37 = vld [vmem:[#allocation3 + $0xb48] sm:$0xf]  ;;  %v7583_v40 = vor.u32 %v9827_v33, %v7582_v25 }
 0x1eb   :  { %5532 = vmatpush.bf16.msra.mxu3 %v7887_v47  ;;  %v9891_v38 = vld [vmem:[#allocation3 + $0xb54] sm:$0xf0]  ;;  %v7711_v0 = vor.u32 %v9859_v35, %v7710_v34  ;;  %v7438_v41 = vld [vmem:[#allocation3 + $0x828] sm:$0xf] }
 0x1ec   :  { %5494 = vmatpush.bf16.msra.mxu0 %v7487_v54  ;;  %v9791_v43 = vld [vmem:[#allocation3 + $0x834] sm:$0xf0]  ;;  %v7566_v44 = vld [vmem:[#allocation3 + $0x928] sm:$0xf]  ;;  %v7839_v45 = vor.u32 %v9891_v38, %v7838_v37 }
 0x1ed   :  { %5507 = vmatpush.bf16.msra.mxu1 %v7615_v57  ;;  %v9823_v46 = vld [vmem:[#allocation3 + $0x934] sm:$0xf0]  ;;  %v7694_v47 = vld [vmem:[#allocation3 + $0xa28] sm:$0xf]  ;;  %v7439_v52 = vor.u32 %v9791_v43, %v7438_v41  ;;  %v5268_v7 = vpop.f32.mrf.mxu2 }
 0x1ee   :  { %5520 = vmatpush.bf16.msra.mxu2 %v7743_v58  ;;  %v9855_v48 = vld [vmem:[#allocation3 + $0xa34] sm:$0xf0]  ;;  %v7822_v50 = vld [vmem:[#allocation3 + $0xb28] sm:$0xf]  ;;  %v7567_v57 = vor.u32 %v9823_v46, %v7566_v44 }
 0x1ef   :  { %5533 = vmatpush.bf16.msra.mxu3 %v7871_v62  ;;  %v9887_v51 = vld [vmem:[#allocation3 + $0xb34] sm:$0xf0]  ;;  %v7422_v53 = vld [vmem:[#allocation3 + $0x808] sm:$0xf]  ;;  %v7695_v58 = vor.u32 %v9855_v48, %v7694_v47 }
 0x1f0   :  { %5495 = vmatpush.bf16.msra.mxu0 %v7471_v12  ;;  %v9787_v54 = vld [vmem:[#allocation3 + $0x814] sm:$0xf0]  ;;  %v7550_v59 = vld [vmem:[#allocation3 + $0x908] sm:$0xf]  ;;  %v7823_v62 = vor.u32 %v9887_v51, %v7822_v50 }
 0x1f1   :  { %5508 = vmatpush.bf16.msra.mxu1 %v7599_v28  ;;  %v9819_v4 = vld [vmem:[#allocation3 + $0x914] sm:$0xf0]  ;;  %v7678_v61 = vld [vmem:[#allocation3 + $0xa08] sm:$0xf]  ;;  %v7423_v19 = vor.u32 %v9787_v54, %v7422_v53 }
 0x1f2   :  { %5521 = vmatpush.bf16.msra.mxu2 %v7727_v18  ;;  %v9851_v63 = vld [vmem:[#allocation3 + $0xa14] sm:$0xf0]  ;;  %v7806_v5 = vld [vmem:[#allocation3 + $0xb08] sm:$0xf]  ;;  %v5281_v18 = vpop.f32.mrf.mxu3  ;;  %v7551_v33 = vor.u32 %v9819_v4, %v7550_v59 }
 0x1f3   :  { %5534 = vmatpush.bf16.msra.mxu3 %v7855_v31  ;;  %v9883_v6 = vld [vmem:[#allocation3 + $0xb14] sm:$0xf0]  ;;  %v8046_v11 = vld [vmem:[#allocation3 + $0xce8] sm:$0xf]  ;;  %v7679_v34 = vor.u32 %v9851_v63, %v7678_v61 }
 0x1f4   :  { %5496 = vmatpush.bf16.msra.mxu0 %v7455_v17  ;;  %v9943_v12 = vld [vmem:[#allocation3 + $0xcf4] sm:$0xf0]  ;;  %v8174_v28 = vld [vmem:[#allocation3 + $0xde8] sm:$0xf]  ;;  %v7807_v38 = vor.u32 %v9883_v6, %v7806_v5 }
 0x1f5   :  { %5509 = vmatpush.bf16.msra.mxu1 %v7583_v40  ;;  %v9975_v20 = vld [vmem:[#allocation3 + $0xdf4] sm:$0xf0]  ;;  %v8302_v25 = vld [vmem:[#allocation3 + $0xee8] sm:$0xf]  ;;  %v8047_v42 = vor.u32 %v9943_v12, %v8046_v11 }
 0x1f6   :  { %5522 = vmatpush.bf16.msra.mxu2 %v7711_v0  ;;  %v10007_v31 = vld [vmem:[#allocation3 + $0xef4] sm:$0xf0]  ;;  %v8430_v35 = vld [vmem:[#allocation3 + $0xfe8] sm:$0xf]  ;;  %v8175_v17 = vor.u32 %v9975_v20, %v8174_v28 }
 0x1f7   :  { %5535 = vmatpush.bf16.msra.mxu3 %v7839_v45  ;;  %v10039_v37 = vld [vmem:[#allocation3 + $0xff4] sm:$0xf0]  ;;  %v8303_v39 = vor.u32 %v10007_v31, %v8302_v25  ;;  %v8030_v40 = vld [vmem:[#allocation3 + $0xcc8] sm:$0xf] }
 0x1f8   :  { %5497 = vmatpush.bf16.msra.mxu0 %v7439_v52  ;;  %v9939_v0 = vld [vmem:[#allocation3 + $0xcd4] sm:$0xf0]  ;;  %v8158_v41 = vld [vmem:[#allocation3 + $0xdc8] sm:$0xf]  ;;  %v8431_v43 = vor.u32 %v10039_v37, %v8430_v35 }
 0x1f9   :  { %5510 = vmatpush.bf16.msra.mxu1 %v7567_v57  ;;  %v9971_v44 = vld [vmem:[#allocation3 + $0xdd4] sm:$0xf0]  ;;  %v8286_v45 = vld [vmem:[#allocation3 + $0xec8] sm:$0xf]  ;;  %v8031_v50 = vor.u32 %v9939_v0, %v8030_v40 }
 0x1fa   :  { %5523 = vmatpush.bf16.msra.mxu2 %v7695_v58  ;;  %v10003_v46 = vld [vmem:[#allocation3 + $0xed4] sm:$0xf0]  ;;  %v8414_v47 = vld [vmem:[#allocation3 + $0xfc8] sm:$0xf]  ;;  %v8159_v51 = vor.u32 %v9971_v44, %v8158_v41 }
 0x1fb   :  { %5536 = vmatpush.bf16.msra.mxu3 %v7823_v62  ;;  %v10035_v48 = vld [vmem:[#allocation3 + $0xfd4] sm:$0xf0]  ;;  %v8287_v52 = vor.u32 %v10003_v46, %v8286_v45  ;;  %v8014_v53 = vld [vmem:[#allocation3 + $0xca8] sm:$0xf] }
 0x1fc   :  { %5498 = vmatpush.bf16.msra.mxu0 %v7423_v19  ;;  %v9935_v54 = vld [vmem:[#allocation3 + $0xcb4] sm:$0xf0]  ;;  %v8142_v57 = vld [vmem:[#allocation3 + $0xda8] sm:$0xf]  ;;  %v8415_v58 = vor.u32 %v10035_v48, %v8414_v47 }
 0x1fd   :  { %5511 = vmatpush.bf16.msra.mxu1 %v7551_v33  ;;  %v9967_v59 = vld [vmem:[#allocation3 + $0xdb4] sm:$0xf0]  ;;  %v8270_v4 = vld [vmem:[#allocation3 + $0xea8] sm:$0xf]  ;;  %v8015_v5 = vor.u32 %v9935_v54, %v8014_v53 }
 0x1fe   :  { %5524 = vmatpush.bf16.msra.mxu2 %v7679_v34  ;;  %v9999_v61 = vld [vmem:[#allocation3 + $0xeb4] sm:$0xf0]  ;;  %v8398_v62 = vld [vmem:[#allocation3 + $0xfa8] sm:$0xf]  ;;  %v8143_v6 = vor.u32 %v9967_v59, %v8142_v57  ;;  %v10628_v31 = vpop.f32.mrf.mxu0 }
 0x1ff   :  { %5537 = vmatpush.bf16.msra.mxu3 %v7807_v38  ;;  %5499 = vmatmul.bf16.vlgmr.msra.gmra.mxu0 %v10531_v3  ;;  %v10031_v63 = vld [vmem:[#allocation3 + $0xfb4] sm:$0xf0]  ;;  %v8271_v7 = vor.u32 %v9999_v61, %v8270_v4  ;;  %v7998_v11 = vld [vmem:[#allocation3 + $0xc88] sm:$0xf]  ;;  %v5241_v61 = vadd.f32 %v10616_v49, %v10610_v16 }
 0x200   :  { %5543 = vmatpush.bf16.msrb.mxu0 %v8047_v42  ;;  %5512 = vmatmul.bf16.vlgmr.msra.gmra.mxu1 %v10535_v14  ;;  %v9931_v12 = vld [vmem:[#allocation3 + $0xc94] sm:$0xf0]  ;;  %v8126_v28 = vld [vmem:[#allocation3 + $0xd88] sm:$0xf]  ;;  %v8399_v18 = vor.u32 %v10031_v63, %v8398_v62 }
 0x201   :  { %5556 = vmatpush.bf16.msrb.mxu1 %v8175_v17  ;;  %5525 = vmatmul.bf16.vlgmr.msra.gmra.mxu2 %v10533_v8  ;;  %v9963_v19 = vld [vmem:[#allocation3 + $0xd94] sm:$0xf0]  ;;  %v8254_v20 = vld [vmem:[#allocation3 + $0xe88] sm:$0xf]  ;;  %v7999_v35 = vor.u32 %v9931_v12, %v7998_v11  ;;  %v10630_v37 = vpop.f32.mrf.mxu1  ;;  %v5254_v49 = vadd.f32 %v10618_v56, %v5241_v61 }
 0x202   :  { %5569 = vmatpush.bf16.msrb.mxu2 %v8303_v39  ;;  %5538 = vmatmul.bf16.vlgmr.msra.gmra.mxu3 %v10537_v15  ;;  %v9995_v25 = vld [vmem:[#allocation3 + $0xe94] sm:$0xf0]  ;;  %v8382_v33 = vld [vmem:[#allocation3 + $0xf88] sm:$0xf]  ;;  %v8127_v38 = vor.u32 %v9963_v19, %v8126_v28 }
 0x203   :  { %5582 = vmatpush.bf16.msrb.mxu3 %v8431_v43  ;;  %v10027_v34 = vld [vmem:[#allocation3 + $0xf94] sm:$0xf0]  ;;  %v8255_v42 = vor.u32 %v9995_v25, %v8254_v20  ;;  %v7982_v17 = vld [vmem:[#allocation3 + $0xc68] sm:$0xf] }
 0x204   :  { %5544 = vmatpush.bf16.msrb.mxu0 %v8031_v50  ;;  %v9927_v39 = vld [vmem:[#allocation3 + $0xc74] sm:$0xf0]  ;;  %v8110_v40 = vld [vmem:[#allocation3 + $0xd68] sm:$0xf]  ;;  %v8383_v0 = vor.u32 %v10027_v34, %v8382_v33 }
 0x205   :  { %5557 = vmatpush.bf16.msrb.mxu1 %v8159_v51  ;;  %v9959_v41 = vld [vmem:[#allocation3 + $0xd74] sm:$0xf0]  ;;  %v8238_v43 = vld [vmem:[#allocation3 + $0xe68] sm:$0xf]  ;;  %v7983_v47 = vor.u32 %v9927_v39, %v7982_v17 }
 0x206   :  { %5570 = vmatpush.bf16.msrb.mxu2 %v8287_v52  ;;  %v9991_v44 = vld [vmem:[#allocation3 + $0xe74] sm:$0xf0]  ;;  %v8366_v45 = vld [vmem:[#allocation3 + $0xf68] sm:$0xf]  ;;  %v8111_v48 = vor.u32 %v9959_v41, %v8110_v40  ;;  %v10632_v57 = vpop.f32.mrf.mxu2  ;;  %v5267_v40 = vadd.f32 %v10620_v32, %v5254_v49 }
 0x207   :  { %5583 = vmatpush.bf16.msrb.mxu3 %v8415_v58  ;;  %v10023_v46 = vld [vmem:[#allocation3 + $0xf74] sm:$0xf0]  ;;  %v8239_v50 = vor.u32 %v9991_v44, %v8238_v43  ;;  %v7966_v51 = vld [vmem:[#allocation3 + $0xc48] sm:$0xf] }
 0x208   :  { %5545 = vmatpush.bf16.msrb.mxu0 %v8015_v5  ;;  %v9923_v52 = vld [vmem:[#allocation3 + $0xc54] sm:$0xf0]  ;;  %v8094_v53 = vld [vmem:[#allocation3 + $0xd48] sm:$0xf]  ;;  %v8367_v54 = vor.u32 %v10023_v46, %v8366_v45  ;;  %v10636_v62 = vpop.f32.mrf.mxu3  ;;  %v5280_v61 = vadd.f32 %v10622_v36, %v5267_v40 }
 0x209   :  { %5558 = vmatpush.bf16.msrb.mxu1 %v8143_v6  ;;  %v9955_v58 = vld [vmem:[#allocation3 + $0xd54] sm:$0xf0]  ;;  %v8222_v59 = vld [vmem:[#allocation3 + $0xe48] sm:$0xf]  ;;  %v5294_v6 = vpop.f32.mrf.mxu0  ;;  %v5307_v11 = vpop.f32.mrf.mxu1 }
 0x20a   :  { %5571 = vmatpush.bf16.msrb.mxu2 %v8271_v7  ;;  %v9987_v4 = vld [vmem:[#allocation3 + $0xe54] sm:$0xf0]  ;;  %v8350_v63 = vld [vmem:[#allocation3 + $0xf48] sm:$0xf]  ;;  %v7967_v7 = vor.u32 %v9923_v52, %v7966_v51  ;;  %v8095_v12 = vor.u32 %v9955_v58, %v8094_v53 }
 0x20b   :  { %5584 = vmatpush.bf16.msrb.mxu3 %v8399_v18  ;;  %v10019_v5 = vld [vmem:[#allocation3 + $0xf54] sm:$0xf0]  ;;  %v8223_v28 = vor.u32 %v9987_v4, %v8222_v59  ;;  %v7950_v18 = vld [vmem:[#allocation3 + $0xc28] sm:$0xf] }
 0x20c   :  { %5546 = vmatpush.bf16.msrb.mxu0 %v7999_v35  ;;  %v9919_v19 = vld [vmem:[#allocation3 + $0xc34] sm:$0xf0]  ;;  %v8078_v20 = vld [vmem:[#allocation3 + $0xd28] sm:$0xf]  ;;  %v8351_v25 = vor.u32 %v10019_v5, %v8350_v63 }
 0x20d   :  { %5559 = vmatpush.bf16.msrb.mxu1 %v8127_v38  ;;  %v9951_v33 = vld [vmem:[#allocation3 + $0xd34] sm:$0xf0]  ;;  %v8206_v34 = vld [vmem:[#allocation3 + $0xe28] sm:$0xf] }
 0x20e   :  { %5572 = vmatpush.bf16.msrb.mxu2 %v8255_v42  ;;  %v9983_v16 = vld [vmem:[#allocation3 + $0xe34] sm:$0xf0]  ;;  %v8334_v35 = vld [vmem:[#allocation3 + $0xf28] sm:$0xf]  ;;  %v7951_v42 = vor.u32 %v9919_v19, %v7950_v18 }
 0x20f   :  { %5585 = vmatpush.bf16.msrb.mxu3 %v8383_v0  ;;  %v10015_v38 = vld [vmem:[#allocation3 + $0xf34] sm:$0xf0]  ;;  %v7934_v17 = vld [vmem:[#allocation3 + $0xc08] sm:$0xf]  ;;  %v8079_v0 = vor.u32 %v9951_v33, %v8078_v20  ;;  %v8207_v41 = vor.u32 %v9983_v16, %v8206_v34 }
 0x210   :  { %5547 = vmatpush.bf16.msrb.mxu0 %v7983_v47  ;;  %v9915_v39 = vld [vmem:[#allocation3 + $0xc14] sm:$0xf0]  ;;  %v8062_v43 = vld [vmem:[#allocation3 + $0xd08] sm:$0xf]  ;;  %v8335_v46 = vor.u32 %v10015_v38, %v8334_v35 }
 0x211   :  { %5560 = vmatpush.bf16.msrb.mxu1 %v8111_v48  ;;  %v9947_v44 = vld [vmem:[#allocation3 + $0xd14] sm:$0xf0]  ;;  %v8190_v45 = vld [vmem:[#allocation3 + $0xe08] sm:$0xf]  ;;  %v7935_v58 = vor.u32 %v9915_v39, %v7934_v17 }
 0x212   :  { %5573 = vmatpush.bf16.msrb.mxu2 %v8239_v50  ;;  %v9979_v47 = vld [vmem:[#allocation3 + $0xe14] sm:$0xf0]  ;;  %v8318_v48 = vld [vmem:[#allocation3 + $0xf08] sm:$0xf]  ;;  %v5320_v50 = vpop.f32.mrf.mxu2  ;;  %v8063_v63 = vor.u32 %v9947_v44, %v8062_v43 }
 0x213   :  { %5586 = vmatpush.bf16.msrb.mxu3 %v8367_v54  ;;  %v10011_v56 = vld [vmem:[#allocation3 + $0xf14] sm:$0xf0]  ;;  %v8558_v51 = vld [vmem:[#allocation3 + $0x10e8] sm:$0xf]  ;;  %v5333_v54 = vpop.f32.mrf.mxu3  ;;  %v8191_v5 = vor.u32 %v9979_v47, %v8190_v45 }
 0x214   :  { %5548 = vmatpush.bf16.msrb.mxu0 %v7967_v7  ;;  %v10071_v52 = vld [vmem:[#allocation3 + $0x10f4] sm:$0xf0]  ;;  %v8686_v53 = vld [vmem:[#allocation3 + $0x11e8] sm:$0xf]  ;;  %v8319_v11 = vor.u32 %v10011_v56, %v8318_v48 }
 0x215   :  { %5561 = vmatpush.bf16.msrb.mxu1 %v8095_v12  ;;  %v10103_v32 = vld [vmem:[#allocation3 + $0x11f4] sm:$0xf0]  ;;  %v8814_v59 = vld [vmem:[#allocation3 + $0x12e8] sm:$0xf]  ;;  %v8559_v12 = vor.u32 %v10071_v52, %v8558_v51 }
 0x216   :  { %5574 = vmatpush.bf16.msrb.mxu2 %v8223_v28  ;;  %v10135_v4 = vld [vmem:[#allocation3 + $0x12f4] sm:$0xf0]  ;;  %v8942_v6 = vld [vmem:[#allocation3 + $0x13e8] sm:$0xf]  ;;  %v5293_v28 = vadd.f32 %v10628_v31, %v5280_v61  ;;  %v8687_v18 = vor.u32 %v10103_v32, %v8686_v53 }
 0x217   :  { %5587 = vmatpush.bf16.msrb.mxu3 %v8351_v25  ;;  %v10167_v7 = vld [vmem:[#allocation3 + $0x13f4] sm:$0xf0]  ;;  %v8815_v19 = vor.u32 %v10135_v4, %v8814_v59  ;;  %v8542_v20 = vld [vmem:[#allocation3 + $0x10c8] sm:$0xf] }
 0x218   :  { %5549 = vmatpush.bf16.msrb.mxu0 %v7951_v42  ;;  %v10067_v25 = vld [vmem:[#allocation3 + $0x10d4] sm:$0xf0]  ;;  %v8670_v33 = vld [vmem:[#allocation3 + $0x11c8] sm:$0xf]  ;;  %v8943_v34 = vor.u32 %v10167_v7, %v8942_v6  ;;  %v5306_v17 = vadd.f32 %v10630_v37, %v5293_v28 }
 0x219   :  { %5562 = vmatpush.bf16.msrb.mxu1 %v8079_v0  ;;  %v10099_v16 = vld [vmem:[#allocation3 + $0x11d4] sm:$0xf0]  ;;  %v8798_v36 = vld [vmem:[#allocation3 + $0x12c8] sm:$0xf]  ;;  %v8543_v42 = vor.u32 %v10067_v25, %v8542_v20 }
 0x21a   :  { %5575 = vmatpush.bf16.msrb.mxu2 %v8207_v41  ;;  %v10131_v49 = vld [vmem:[#allocation3 + $0x12d4] sm:$0xf0]  ;;  %v8926_v35 = vld [vmem:[#allocation3 + $0x13c8] sm:$0xf]  ;;  %v8671_v31 = vor.u32 %v10099_v16, %v8670_v33  ;;  %v5319_v47 = vadd.f32 %v10632_v57, %v5306_v17 }
 0x21b   :  { %5588 = vmatpush.bf16.msrb.mxu3 %v8335_v46  ;;  %v10163_v38 = vld [vmem:[#allocation3 + $0x13d4] sm:$0xf0]  ;;  %v8799_v39 = vor.u32 %v10131_v49, %v8798_v36  ;;  %v8526_v40 = vld [vmem:[#allocation3 + $0x10a8] sm:$0xf] }
 0x21c   :  { %5550 = vmatpush.bf16.msrb.mxu0 %v7935_v58  ;;  %v10063_v0 = vld [vmem:[#allocation3 + $0x10b4] sm:$0xf0]  ;;  %v8654_v41 = vld [vmem:[#allocation3 + $0x11a8] sm:$0xf]  ;;  %v8927_v43 = vor.u32 %v10163_v38, %v8926_v35  ;;  %v5332_v4 = vadd.f32 %v10636_v62, %v5319_v47  ;;  %v5344_v61 = vpop.f32.mrf.mxu0 }
 0x21d   :  { %5563 = vmatpush.bf16.msrb.mxu1 %v8063_v63  ;;  %v10095_v44 = vld [vmem:[#allocation3 + $0x11b4] sm:$0xf0]  ;;  %v8782_v45 = vld [vmem:[#allocation3 + $0x12a8] sm:$0xf]  ;;  %v8527_v56 = vor.u32 %v10063_v0, %v8526_v40  ;;  %v5357_v7 = vpop.f32.mrf.mxu1 }
 0x21e   :  { %5576 = vmatpush.bf16.msrb.mxu2 %v8191_v5  ;;  %v10127_v46 = vld [vmem:[#allocation3 + $0x12b4] sm:$0xf0]  ;;  %v8910_v37 = vld [vmem:[#allocation3 + $0x13a8] sm:$0xf]  ;;  %v8655_v50 = vor.u32 %v10095_v44, %v8654_v41 }
 0x21f   :  { %5589 = vmatpush.bf16.msrb.mxu3 %v8319_v11  ;;  %5551 = vmatmul.bf16.vlgmr.msrb.gmra.mxu0 %v10546_v60  ;;  %v10159_v48 = vld [vmem:[#allocation3 + $0x13b4] sm:$0xf0]  ;;  %v8783_v51 = vor.u32 %v10127_v46, %v8782_v45  ;;  %v8510_v52 = vld [vmem:[#allocation3 + $0x1088] sm:$0xf]  ;;  %v6031_v11 = vld [vmem:[#allocation5] sm:$0xf] }
 0x220   :  { %5595 = vmatpush.bf16.msra.mxu0 %v8559_v12  ;;  %5564 = vmatmul.bf16.vlgmr.msrb.gmra.mxu1 %v10550_v9  ;;  %v10059_v53 = vld [vmem:[#allocation3 + $0x1094] sm:$0xf0]  ;;  %v8638_v54 = vld [vmem:[#allocation3 + $0x1188] sm:$0xf]  ;;  %v8911_v58 = vor.u32 %v10159_v48, %v8910_v37  ;;  %v5345_v12 = vadd.f32 %v5344_v61, %v5332_v4  ;;  %v6034_v35 = vperm.slane %v6031_v11, 1  ;;  %v6033_v48 = vperm.slane %v6031_v11, 0 }
 0x221   :  { %5608 = vmatpush.bf16.msra.mxu1 %v8687_v18  ;;  %5577 = vmatmul.bf16.vlgmr.msrb.gmra.mxu2 %v10548_v1  ;;  %v10091_v57 = vld [vmem:[#allocation3 + $0x1194] sm:$0xf0]  ;;  %v8766_v32 = vld [vmem:[#allocation3 + $0x1288] sm:$0xf]  ;;  %v8511_v6 = vor.u32 %v10059_v53, %v8510_v52 }
 0x222   :  { %5621 = vmatpush.bf16.msra.mxu2 %v8815_v19  ;;  %5590 = vmatmul.bf16.vlgmr.msrb.gmra.mxu3 %v10552_v10  ;;  %v10123_v59 = vld [vmem:[#allocation3 + $0x1294] sm:$0xf0]  ;;  %v8894_v63 = vld [vmem:[#allocation3 + $0x1388] sm:$0xf]  ;;  %v8639_v28 = vor.u32 %v10091_v57, %v8638_v54 }
 0x223   :  { %5634 = vmatpush.bf16.msra.mxu3 %v8943_v34  ;;  %v10155_v5 = vld [vmem:[#allocation3 + $0x1394] sm:$0xf0]  ;;  %v8767_v18 = vor.u32 %v10123_v59, %v8766_v32  ;;  %v8494_v19 = vld [vmem:[#allocation3 + $0x1068] sm:$0xf] }
 0x224   :  { %5596 = vmatpush.bf16.msra.mxu0 %v8543_v42  ;;  %v10055_v20 = vld [vmem:[#allocation3 + $0x1074] sm:$0xf0]  ;;  %v8622_v25 = vld [vmem:[#allocation3 + $0x1168] sm:$0xf]  ;;  %v8895_v33 = vor.u32 %v10155_v5, %v8894_v63  ;;  %v5358_v42 = vadd.f32 %v5357_v7, %v5345_v12  ;;  %v5346_v52 = vpop.f32.mrf.mxu0 }
 0x225   :  { %5609 = vmatpush.bf16.msra.mxu1 %v8671_v31  ;;  %v10087_v34 = vld [vmem:[#allocation3 + $0x1174] sm:$0xf0]  ;;  %v8750_v16 = vld [vmem:[#allocation3 + $0x1268] sm:$0xf]  ;;  %v8495_v38 = vor.u32 %v10055_v20, %v8494_v19  ;;  %v5383_v37 = vpop.f32.mrf.mxu3  ;;  %v5359_v54 = vpop.f32.mrf.mxu1 }
 0x226   :  { %5622 = vmatpush.bf16.msra.mxu2 %v8799_v39  ;;  %v10119_v62 = vld [vmem:[#allocation3 + $0x1274] sm:$0xf0]  ;;  %v8878_v36 = vld [vmem:[#allocation3 + $0x1368] sm:$0xf]  ;;  %v8623_v17 = vor.u32 %v10087_v34, %v8622_v25 }
 0x227   :  { %5635 = vmatpush.bf16.msra.mxu3 %v8927_v43  ;;  %v10151_v49 = vld [vmem:[#allocation3 + $0x1374] sm:$0xf0]  ;;  %v8751_v31 = vor.u32 %v10119_v62, %v8750_v16  ;;  %v8478_v39 = vld [vmem:[#allocation3 + $0x1048] sm:$0xf]  ;;  %v5370_v43 = vpop.f32.mrf.mxu2 }
 0x228   :  { %5597 = vmatpush.bf16.msra.mxu0 %v8527_v56  ;;  %v10051_v40 = vld [vmem:[#allocation3 + $0x1054] sm:$0xf0]  ;;  %v8606_v0 = vld [vmem:[#allocation3 + $0x1148] sm:$0xf]  ;;  %v8879_v41 = vor.u32 %v10151_v49, %v8878_v36  ;;  %v5371_v47 = vadd.f32 %v5370_v43, %v5358_v42  ;;  %v6037_v56 = vrot.slane %v6034_v35, 4 }
 0x229   :  { %5610 = vmatpush.bf16.msra.mxu1 %v8655_v50  ;;  %v10083_v44 = vld [vmem:[#allocation3 + $0x1154] sm:$0xf0]  ;;  %v8734_v45 = vld [vmem:[#allocation3 + $0x1248] sm:$0xf]  ;;  %v8479_v53 = vor.u32 %v10051_v40, %v8478_v39 }
 0x22a   :  { %5623 = vmatpush.bf16.msra.mxu2 %v8783_v51  ;;  %v10115_v46 = vld [vmem:[#allocation3 + $0x1254] sm:$0xf0]  ;;  %v8862_v50 = vld [vmem:[#allocation3 + $0x1348] sm:$0xf]  ;;  %v8607_v57 = vor.u32 %v10083_v44, %v8606_v0  ;;  %v6039_v12 = vsel %vm6017_vm0, %v6033_v48, %v6037_v56 }
 0x22b   :  { %5636 = vmatpush.bf16.msra.mxu3 %v8911_v58  ;;  %v10147_v51 = vld [vmem:[#allocation3 + $0x1354] sm:$0xf0]  ;;  %v5384_v58 = vadd.f32 %v5383_v37, %v5371_v47  ;;  %v8735_v32 = vor.u32 %v10115_v46, %v8734_v45  ;;  %v8462_v59 = vld [vmem:[#allocation3 + $0x1028] sm:$0xf] }
 0x22c   :  { %5598 = vmatpush.bf16.msra.mxu0 %v8511_v6  ;;  %v10047_v4 = vld [vmem:[#allocation3 + $0x1034] sm:$0xf0]  ;;  %v8590_v61 = vld [vmem:[#allocation3 + $0x1128] sm:$0xf]  ;;  %v8863_v63 = vor.u32 %v10147_v51, %v8862_v50 }
 0x22d   :  { %5611 = vmatpush.bf16.msra.mxu1 %v8639_v28  ;;  %v10079_v5 = vld [vmem:[#allocation3 + $0x1134] sm:$0xf0]  ;;  %v8718_v6 = vld [vmem:[#allocation3 + $0x1228] sm:$0xf]  ;;  %v6015_v11 = vrot.slane %v5384_v58, 4  ;;  %v8463_v19 = vor.u32 %v10047_v4, %v8462_v59  ;;  %v5385_v43 = vpop.f32.mrf.mxu3 }
 0x22e   :  { %5624 = vmatpush.bf16.msra.mxu2 %v8767_v18  ;;  %v10111_v7 = vld [vmem:[#allocation3 + $0x1234] sm:$0xf0]  ;;  %v8846_v28 = vld [vmem:[#allocation3 + $0x1328] sm:$0xf]  ;;  %v8591_v34 = vor.u32 %v10079_v5, %v8590_v61 }
 0x22f   :  { %5637 = vmatpush.bf16.msra.mxu3 %v8895_v33  ;;  %v10143_v18 = vld [vmem:[#allocation3 + $0x1334] sm:$0xf0]  ;;  %v8446_v20 = vld [vmem:[#allocation3 + $0x1008] sm:$0xf]  ;;  %v6018_v33 = vsel %vm6017_vm0, %v10592_v55, %v6015_v11  ;;  %v8719_v16 = vor.u32 %v10111_v7, %v8718_v6  ;;  %v5372_v39 = vpop.f32.mrf.mxu2 }
 0x230   :  { %5599 = vmatpush.bf16.msra.mxu0 %v8495_v38  ;;  %v10043_v25 = vld [vmem:[#allocation3 + $0x1014] sm:$0xf0]  ;;  %v8574_v62 = vld [vmem:[#allocation3 + $0x1108] sm:$0xf]  ;;  %v10652_v35 = vadd.f32 %v6039_v12, %v6018_v33  ;;  %v8847_v38 = vor.u32 %v10143_v18, %v8846_v28 }
 0x231   :  { %5612 = vmatpush.bf16.msra.mxu1 %v8623_v17  ;;  %v10075_v36 = vld [vmem:[#allocation3 + $0x1114] sm:$0xf0]  ;;  %v8702_v49 = vld [vmem:[#allocation3 + $0x1208] sm:$0xf]  ;;  %v8447_v44 = vor.u32 %v10043_v25, %v8446_v20 }
 0x232   :  { %5625 = vmatpush.bf16.msra.mxu2 %v8751_v31  ;;  %v10107_v42 = vld [vmem:[#allocation3 + $0x1214] sm:$0xf0]  ;;  %v8830_v17 = vld [vmem:[#allocation3 + $0x1308] sm:$0xf]  ;;  %v6198_v55 = vmul.f32 %v10652_v35, %v10652_v35  ;;  %v8575_v37 = vor.u32 %v10075_v36, %v8574_v62 }
 0x233   :  { %5638 = vmatpush.bf16.msra.mxu3 %v8879_v41  ;;  %v10139_v31 = vld [vmem:[#allocation3 + $0x1314] sm:$0xf0]  ;;  %v9070_v40 = vld [vmem:[#allocation3 + $0x14e8] sm:$0xf]  ;;  %v8703_v48 = vor.u32 %v10107_v42, %v8702_v49 }
 0x234   :  { %5600 = vmatpush.bf16.msra.mxu0 %v8479_v53  ;;  %v10199_v0 = vld [vmem:[#allocation3 + $0x14f4] sm:$0xf0]  ;;  %v9198_v41 = vld [vmem:[#allocation3 + $0x15e8] sm:$0xf]  ;;  %6202 = vst [vmem:[#allocation1] ss:$2 sm:$0xff] %v6198_v55  ;;  %v8831_v51 = vor.u32 %v10139_v31, %v8830_v17 }
 0x235   :  { %5613 = vmatpush.bf16.msra.mxu1 %v8607_v57  ;;  %v10231_v45 = vld [vmem:[#allocation3 + $0x15f4] sm:$0xf0]  ;;  %v9326_v46 = vld [vmem:[#allocation3 + $0x16e8] sm:$0xf]  ;;  %v9071_v52 = vor.u32 %v10199_v0, %v9070_v40 }
 0x236   :  { %5626 = vmatpush.bf16.msra.mxu2 %v8735_v32  ;;  %v10263_v47 = vld [vmem:[#allocation3 + $0x16f4] sm:$0xf0]  ;;  %v9454_v56 = vld [vmem:[#allocation3 + $0x17e8] sm:$0xf]  ;;  %v9199_v53 = vor.u32 %v10231_v45, %v9198_v41 }
 0x237   :  { %5639 = vmatpush.bf16.msra.mxu3 %v8863_v63  ;;  %v10295_v50 = vld [vmem:[#allocation3 + $0x17f4] sm:$0xf0]  ;;  %v9327_v54 = vor.u32 %v10263_v47, %v9326_v46  ;;  %v9054_v58 = vld [vmem:[#allocation3 + $0x14c8] sm:$0xf] }
 0x238   :  { %5601 = vmatpush.bf16.msra.mxu0 %v8463_v19  ;;  %v10195_v57 = vld [vmem:[#allocation3 + $0x14d4] sm:$0xf0]  ;;  %v9182_v32 = vld [vmem:[#allocation3 + $0x15c8] sm:$0xf]  ;;  %v9455_v59 = vor.u32 %v10295_v50, %v9454_v56 }
 0x239   :  { %5614 = vmatpush.bf16.msra.mxu1 %v8591_v34  ;;  %v10227_v4 = vld [vmem:[#allocation3 + $0x15d4] sm:$0xf0]  ;;  %v9310_v61 = vld [vmem:[#allocation3 + $0x16c8] sm:$0xf]  ;;  %v9055_v7 = vor.u32 %v10195_v57, %v9054_v58 }
 0x23a   :  { %5627 = vmatpush.bf16.msra.mxu2 %v8719_v16  ;;  %v10259_v63 = vld [vmem:[#allocation3 + $0x16d4] sm:$0xf0]  ;;  %v9438_v5 = vld [vmem:[#allocation3 + $0x17c8] sm:$0xf]  ;;  %v9183_v11 = vor.u32 %v10227_v4, %v9182_v32 }
 0x23b   :  { %5640 = vmatpush.bf16.msra.mxu3 %v8847_v38  ;;  %v10291_v6 = vld [vmem:[#allocation3 + $0x17d4] sm:$0xf0]  ;;  %v9311_v12 = vor.u32 %v10259_v63, %v9310_v61  ;;  %v9038_v28 = vld [vmem:[#allocation3 + $0x14a8] sm:$0xf] }
 0x23c   :  { %5602 = vmatpush.bf16.msra.mxu0 %v8447_v44  ;;  %v10191_v18 = vld [vmem:[#allocation3 + $0x14b4] sm:$0xf0]  ;;  %v9166_v19 = vld [vmem:[#allocation3 + $0x15a8] sm:$0xf]  ;;  %v9439_v20 = vor.u32 %v10291_v6, %v9438_v5  ;;  %v5396_v47 = vpop.f32.mrf.mxu0 }
 0x23d   :  { %5615 = vmatpush.bf16.msra.mxu1 %v8575_v37  ;;  %v10223_v25 = vld [vmem:[#allocation3 + $0x15b4] sm:$0xf0]  ;;  %v9294_v33 = vld [vmem:[#allocation3 + $0x16a8] sm:$0xf]  ;;  %v9039_v38 = vor.u32 %v10191_v18, %v9038_v28 }
 0x23e   :  { %5628 = vmatpush.bf16.msra.mxu2 %v8703_v48  ;;  %v10255_v34 = vld [vmem:[#allocation3 + $0x16b4] sm:$0xf0]  ;;  %v10331_v16 = vld.sshfl [vmem:[#allocation1 + $0x10] sm:$0xff pattern:$0x73625140]  ;;  %v9167_v42 = vor.u32 %v10223_v25, %v9166_v19 }
 0x23f   :  { %5641 = vmatpush.bf16.msra.mxu3 %v8831_v51  ;;  %5603 = vmatmul.bf16.vlgmr.msra.gmra.mxu0 %v10594_v2  ;;  %v9422_v62 = vld [vmem:[#allocation3 + $0x17a8] sm:$0xf]  ;;  %v10287_v36 = vld [vmem:[#allocation3 + $0x17b4] sm:$0xf0]  ;;  %v9295_v17 = vor.u32 %v10255_v34, %v9294_v33 }
 0x240   :  { %5647 = vmatpush.bf16.msrb.mxu0 %v9071_v52  ;;  %5616 = vmatmul.bf16.vlgmr.msra.gmra.mxu1 %v10597_v13  ;;  %v10332_v49 = vld.sshfl [vmem:[#allocation1 + $0x18] sm:$0xff pattern:$0x73625140]  ;;  %v9022_v31 = vld [vmem:[#allocation3 + $0x1488] sm:$0xf]  ;;  %v9423_v0 = vor.u32 %v10287_v36, %v9422_v62  ;;  %v5409_v52 = vpop.f32.mrf.mxu1 }
 0x241   :  { %5660 = vmatpush.bf16.msrb.mxu1 %v9199_v53  ;;  %5629 = vmatmul.bf16.vlgmr.msra.gmra.mxu2 %v10331_v16  ;;  %v10187_v39 = vld [vmem:[#allocation3 + $0x1494] sm:$0xf0]  ;;  %v9150_v40 = vld [vmem:[#allocation3 + $0x1588] sm:$0xf]  ;;  %v5410_v32 = vadd.f32 %v5409_v52, %v5396_v47 }
 0x242   :  { %5673 = vmatpush.bf16.msrb.mxu2 %v9327_v54  ;;  %5642 = vmatmul.bf16.vlgmr.msra.gmra.mxu3 %v10332_v49  ;;  %v10219_v41 = vld [vmem:[#allocation3 + $0x1594] sm:$0xf0]  ;;  %v9278_v43 = vld [vmem:[#allocation3 + $0x1688] sm:$0xf]  ;;  %v9023_v46 = vor.u32 %v10187_v39, %v9022_v31 }
 0x243   :  { %5686 = vmatpush.bf16.msrb.mxu3 %v9455_v59  ;;  %v10251_v55 = vld [vmem:[#allocation3 + $0x1694] sm:$0xf0]  ;;  %v9406_v44 = vld [vmem:[#allocation3 + $0x1788] sm:$0xf]  ;;  %v9151_v37 = vor.u32 %v10219_v41, %v9150_v40 }
 0x244   :  { %5648 = vmatpush.bf16.msrb.mxu0 %v9055_v7  ;;  %v10283_v45 = vld [vmem:[#allocation3 + $0x1794] sm:$0xf0]  ;;  %v9279_v48 = vor.u32 %v10251_v55, %v9278_v43  ;;  %v9006_v56 = vld [vmem:[#allocation3 + $0x1468] sm:$0xf]  ;;  %v5398_v49 = vpop.f32.mrf.mxu0 }
 0x245   :  { %5661 = vmatpush.bf16.msrb.mxu1 %v9183_v11  ;;  %v10183_v50 = vld [vmem:[#allocation3 + $0x1474] sm:$0xf0]  ;;  %v9134_v51 = vld [vmem:[#allocation3 + $0x1568] sm:$0xf]  ;;  %v9407_v53 = vor.u32 %v10283_v45, %v9406_v44  ;;  %v5435_v33 = vpop.f32.mrf.mxu3  ;;  %v9585_v49 = vld [vmem:[#allocation3 + $0x1cc] sm:$0xf] }
 0x246   :  { %5674 = vmatpush.bf16.msrb.mxu2 %v9311_v12  ;;  %v10215_v54 = vld [vmem:[#allocation3 + $0x1574] sm:$0xf0]  ;;  %v9262_v58 = vld [vmem:[#allocation3 + $0x1668] sm:$0xf]  ;;  %v9007_v61 = vor.u32 %v10183_v50, %v9006_v56  ;;  %v5422_v12 = vpop.f32.mrf.mxu2 }
 0x247   :  { %5687 = vmatpush.bf16.msrb.mxu3 %v9439_v20  ;;  %v10247_v57 = vld [vmem:[#allocation3 + $0x1674] sm:$0xf0]  ;;  %v9390_v59 = vld [vmem:[#allocation3 + $0x1768] sm:$0xf]  ;;  %v9135_v63 = vor.u32 %v10215_v54, %v9134_v51  ;;  %v5423_v25 = vadd.f32 %v5422_v12, %v5410_v32 }
 0x248   :  { %5649 = vmatpush.bf16.msrb.mxu0 %v9039_v38  ;;  %v10279_v4 = vld [vmem:[#allocation3 + $0x1774] sm:$0xf0]  ;;  %v9263_v5 = vor.u32 %v10247_v57, %v9262_v58  ;;  %v8990_v6 = vld [vmem:[#allocation3 + $0x1448] sm:$0xf]  ;;  %v5411_v40 = vpop.f32.mrf.mxu1 }
 0x249   :  { %5662 = vmatpush.bf16.msrb.mxu1 %v9167_v42  ;;  %v10179_v7 = vld [vmem:[#allocation3 + $0x1454] sm:$0xf0]  ;;  %v9118_v11 = vld [vmem:[#allocation3 + $0x1548] sm:$0xf]  ;;  %v9391_v28 = vor.u32 %v10279_v4, %v9390_v59  ;;  %v10658_v36 = vadd.f32 %v5435_v33, %v5423_v25  ;;  %v9557_v4 = vld [vmem:[#allocation3 + $0xec] sm:$0xf] }
 0x24a   :  { %5675 = vmatpush.bf16.msrb.mxu2 %v9295_v17  ;;  %v10211_v18 = vld [vmem:[#allocation3 + $0x1554] sm:$0xf0]  ;;  %v9246_v19 = vld [vmem:[#allocation3 + $0x1648] sm:$0xf]  ;;  %v8991_v62 = vor.u32 %v10179_v7, %v8990_v6  ;;  %v6640_v6 = vld [vmem:[#allocation3 + $0x1f8] sm:$0xf0] }
 0x24b   :  { %5688 = vmatpush.bf16.msrb.mxu3 %v9423_v0  ;;  %v10243_v20 = vld [vmem:[#allocation3 + $0x1654] sm:$0xf0]  ;;  %v9374_v34 = vld [vmem:[#allocation3 + $0x1748] sm:$0xf]  ;;  %v9119_v38 = vor.u32 %v10211_v18, %v9118_v11  ;;  %v9621_v7 = vld [vmem:[#allocation3 + $0x2ec] sm:$0xf] }
 0x24c   :  { %5650 = vmatpush.bf16.msrb.mxu0 %v9023_v46  ;;  %v10275_v16 = vld [vmem:[#allocation3 + $0x1754] sm:$0xf0]  ;;  %v9247_v42 = vor.u32 %v10243_v20, %v9246_v19  ;;  %v8974_v17 = vld [vmem:[#allocation3 + $0x1428] sm:$0xf]  ;;  %v6768_v11 = vld [vmem:[#allocation3 + $0x2f8] sm:$0xf0] }
 0x24d   :  { %5663 = vmatpush.bf16.msrb.mxu1 %v9151_v37  ;;  %v10175_v31 = vld [vmem:[#allocation3 + $0x1434] sm:$0xf0]  ;;  %v9102_v39 = vld [vmem:[#allocation3 + $0x1528] sm:$0xf]  ;;  %v9375_v0 = vor.u32 %v10275_v16, %v9374_v34  ;;  %v5437_v59 = vpop.f32.mrf.mxu3  ;;  %v9653_v18 = vld [vmem:[#allocation3 + $0x3ec] sm:$0xf]  ;;  %v6771_v34 = vor.u32 %v9621_v7, %v6768_v11 }
 0x24e   :  { %5676 = vmatpush.bf16.msrb.mxu2 %v9279_v48  ;;  %v10207_v41 = vld [vmem:[#allocation3 + $0x1534] sm:$0xf0]  ;;  %v9230_v43 = vld [vmem:[#allocation3 + $0x1628] sm:$0xf]  ;;  %v8975_v46 = vor.u32 %v10175_v31, %v8974_v17  ;;  %v6896_v19 = vld [vmem:[#allocation3 + $0x3f8] sm:$0xf0] }
 0x24f   :  { %5689 = vmatpush.bf16.msrb.mxu3 %v9407_v53  ;;  %v10239_v55 = vld [vmem:[#allocation3 + $0x1634] sm:$0xf0]  ;;  %v9358_v44 = vld [vmem:[#allocation3 + $0x1728] sm:$0xf]  ;;  %v9103_v48 = vor.u32 %v10207_v41, %v9102_v39  ;;  %v5424_v53 = vpop.f32.mrf.mxu2  ;;  %v9553_v16 = vld [vmem:[#allocation3 + $0xcc] sm:$0xf] }
 0x250   :  { %5651 = vmatpush.bf16.msrb.mxu0 %v9007_v61  ;;  %v10271_v45 = vld [vmem:[#allocation3 + $0x1734] sm:$0xf0]  ;;  %v8958_v47 = vld [vmem:[#allocation3 + $0x1408] sm:$0xf]  ;;  %v9231_v56 = vor.u32 %v10239_v55, %v9230_v43  ;;  %v6512_v61 = vld [vmem:[#allocation3 + $0xf8] sm:$0xf0] }
 0x251   :  { %5664 = vmatpush.bf16.msrb.mxu1 %v9135_v63  ;;  %v10171_v37 = vld [vmem:[#allocation3 + $0x1414] sm:$0xf0]  ;;  %v9086_v50 = vld [vmem:[#allocation3 + $0x1508] sm:$0xf]  ;;  %v9359_v54 = vor.u32 %v10271_v45, %v9358_v44  ;;  %v9589_v63 = vld [vmem:[#allocation3 + $0x1ec] sm:$0xf]  ;;  %v6515_v25 = vor.u32 %v9557_v4, %v6512_v61 }
 0x252   :  { %5677 = vmatpush.bf16.msrb.mxu2 %v9263_v5  ;;  %v10203_v51 = vld [vmem:[#allocation3 + $0x1514] sm:$0xf0]  ;;  %v9214_v52 = vld [vmem:[#allocation3 + $0x1608] sm:$0xf]  ;;  %v8959_v5 = vor.u32 %v10171_v37, %v8958_v47  ;;  %v6643_v33 = vor.u32 %v9589_v63, %v6640_v6  ;;  %v9617_v17 = vld [vmem:[#allocation3 + $0x2cc] sm:$0xf] }
 0x253   :  { %5690 = vmatpush.bf16.msrb.mxu3 %v9391_v28  ;;  %v10235_v58 = vld [vmem:[#allocation3 + $0x1614] sm:$0xf0]  ;;  %v9342_v57 = vld [vmem:[#allocation3 + $0x1708] sm:$0xf]  ;;  %v9087_v12 = vor.u32 %v10203_v51, %v9086_v50  ;;  %v6752_v31 = vld [vmem:[#allocation3 + $0x2d8] sm:$0xf0] }
 0x254   :  { %5652 = vmatpush.bf16.msrb.mxu0 %v8991_v62  ;;  %v10267_v32 = vld [vmem:[#allocation3 + $0x1714] sm:$0xf0]  ;;  %v9215_v28 = vor.u32 %v10235_v58, %v9214_v52  ;;  %v6496_v62 = vld [vmem:[#allocation3 + $0xd8] sm:$0xf0]  ;;  %v9649_v39 = vld [vmem:[#allocation3 + $0x3cc] sm:$0xf]  ;;  %v6755_v43 = vor.u32 %v9617_v17, %v6752_v31 }
 0x255   :  { %5665 = vmatpush.bf16.msrb.mxu1 %v9119_v38  ;;  %v9343_v20 = vor.u32 %v10267_v32, %v9342_v57  ;;  %v6899_v38 = vor.u32 %v9653_v18, %v6896_v19  ;;  %v6880_v40 = vld [vmem:[#allocation3 + $0x3d8] sm:$0xf0]  ;;  %v9549_v55 = vld [vmem:[#allocation3 + $0xac] sm:$0xf] }
 0x256   :  { %5678 = vmatpush.bf16.msrb.mxu2 %v9247_v42  ;;  %v6624_v42 = vld [vmem:[#allocation3 + $0x1d8] sm:$0xf0]  ;;  %v9581_v45 = vld [vmem:[#allocation3 + $0x1ac] sm:$0xf]  ;;  %v6883_v47 = vor.u32 %v9649_v39, %v6880_v40 }
 0x257   :  { %5691 = vmatpush.bf16.msrb.mxu3 %v9375_v0  ;;  %v6499_v0 = vor.u32 %v9553_v16, %v6496_v62  ;;  %v6627_v41 = vor.u32 %v9585_v49, %v6624_v42  ;;  %v6480_v44 = vld [vmem:[#allocation3 + $0xb8] sm:$0xf0]  ;;  %v10334_v50 = vld.sshfl [vmem:[#allocation1 + $0x30] sm:$0xff pattern:$0x73625140] }
 0x258   :  { %5653 = vmatpush.bf16.msrb.mxu0 %v8975_v46  ;;  %v10333_v46 = vld.sshfl [vmem:[#allocation1 + $0x20] sm:$0xff pattern:$0x73625140]  ;;  %v10335_v51 = vld.sshfl [vmem:[#allocation1 + $0x28] sm:$0xff pattern:$0x73625140]  ;;  %v6483_v58 = vor.u32 %v9549_v55, %v6480_v44 }
 0x259   :  { %5666 = vmatpush.bf16.msrb.mxu1 %v9103_v48  ;;  %v6608_v37 = vld [vmem:[#allocation3 + $0x1b8] sm:$0xf0]  ;;  %v9613_v48 = vld [vmem:[#allocation3 + $0x2ac] sm:$0xf] }
 0x25a   :  { %5679 = vmatpush.bf16.msrb.mxu2 %v9231_v56  ;;  %v6736_v56 = vld [vmem:[#allocation3 + $0x2b8] sm:$0xf0]  ;;  %v9645_v52 = vld [vmem:[#allocation3 + $0x3ac] sm:$0xf]  ;;  %v6611_v57 = vor.u32 %v9581_v45, %v6608_v37 }
 0x25b   :  { %5692 = vmatpush.bf16.msrb.mxu3 %v9359_v54  ;;  %v6864_v53 = vld [vmem:[#allocation3 + $0x3b8] sm:$0xf0]  ;;  %v10336_v54 = vld.sshfl [vmem:[#allocation1 + $0x38] sm:$0xff pattern:$0x73625140]  ;;  %v6739_v32 = vor.u32 %v9613_v48, %v6736_v56 }
 0x25c   :  { %5654 = vmatpush.bf16.msrb.mxu0 %v8959_v5  ;;  %v9545_v59 = vld [vmem:[#allocation3 + $0x8c] sm:$0xf]  ;;  %v6464_v4 = vld [vmem:[#allocation3 + $0x98] sm:$0xf0]  ;;  %v6867_v63 = vor.u32 %v9645_v52, %v6864_v53  ;;  %v10660_v18 = vpop.f32.mrf.mxu0 }
 0x25d   :  { %5667 = vmatpush.bf16.msrb.mxu1 %v9087_v12  ;;  %v9577_v61 = vld [vmem:[#allocation3 + $0x18c] sm:$0xf]  ;;  %v6592_v5 = vld [vmem:[#allocation3 + $0x198] sm:$0xf0]  ;;  %v10662_v16 = vpop.f32.mrf.mxu1 }
 0x25e   :  { %5680 = vmatpush.bf16.msrb.mxu2 %v9215_v28  ;;  %v9609_v6 = vld [vmem:[#allocation3 + $0x28c] sm:$0xf]  ;;  %v6720_v7 = vld [vmem:[#allocation3 + $0x298] sm:$0xf0]  ;;  %v6467_v28 = vor.u32 %v9545_v59, %v6464_v4  ;;  %v6595_v19 = vor.u32 %v9577_v61, %v6592_v5 }
 0x25f   :  { %5693 = vmatpush.bf16.msrb.mxu3 %v9343_v20  ;;  %5655 = vmatmul.bf16.vlgmr.msrb.gmra.mxu0 %v10333_v46  ;;  %v9641_v11 = vld [vmem:[#allocation3 + $0x38c] sm:$0xf]  ;;  %v6848_v12 = vld [vmem:[#allocation3 + $0x398] sm:$0xf0]  ;;  %v6723_v20 = vor.u32 %v9609_v6, %v6720_v7 }
 0x260   :  { %5699 = vmatpush.bf16.msra.mxu0 %v6515_v25  ;;  %5668 = vmatmul.bf16.vlgmr.msrb.gmra.mxu1 %v10335_v51  ;;  %v9541_v25 = vld [vmem:[#allocation3 + $0x6c] sm:$0xf]  ;;  %v6851_v62 = vor.u32 %v9641_v11, %v6848_v12  ;;  %v6576_v49 = vld [vmem:[#allocation3 + $0x178] sm:$0xf0] }
 0x261   :  { %5712 = vmatpush.bf16.msra.mxu1 %v6643_v33  ;;  %5681 = vmatmul.bf16.vlgmr.msrb.gmra.mxu2 %v10334_v50  ;;  %v6448_v33 = vld [vmem:[#allocation3 + $0x78] sm:$0xf0]  ;;  %v9637_v17 = vld [vmem:[#allocation3 + $0x36c] sm:$0xf] }
 0x262   :  { %5725 = vmatpush.bf16.msra.mxu2 %v6771_v34  ;;  %5694 = vmatmul.bf16.vlgmr.msrb.gmra.mxu3 %v10336_v54  ;;  %v9573_v34 = vld [vmem:[#allocation3 + $0x16c] sm:$0xf]  ;;  %v6704_v42 = vld [vmem:[#allocation3 + $0x278] sm:$0xf0]  ;;  %v6451_v39 = vor.u32 %v9541_v25, %v6448_v33 }
 0x263   :  { %5738 = vmatpush.bf16.msra.mxu3 %v6899_v38  ;;  %v9605_v38 = vld [vmem:[#allocation3 + $0x26c] sm:$0xf]  ;;  %v6832_v31 = vld [vmem:[#allocation3 + $0x378] sm:$0xf0]  ;;  %v6579_v40 = vor.u32 %v9573_v34, %v6576_v49 }
 0x264   :  { %5700 = vmatpush.bf16.msra.mxu0 %v6499_v0  ;;  %v6707_v0 = vor.u32 %v9605_v38, %v6704_v42  ;;  %v9569_v55 = vld [vmem:[#allocation3 + $0x14c] sm:$0xf]  ;;  %v10664_v44 = vpop.f32.mrf.mxu2  ;;  %v6835_v45 = vor.u32 %v9637_v17, %v6832_v31  ;;  %v6560_v46 = vld [vmem:[#allocation3 + $0x158] sm:$0xf0]  ;;  %v5450_v52 = vpop.f32.mrf.mxu0 }
 0x265   :  { %5713 = vmatpush.bf16.msra.mxu1 %v6627_v41  ;;  %v9537_v41 = vld [vmem:[#allocation3 + $0x4c] sm:$0xf]  ;;  %v6688_v37 = vld [vmem:[#allocation3 + $0x258] sm:$0xf0]  ;;  %v10666_v48 = vpop.f32.mrf.mxu3  ;;  %v6563_v53 = vor.u32 %v9569_v55, %v6560_v46  ;;  %v5463_v59 = vpop.f32.mrf.mxu1 }
 0x266   :  { %5726 = vmatpush.bf16.msra.mxu2 %v6755_v43  ;;  %v6432_v43 = vld [vmem:[#allocation3 + $0x58] sm:$0xf0]  ;;  %v9633_v56 = vld [vmem:[#allocation3 + $0x34c] sm:$0xf] }
 0x267   :  { %5739 = vmatpush.bf16.msra.mxu3 %v6883_v47  ;;  %v9601_v47 = vld [vmem:[#allocation3 + $0x24c] sm:$0xf]  ;;  %v6816_v50 = vld [vmem:[#allocation3 + $0x358] sm:$0xf0]  ;;  %v6435_v51 = vor.u32 %v9537_v41, %v6432_v43  ;;  %v5449_v41 = vadd.f32 %v10660_v18, %v10658_v36 }
 0x268   :  { %5701 = vmatpush.bf16.msra.mxu0 %v6483_v58  ;;  %v6691_v54 = vor.u32 %v9601_v47, %v6688_v37  ;;  %v9533_v58 = vld [vmem:[#allocation3 + $0x2c] sm:$0xf]  ;;  %v6819_v4 = vor.u32 %v9633_v56, %v6816_v50  ;;  %v6544_v61 = vld [vmem:[#allocation3 + $0x138] sm:$0xf0] }
 0x269   :  { %5714 = vmatpush.bf16.msra.mxu1 %v6611_v57  ;;  %v6416_v57 = vld [vmem:[#allocation3 + $0x38] sm:$0xf0]  ;;  %v9629_v6 = vld [vmem:[#allocation3 + $0x32c] sm:$0xf]  ;;  %v5462_v36 = vadd.f32 %v10662_v16, %v5449_v41 }
 0x26a   :  { %5727 = vmatpush.bf16.msra.mxu2 %v6739_v32  ;;  %v9565_v32 = vld [vmem:[#allocation3 + $0x12c] sm:$0xf]  ;;  %v6672_v5 = vld [vmem:[#allocation3 + $0x238] sm:$0xf0]  ;;  %v6419_v11 = vor.u32 %v9533_v58, %v6416_v57 }
 0x26b   :  { %5740 = vmatpush.bf16.msra.mxu3 %v6867_v63  ;;  %v9597_v63 = vld [vmem:[#allocation3 + $0x22c] sm:$0xf]  ;;  %v6800_v7 = vld [vmem:[#allocation3 + $0x338] sm:$0xf0]  ;;  %v5475_v16 = vadd.f32 %v10664_v44, %v5462_v36 }
 0x26c   :  { %5702 = vmatpush.bf16.msra.mxu0 %v6467_v28  ;;  %v9529_v12 = vld [vmem:[#allocation3 + $0xc] sm:$0xf]  ;;  %v6400_v28 = vld [vmem:[#allocation3 + $0x18] sm:$0xf0]  ;;  %v6803_v49 = vor.u32 %v9629_v6, %v6800_v7 }
 0x26d   :  { %5715 = vmatpush.bf16.msra.mxu1 %v6595_v19  ;;  %v6547_v19 = vor.u32 %v9565_v32, %v6544_v61  ;;  %v9561_v25 = vld [vmem:[#allocation3 + $0x10c] sm:$0xf]  ;;  %v6528_v33 = vld [vmem:[#allocation3 + $0x118] sm:$0xf0]  ;;  %v5489_v31 = vpop.f32.mrf.mxu3  ;;  %v6403_v43 = vor.u32 %v9529_v12, %v6400_v28 }
 0x26e   :  { %5728 = vmatpush.bf16.msra.mxu2 %v6723_v20  ;;  %v6675_v20 = vor.u32 %v9597_v63, %v6672_v5  ;;  %v9593_v34 = vld [vmem:[#allocation3 + $0x20c] sm:$0xf]  ;;  %v6656_v38 = vld [vmem:[#allocation3 + $0x218] sm:$0xf0]  ;;  %v6531_v47 = vor.u32 %v9561_v25, %v6528_v33 }
 0x26f   :  { %5741 = vmatpush.bf16.msra.mxu3 %v6851_v62  ;;  %v5476_v62 = vpop.f32.mrf.mxu2  ;;  %v9625_v42 = vld [vmem:[#allocation3 + $0x30c] sm:$0xf]  ;;  %v6784_v17 = vld [vmem:[#allocation3 + $0x318] sm:$0xf0]  ;;  %v6659_v37 = vor.u32 %v9593_v34, %v6656_v38 }
 0x270   :  { %5703 = vmatpush.bf16.msra.mxu0 %v6451_v39  ;;  %v9685_v39 = vld [vmem:[#allocation3 + $0x4ec] sm:$0xf]  ;;  %v7152_v55 = vld [vmem:[#allocation3 + $0x5f8] sm:$0xf0] }
 0x271   :  { %5716 = vmatpush.bf16.msra.mxu1 %v6579_v40  ;;  %v7024_v40 = vld [vmem:[#allocation3 + $0x4f8] sm:$0xf0]  ;;  %v9781_v56 = vld [vmem:[#allocation3 + $0x7ec] sm:$0xf] }
 0x272   :  { %5729 = vmatpush.bf16.msra.mxu2 %v6707_v0  ;;  %v9717_v0 = vld [vmem:[#allocation3 + $0x5ec] sm:$0xf]  ;;  %v7280_v46 = vld [vmem:[#allocation3 + $0x6f8] sm:$0xf0]  ;;  %v7027_v52 = vor.u32 %v9685_v39, %v7024_v40  ;;  %v5488_v40 = vadd.f32 %v10666_v48, %v5475_v16 }
 0x273   :  { %5742 = vmatpush.bf16.msra.mxu3 %v6835_v45  ;;  %v9749_v45 = vld [vmem:[#allocation3 + $0x6ec] sm:$0xf]  ;;  %v7408_v50 = vld [vmem:[#allocation3 + $0x7f8] sm:$0xf0] }
 0x274   :  { %5704 = vmatpush.bf16.msra.mxu0 %v6435_v51  ;;  %v6787_v51 = vor.u32 %v9625_v42, %v6784_v17  ;;  %v9681_v58 = vld [vmem:[#allocation3 + $0x4cc] sm:$0xf]  ;;  %v7008_v57 = vld [vmem:[#allocation3 + $0x4d8] sm:$0xf0]  ;;  %v7411_v18 = vor.u32 %v9781_v56, %v7408_v50 }
 0x275   :  { %5717 = vmatpush.bf16.msra.mxu1 %v6563_v53  ;;  %v7155_v53 = vor.u32 %v9717_v0, %v7152_v55  ;;  %v9713_v32 = vld [vmem:[#allocation3 + $0x5cc] sm:$0xf]  ;;  %v7136_v59 = vld [vmem:[#allocation3 + $0x5d8] sm:$0xf0]  ;;  %v7011_v6 = vor.u32 %v9681_v58, %v7008_v57 }
 0x276   :  { %5730 = vmatpush.bf16.msra.mxu2 %v6691_v54  ;;  %v7283_v54 = vor.u32 %v9749_v45, %v7280_v46  ;;  %v7264_v61 = vld [vmem:[#allocation3 + $0x6d8] sm:$0xf0]  ;;  %v9777_v63 = vld [vmem:[#allocation3 + $0x7cc] sm:$0xf]  ;;  %v7139_v7 = vor.u32 %v9713_v32, %v7136_v59 }
 0x277   :  { %5743 = vmatpush.bf16.msra.mxu3 %v6819_v4  ;;  %v9745_v4 = vld [vmem:[#allocation3 + $0x6cc] sm:$0xf]  ;;  %v7392_v5 = vld [vmem:[#allocation3 + $0x7d8] sm:$0xf0] }
 0x278   :  { %5705 = vmatpush.bf16.msra.mxu0 %v6419_v11  ;;  %v7267_v11 = vor.u32 %v9745_v4, %v7264_v61  ;;  %v9677_v12 = vld [vmem:[#allocation3 + $0x4ac] sm:$0xf]  ;;  %v6992_v28 = vld [vmem:[#allocation3 + $0x4b8] sm:$0xf0] }
 0x279   :  { %5718 = vmatpush.bf16.msra.mxu1 %v6547_v19  ;;  %v9709_v19 = vld [vmem:[#allocation3 + $0x5ac] sm:$0xf]  ;;  %v7120_v25 = vld [vmem:[#allocation3 + $0x5b8] sm:$0xf0]  ;;  %v6995_v38 = vor.u32 %v9677_v12, %v6992_v28 }
 0x27a   :  { %5731 = vmatpush.bf16.msra.mxu2 %v6675_v20  ;;  %v7395_v20 = vor.u32 %v9777_v63, %v7392_v5  ;;  %v9741_v33 = vld [vmem:[#allocation3 + $0x6ac] sm:$0xf]  ;;  %v7248_v34 = vld [vmem:[#allocation3 + $0x6b8] sm:$0xf0]  ;;  %v7123_v44 = vor.u32 %v9709_v19, %v7120_v25 }
 0x27b   :  { %5744 = vmatpush.bf16.msra.mxu3 %v6803_v49  ;;  %v9773_v62 = vld [vmem:[#allocation3 + $0x7ac] sm:$0xf]  ;;  %v7376_v49 = vld [vmem:[#allocation3 + $0x7b8] sm:$0xf0]  ;;  %v7251_v42 = vor.u32 %v9741_v33, %v7248_v34 }
 0x27c   :  { %5706 = vmatpush.bf16.msra.mxu0 %v6403_v43  ;;  %v9673_v17 = vld [vmem:[#allocation3 + $0x48c] sm:$0xf]  ;;  %v6976_v31 = vld [vmem:[#allocation3 + $0x498] sm:$0xf0]  ;;  %v5500_v43 = vpop.f32.mrf.mxu0 }
 0x27d   :  { %5719 = vmatpush.bf16.msra.mxu1 %v6531_v47  ;;  %v9705_v39 = vld [vmem:[#allocation3 + $0x58c] sm:$0xf]  ;;  %v7104_v0 = vld [vmem:[#allocation3 + $0x598] sm:$0xf0]  ;;  %v5501_v45 = vadd.f32 %v5500_v43, %v5488_v40  ;;  %v5513_v46 = vpop.f32.mrf.mxu1 }
 0x27e   :  { %5732 = vmatpush.bf16.msra.mxu2 %v6659_v37  ;;  %v9737_v41 = vld [vmem:[#allocation3 + $0x68c] sm:$0xf]  ;;  %v7360_v55 = vld [vmem:[#allocation3 + $0x798] sm:$0xf0]  ;;  %v7107_v47 = vor.u32 %v9705_v39, %v7104_v0 }
 0x27f   :  { %5745 = vmatpush.bf16.msra.mxu3 %v6787_v51  ;;  %5707 = vmatmul.bf16.vlgmr.msra.gmra.mxu0 %v10503_v24  ;;  %v7232_v24 = vld [vmem:[#allocation3 + $0x698] sm:$0xf0]  ;;  %v9669_v56 = vld [vmem:[#allocation3 + $0x46c] sm:$0xf] }
 0x280   :  { %5751 = vmatpush.bf16.msrb.mxu0 %v7027_v52  ;;  %5720 = vmatmul.bf16.vlgmr.msra.gmra.mxu1 %v10508_v27  ;;  %v6979_v27 = vor.u32 %v9673_v17, %v6976_v31  ;;  %v7235_v37 = vor.u32 %v9737_v41, %v7232_v24  ;;  %v6960_v50 = vld [vmem:[#allocation3 + $0x478] sm:$0xf0]  ;;  %v9701_v51 = vld [vmem:[#allocation3 + $0x56c] sm:$0xf]  ;;  %v5514_v52 = vadd.f32 %v5513_v46, %v5501_v45 }
 0x281   :  { %5764 = vmatpush.bf16.msrb.mxu1 %v7155_v53  ;;  %5733 = vmatmul.bf16.vlgmr.msra.gmra.mxu2 %v10501_v23  ;;  %v7379_v23 = vor.u32 %v9773_v62, %v7376_v49  ;;  %v7088_v53 = vld [vmem:[#allocation3 + $0x578] sm:$0xf0]  ;;  %v9765_v57 = vld [vmem:[#allocation3 + $0x76c] sm:$0xf]  ;;  %v6963_v36 = vor.u32 %v9669_v56, %v6960_v50 }
 0x282   :  { %5777 = vmatpush.bf16.msrb.mxu2 %v7283_v54  ;;  %5746 = vmatmul.bf16.vlgmr.msra.gmra.mxu3 %v10506_v26  ;;  %v9769_v26 = vld [vmem:[#allocation3 + $0x78c] sm:$0xf]  ;;  %v7216_v58 = vld [vmem:[#allocation3 + $0x678] sm:$0xf0] }
 0x283   :  { %5790 = vmatpush.bf16.msrb.mxu3 %v7411_v18  ;;  %v7363_v48 = vor.u32 %v9769_v26, %v7360_v55  ;;  %v9733_v54 = vld [vmem:[#allocation3 + $0x66c] sm:$0xf]  ;;  %v7344_v32 = vld [vmem:[#allocation3 + $0x778] sm:$0xf0]  ;;  %v7091_v18 = vor.u32 %v9701_v51, %v7088_v53 }
 0x284   :  { %5752 = vmatpush.bf16.msrb.mxu0 %v7011_v6  ;;  %v7219_v59 = vor.u32 %v9733_v54, %v7216_v58  ;;  %v9665_v4 = vld [vmem:[#allocation3 + $0x44c] sm:$0xf]  ;;  %v6944_v61 = vld [vmem:[#allocation3 + $0x458] sm:$0xf0]  ;;  %v7347_v5 = vor.u32 %v9765_v57, %v7344_v32  ;;  %v5526_v6 = vpop.f32.mrf.mxu2  ;;  %v5502_v25 = vpop.f32.mrf.mxu0 }
 0x285   :  { %5765 = vmatpush.bf16.msrb.mxu1 %v7139_v7  ;;  %v9697_v63 = vld [vmem:[#allocation3 + $0x54c] sm:$0xf]  ;;  %v7072_v7 = vld [vmem:[#allocation3 + $0x558] sm:$0xf0]  ;;  %v5527_v28 = vadd.f32 %v5526_v6, %v5514_v52  ;;  %v5539_v19 = vpop.f32.mrf.mxu3  ;;  %v6947_v33 = vor.u32 %v9665_v4, %v6944_v61  ;;  %v5515_v34 = vpop.f32.mrf.mxu1 }
 0x286   :  { %5778 = vmatpush.bf16.msrb.mxu2 %v7267_v11  ;;  %v9729_v11 = vld [vmem:[#allocation3 + $0x64c] sm:$0xf]  ;;  %v7200_v12 = vld [vmem:[#allocation3 + $0x658] sm:$0xf0]  ;;  %v7075_v49 = vor.u32 %v9697_v63, %v7072_v7 }
 0x287   :  { %5791 = vmatpush.bf16.msrb.mxu3 %v7395_v20  ;;  %v9761_v16 = vld [vmem:[#allocation3 + $0x74c] sm:$0xf]  ;;  %v7328_v20 = vld [vmem:[#allocation3 + $0x758] sm:$0xf0]  ;;  %v10677_v62 = vadd.f32 %v5539_v19, %v5527_v28 }
 0x288   :  { %5753 = vmatpush.bf16.msrb.mxu0 %v6995_v38  ;;  %v7203_v38 = vor.u32 %v9729_v11, %v7200_v12  ;;  %v9693_v17 = vld [vmem:[#allocation3 + $0x52c] sm:$0xf]  ;;  %v7331_v31 = vor.u32 %v9761_v16, %v7328_v20  ;;  %v7056_v39 = vld [vmem:[#allocation3 + $0x538] sm:$0xf0] }
 0x289   :  { %5766 = vmatpush.bf16.msrb.mxu1 %v7123_v44  ;;  %v9661_v44 = vld [vmem:[#allocation3 + $0x42c] sm:$0xf]  ;;  %v7312_v41 = vld [vmem:[#allocation3 + $0x738] sm:$0xf0]  ;;  %v7059_v55 = vor.u32 %v9693_v17, %v7056_v39 }
 0x28a   :  { %5779 = vmatpush.bf16.msrb.mxu2 %v7251_v42  ;;  %v6928_v42 = vld [vmem:[#allocation3 + $0x438] sm:$0xf0]  ;;  %v9725_v40 = vld [vmem:[#allocation3 + $0x62c] sm:$0xf] }
 0x28b   :  { %5792 = vmatpush.bf16.msrb.mxu3 %v7379_v23  ;;  %v7184_v23 = vld [vmem:[#allocation3 + $0x638] sm:$0xf0]  ;;  %v9757_v0 = vld [vmem:[#allocation3 + $0x72c] sm:$0xf]  ;;  %v6931_v24 = vor.u32 %v9661_v44, %v6928_v42 }
 0x28c   :  { %5754 = vmatpush.bf16.msrb.mxu0 %v6979_v27  ;;  %v9657_v43 = vld [vmem:[#allocation3 + $0x40c] sm:$0xf]  ;;  %v6912_v26 = vld [vmem:[#allocation3 + $0x418] sm:$0xf0]  ;;  %v7187_v45 = vor.u32 %v9725_v40, %v7184_v23 }
 0x28d   :  { %5767 = vmatpush.bf16.msrb.mxu1 %v7107_v47  ;;  %v9689_v27 = vld [vmem:[#allocation3 + $0x50c] sm:$0xf]  ;;  %v7040_v46 = vld [vmem:[#allocation3 + $0x518] sm:$0xf0]  ;;  %v5541_v58 = vpop.f32.mrf.mxu3  ;;  %v6915_v57 = vor.u32 %v9657_v43, %v6912_v26 }
 0x28e   :  { %5780 = vmatpush.bf16.msrb.mxu2 %v7235_v37  ;;  %v9721_v47 = vld [vmem:[#allocation3 + $0x60c] sm:$0xf]  ;;  %v7315_v37 = vor.u32 %v9757_v0, %v7312_v41  ;;  %v7168_v56 = vld [vmem:[#allocation3 + $0x618] sm:$0xf0] }
 0x28f   :  { %5793 = vmatpush.bf16.msrb.mxu3 %v7363_v48  ;;  %v9753_v50 = vld [vmem:[#allocation3 + $0x70c] sm:$0xf]  ;;  %v7296_v51 = vld [vmem:[#allocation3 + $0x718] sm:$0xf0]  ;;  %v5528_v48 = vpop.f32.mrf.mxu2  ;;  %v7171_v4 = vor.u32 %v9721_v47, %v7168_v56 }
 0x290   :  { %5755 = vmatpush.bf16.msrb.mxu0 %v6963_v36  ;;  %v9813_v52 = vld [vmem:[#allocation3 + $0x8ec] sm:$0xf]  ;;  %v7536_v53 = vld [vmem:[#allocation3 + $0x8f8] sm:$0xf0] }
 0x291   :  { %5768 = vmatpush.bf16.msrb.mxu1 %v7091_v18  ;;  %v9845_v54 = vld [vmem:[#allocation3 + $0x9ec] sm:$0xf]  ;;  %v7664_v32 = vld [vmem:[#allocation3 + $0x9f8] sm:$0xf0]  ;;  %v7539_v6 = vor.u32 %v9813_v52, %v7536_v53 }
 0x292   :  { %5781 = vmatpush.bf16.msrb.mxu2 %v7219_v59  ;;  %v9877_v36 = vld [vmem:[#allocation3 + $0xaec] sm:$0xf]  ;;  %v7792_v18 = vld [vmem:[#allocation3 + $0xaf8] sm:$0xf0]  ;;  %v7043_v59 = vor.u32 %v9689_v27, %v7040_v46  ;;  %v7667_v7 = vor.u32 %v9845_v54, %v7664_v32 }
 0x293   :  { %5794 = vmatpush.bf16.msrb.mxu3 %v7347_v5  ;;  %v9909_v61 = vld [vmem:[#allocation3 + $0xbec] sm:$0xf]  ;;  %v7920_v63 = vld [vmem:[#allocation3 + $0xbf8] sm:$0xf0]  ;;  %v7299_v5 = vor.u32 %v9753_v50, %v7296_v51  ;;  %v7795_v11 = vor.u32 %v9877_v36, %v7792_v18 }
 0x294   :  { %5756 = vmatpush.bf16.msrb.mxu0 %v6947_v33  ;;  %v9809_v12 = vld [vmem:[#allocation3 + $0x8cc] sm:$0xf]  ;;  %v7520_v28 = vld [vmem:[#allocation3 + $0x8d8] sm:$0xf0]  ;;  %v7923_v16 = vor.u32 %v9909_v61, %v7920_v63 }
 0x295   :  { %5769 = vmatpush.bf16.msrb.mxu1 %v7075_v49  ;;  %v9841_v19 = vld [vmem:[#allocation3 + $0x9cc] sm:$0xf]  ;;  %v7648_v20 = vld [vmem:[#allocation3 + $0x9d8] sm:$0xf0] }
 0x296   :  { %5782 = vmatpush.bf16.msrb.mxu2 %v7203_v38  ;;  %v9873_v25 = vld [vmem:[#allocation3 + $0xacc] sm:$0xf]  ;;  %v7776_v33 = vld [vmem:[#allocation3 + $0xad8] sm:$0xf0]  ;;  %v7523_v38 = vor.u32 %v9809_v12, %v7520_v28  ;;  %v7651_v44 = vor.u32 %v9841_v19, %v7648_v20 }
 0x297   :  { %5795 = vmatpush.bf16.msrb.mxu3 %v7331_v31  ;;  %v9905_v34 = vld [vmem:[#allocation3 + $0xbcc] sm:$0xf]  ;;  %v7904_v49 = vld [vmem:[#allocation3 + $0xbd8] sm:$0xf0]  ;;  %v7779_v42 = vor.u32 %v9873_v25, %v7776_v33 }
 0x298   :  { %5757 = vmatpush.bf16.msrb.mxu0 %v6931_v24  ;;  %v9805_v17 = vld [vmem:[#allocation3 + $0x8ac] sm:$0xf]  ;;  %v7504_v31 = vld [vmem:[#allocation3 + $0x8b8] sm:$0xf0]  ;;  %v7907_v40 = vor.u32 %v9905_v34, %v7904_v49 }
 0x299   :  { %5770 = vmatpush.bf16.msrb.mxu1 %v7059_v55  ;;  %v9837_v39 = vld [vmem:[#allocation3 + $0x9ac] sm:$0xf]  ;;  %v7632_v23 = vld [vmem:[#allocation3 + $0x9b8] sm:$0xf0]  ;;  %v7507_v26 = vor.u32 %v9805_v17, %v7504_v31 }
 0x29a   :  { %5783 = vmatpush.bf16.msrb.mxu2 %v7187_v45  ;;  %v9869_v0 = vld [vmem:[#allocation3 + $0xaac] sm:$0xf]  ;;  %v7760_v41 = vld [vmem:[#allocation3 + $0xab8] sm:$0xf0]  ;;  %v7635_v55 = vor.u32 %v9837_v39, %v7632_v23 }
 0x29b   :  { %5796 = vmatpush.bf16.msrb.mxu3 %v7315_v37  ;;  %v9901_v24 = vld [vmem:[#allocation3 + $0xbac] sm:$0xf]  ;;  %v7888_v43 = vld [vmem:[#allocation3 + $0xbb8] sm:$0xf0]  ;;  %v7763_v45 = vor.u32 %v9869_v0, %v7760_v41 }
 0x29c   :  { %5758 = vmatpush.bf16.msrb.mxu0 %v6915_v57  ;;  %v9801_v27 = vld [vmem:[#allocation3 + $0x88c] sm:$0xf]  ;;  %v7488_v46 = vld [vmem:[#allocation3 + $0x898] sm:$0xf0]  ;;  %v7891_v47 = vor.u32 %v9901_v24, %v7888_v43  ;;  %v5552_v50 = vpop.f32.mrf.mxu0 }
 0x29d   :  { %5771 = vmatpush.bf16.msrb.mxu1 %v7043_v59  ;;  %v7616_v37 = vld [vmem:[#allocation3 + $0x998] sm:$0xf0]  ;;  %v9865_v56 = vld [vmem:[#allocation3 + $0xa8c] sm:$0xf]  ;;  %v5553_v48 = vadd.f32 %v5552_v50, %v10677_v62  ;;  %v7491_v52 = vor.u32 %v9801_v27, %v7488_v46 }
 0x29e   :  { %5784 = vmatpush.bf16.msrb.mxu2 %v7171_v4  ;;  %v7872_v51 = vld [vmem:[#allocation3 + $0xb98] sm:$0xf0]  ;;  %v9797_v58 = vld [vmem:[#allocation3 + $0x86c] sm:$0xf] }
 0x29f   :  { %5797 = vmatpush.bf16.msrb.mxu3 %v7299_v5  ;;  %5759 = vmatmul.bf16.vlgmr.msrb.gmra.mxu0 %v10521_v22  ;;  %v7744_v22 = vld [vmem:[#allocation3 + $0xa98] sm:$0xf0]  ;;  %v9829_v32 = vld [vmem:[#allocation3 + $0x96c] sm:$0xf] }
 0x2a0   :  { %5803 = vmatpush.bf16.msra.mxu0 %v7539_v6  ;;  %5772 = vmatmul.bf16.vlgmr.msrb.gmra.mxu1 %v10525_v30  ;;  %v5565_v30 = vpop.f32.mrf.mxu1  ;;  %v7747_v54 = vor.u32 %v9865_v56, %v7744_v22  ;;  %v7472_v57 = vld [vmem:[#allocation3 + $0x878] sm:$0xf0]  ;;  %v9861_v4 = vld [vmem:[#allocation3 + $0xa6c] sm:$0xf] }
 0x2a1   :  { %5816 = vmatpush.bf16.msra.mxu1 %v7667_v7  ;;  %5785 = vmatmul.bf16.vlgmr.msrb.gmra.mxu2 %v10519_v21  ;;  %v9833_v21 = vld [vmem:[#allocation3 + $0x98c] sm:$0xf]  ;;  %v5566_v18 = vadd.f32 %v5565_v30, %v5553_v48  ;;  %v7600_v59 = vld [vmem:[#allocation3 + $0x978] sm:$0xf0]  ;;  %v7475_v6 = vor.u32 %v9797_v58, %v7472_v57 }
 0x2a2   :  { %5829 = vmatpush.bf16.msra.mxu2 %v7795_v11  ;;  %5798 = vmatmul.bf16.vlgmr.msrb.gmra.mxu3 %v10523_v29  ;;  %v9897_v29 = vld [vmem:[#allocation3 + $0xb8c] sm:$0xf]  ;;  %v7619_v53 = vor.u32 %v9833_v21, %v7616_v37  ;;  %v7728_v61 = vld [vmem:[#allocation3 + $0xa78] sm:$0xf0]  ;;  %v7603_v62 = vor.u32 %v9829_v32, %v7600_v59 }
 0x2a3   :  { %5842 = vmatpush.bf16.msra.mxu3 %v7923_v16  ;;  %v7875_v36 = vor.u32 %v9897_v29, %v7872_v51  ;;  %v9893_v63 = vld [vmem:[#allocation3 + $0xb6c] sm:$0xf]  ;;  %v7856_v5 = vld [vmem:[#allocation3 + $0xb78] sm:$0xf0]  ;;  %v7731_v7 = vor.u32 %v9861_v4, %v7728_v61 }
 0x2a4   :  { %5804 = vmatpush.bf16.msra.mxu0 %v7523_v38  ;;  %v9793_v11 = vld [vmem:[#allocation3 + $0x84c] sm:$0xf]  ;;  %v7456_v12 = vld [vmem:[#allocation3 + $0x858] sm:$0xf0]  ;;  %v7859_v19 = vor.u32 %v9893_v63, %v7856_v5  ;;  %v5578_v16 = vpop.f32.mrf.mxu2 }
 0x2a5   :  { %5817 = vmatpush.bf16.msra.mxu1 %v7651_v44  ;;  %v9825_v28 = vld [vmem:[#allocation3 + $0x94c] sm:$0xf]  ;;  %v7584_v20 = vld [vmem:[#allocation3 + $0x958] sm:$0xf0]  ;;  %v5579_v34 = vadd.f32 %v5578_v16, %v5566_v18  ;;  %v5591_v49 = vpop.f32.mrf.mxu3  ;;  %v7459_v17 = vor.u32 %v9793_v11, %v7456_v12 }
 0x2a6   :  { %5830 = vmatpush.bf16.msra.mxu2 %v7779_v42  ;;  %v9857_v25 = vld [vmem:[#allocation3 + $0xa4c] sm:$0xf]  ;;  %v7712_v33 = vld [vmem:[#allocation3 + $0xa58] sm:$0xf0]  ;;  %v5554_v42 = vpop.f32.mrf.mxu0 }
 0x2a7   :  { %5843 = vmatpush.bf16.msra.mxu3 %v7907_v40  ;;  %v9889_v38 = vld [vmem:[#allocation3 + $0xb4c] sm:$0xf]  ;;  %v7840_v44 = vld [vmem:[#allocation3 + $0xb58] sm:$0xf0]  ;;  %v10684_v39 = vadd.f32 %v5591_v49, %v5579_v34  ;;  %v7587_v40 = vor.u32 %v9825_v28, %v7584_v20  ;;  %v7715_v23 = vor.u32 %v9857_v25, %v7712_v33 }
 0x2a8   :  { %5805 = vmatpush.bf16.msra.mxu0 %v7507_v26  ;;  %v5567_v31 = vpop.f32.mrf.mxu1  ;;  %v9789_v0 = vld [vmem:[#allocation3 + $0x82c] sm:$0xf]  ;;  %v7440_v41 = vld [vmem:[#allocation3 + $0x838] sm:$0xf0]  ;;  %v7843_v43 = vor.u32 %v9889_v38, %v7840_v44 }
 0x2a9   :  { %5818 = vmatpush.bf16.msra.mxu1 %v7635_v55  ;;  %v9821_v24 = vld [vmem:[#allocation3 + $0x92c] sm:$0xf]  ;;  %v7568_v26 = vld [vmem:[#allocation3 + $0x938] sm:$0xf0]  ;;  %v7443_v21 = vor.u32 %v9789_v0, %v7440_v41 }
 0x2aa   :  { %5831 = vmatpush.bf16.msra.mxu2 %v7763_v45  ;;  %v9853_v55 = vld [vmem:[#allocation3 + $0xa2c] sm:$0xf]  ;;  %v7696_v45 = vld [vmem:[#allocation3 + $0xa38] sm:$0xf0]  ;;  %v7571_v56 = vor.u32 %v9821_v24, %v7568_v26 }
 0x2ab   :  { %5844 = vmatpush.bf16.msra.mxu3 %v7891_v47  ;;  %v9885_v27 = vld [vmem:[#allocation3 + $0xb2c] sm:$0xf]  ;;  %v7824_v46 = vld [vmem:[#allocation3 + $0xb38] sm:$0xf0]  ;;  %v7699_v22 = vor.u32 %v9853_v55, %v7696_v45 }
 0x2ac   :  { %5806 = vmatpush.bf16.msra.mxu0 %v7491_v52  ;;  %v9785_v47 = vld [vmem:[#allocation3 + $0x80c] sm:$0xf]  ;;  %v7424_v37 = vld [vmem:[#allocation3 + $0x818] sm:$0xf0]  ;;  %v7827_v48 = vor.u32 %v9885_v27, %v7824_v46 }
 0x2ad   :  { %5819 = vmatpush.bf16.msra.mxu1 %v7619_v53  ;;  %v9817_v50 = vld [vmem:[#allocation3 + $0x90c] sm:$0xf]  ;;  %v7552_v29 = vld [vmem:[#allocation3 + $0x918] sm:$0xf0]  ;;  %v7427_v18 = vor.u32 %v9785_v47, %v7424_v37 }
 0x2ae   :  { %5832 = vmatpush.bf16.msra.mxu2 %v7747_v54  ;;  %v9849_v51 = vld [vmem:[#allocation3 + $0xa0c] sm:$0xf]  ;;  %v7680_v52 = vld [vmem:[#allocation3 + $0xa18] sm:$0xf0]  ;;  %v5580_v54 = vpop.f32.mrf.mxu2  ;;  %v7555_v63 = vor.u32 %v9817_v50, %v7552_v29 }
 0x2af   :  { %5845 = vmatpush.bf16.msra.mxu3 %v7875_v36  ;;  %v9881_v30 = vld [vmem:[#allocation3 + $0xb0c] sm:$0xf]  ;;  %v7808_v53 = vld [vmem:[#allocation3 + $0xb18] sm:$0xf0]  ;;  %v5593_v36 = vpop.f32.mrf.mxu3  ;;  %v7683_v5 = vor.u32 %v9849_v51, %v7680_v52 }
 0x2b0   :  { %5807 = vmatpush.bf16.msra.mxu0 %v7475_v6  ;;  %v9941_v58 = vld [vmem:[#allocation3 + $0xcec] sm:$0xf]  ;;  %v8048_v57 = vld [vmem:[#allocation3 + $0xcf8] sm:$0xf0] }
 0x2b1   :  { %5820 = vmatpush.bf16.msra.mxu1 %v7603_v62  ;;  %v9973_v32 = vld [vmem:[#allocation3 + $0xdec] sm:$0xf]  ;;  %v8176_v59 = vld [vmem:[#allocation3 + $0xdf8] sm:$0xf0]  ;;  %v8051_v11 = vor.u32 %v9941_v58, %v8048_v57 }
 0x2b2   :  { %5833 = vmatpush.bf16.msra.mxu2 %v7731_v7  ;;  %v10005_v4 = vld [vmem:[#allocation3 + $0xeec] sm:$0xf]  ;;  %v8304_v61 = vld [vmem:[#allocation3 + $0xef8] sm:$0xf0]  ;;  %v7811_v7 = vor.u32 %v9881_v30, %v7808_v53  ;;  %v8179_v12 = vor.u32 %v9973_v32, %v8176_v59 }
 0x2b3   :  { %5846 = vmatpush.bf16.msra.mxu3 %v7859_v19  ;;  %v10037_v6 = vld [vmem:[#allocation3 + $0xfec] sm:$0xf]  ;;  %v8432_v62 = vld [vmem:[#allocation3 + $0xff8] sm:$0xf0]  ;;  %v8307_v28 = vor.u32 %v10005_v4, %v8304_v61 }
 0x2b4   :  { %5808 = vmatpush.bf16.msra.mxu0 %v7459_v17  ;;  %v9937_v19 = vld [vmem:[#allocation3 + $0xccc] sm:$0xf]  ;;  %v8032_v16 = vld [vmem:[#allocation3 + $0xcd8] sm:$0xf0]  ;;  %v8435_v25 = vor.u32 %v10037_v6, %v8432_v62 }
 0x2b5   :  { %5821 = vmatpush.bf16.msra.mxu1 %v7587_v40  ;;  %v9969_v20 = vld [vmem:[#allocation3 + $0xdcc] sm:$0xf]  ;;  %v8160_v33 = vld [vmem:[#allocation3 + $0xdd8] sm:$0xf0]  ;;  %v8035_v42 = vor.u32 %v9937_v19, %v8032_v16 }
 0x2b6   :  { %5834 = vmatpush.bf16.msra.mxu2 %v7715_v23  ;;  %v10001_v34 = vld [vmem:[#allocation3 + $0xecc] sm:$0xf]  ;;  %v8288_v49 = vld [vmem:[#allocation3 + $0xed8] sm:$0xf0]  ;;  %v8163_v17 = vor.u32 %v9969_v20, %v8160_v33 }
 0x2b7   :  { %5847 = vmatpush.bf16.msra.mxu3 %v7843_v43  ;;  %v10033_v38 = vld [vmem:[#allocation3 + $0xfcc] sm:$0xf]  ;;  %v8416_v44 = vld [vmem:[#allocation3 + $0xfd8] sm:$0xf0]  ;;  %v8291_v31 = vor.u32 %v10001_v34, %v8288_v49 }
 0x2b8   :  { %5809 = vmatpush.bf16.msra.mxu0 %v7443_v21  ;;  %v9933_v40 = vld [vmem:[#allocation3 + $0xcac] sm:$0xf]  ;;  %v8016_v23 = vld [vmem:[#allocation3 + $0xcb8] sm:$0xf0]  ;;  %v8419_v41 = vor.u32 %v10033_v38, %v8416_v44 }
 0x2b9   :  { %5822 = vmatpush.bf16.msra.mxu1 %v7571_v56  ;;  %v9965_v0 = vld [vmem:[#allocation3 + $0xdac] sm:$0xf]  ;;  %v8144_v24 = vld [vmem:[#allocation3 + $0xdb8] sm:$0xf0]  ;;  %v8019_v27 = vor.u32 %v9933_v40, %v8016_v23 }
 0x2ba   :  { %5835 = vmatpush.bf16.msra.mxu2 %v7699_v22  ;;  %v9997_v43 = vld [vmem:[#allocation3 + $0xeac] sm:$0xf]  ;;  %v8272_v26 = vld [vmem:[#allocation3 + $0xeb8] sm:$0xf0]  ;;  %v8147_v46 = vor.u32 %v9965_v0, %v8144_v24 }
 0x2bb   :  { %5848 = vmatpush.bf16.msra.mxu3 %v7827_v48  ;;  %v10029_v55 = vld [vmem:[#allocation3 + $0xfac] sm:$0xf]  ;;  %v8400_v45 = vld [vmem:[#allocation3 + $0xfb8] sm:$0xf0]  ;;  %v8275_v21 = vor.u32 %v9997_v43, %v8272_v26 }
 0x2bc   :  { %5810 = vmatpush.bf16.msra.mxu0 %v7427_v18  ;;  %v9929_v47 = vld [vmem:[#allocation3 + $0xc8c] sm:$0xf]  ;;  %v8403_v56 = vor.u32 %v10029_v55, %v8400_v45  ;;  %v8128_v22 = vld [vmem:[#allocation3 + $0xd98] sm:$0xf0]  ;;  %v5604_v29 = vpop.f32.mrf.mxu0 }
 0x2bd   :  { %5823 = vmatpush.bf16.msra.mxu1 %v7555_v63  ;;  %v9961_v37 = vld [vmem:[#allocation3 + $0xd8c] sm:$0xf]  ;;  %v8384_v51 = vld [vmem:[#allocation3 + $0xf98] sm:$0xf0]  ;;  %v5617_v52 = vpop.f32.mrf.mxu1 }
 0x2be   :  { %5836 = vmatpush.bf16.msra.mxu2 %v7683_v5  ;;  %v9993_v50 = vld [vmem:[#allocation3 + $0xe8c] sm:$0xf]  ;;  %v8131_v30 = vor.u32 %v9961_v37, %v8128_v22  ;;  %v7984_v58 = vld [vmem:[#allocation3 + $0xc78] sm:$0xf0] }
 0x2bf   :  { %5849 = vmatpush.bf16.msra.mxu3 %v7811_v7  ;;  %5811 = vmatmul.bf16.vlgmr.msra.gmra.mxu0 %v10531_v3  ;;  %v8000_v3 = vld [vmem:[#allocation3 + $0xc98] sm:$0xf0]  ;;  %v9925_v54 = vld [vmem:[#allocation3 + $0xc6c] sm:$0xf] }
 0x2c0   :  { %5855 = vmatpush.bf16.msrb.mxu0 %v8051_v11  ;;  %5824 = vmatmul.bf16.vlgmr.msra.gmra.mxu1 %v10535_v14  ;;  %v10025_v14 = vld [vmem:[#allocation3 + $0xf8c] sm:$0xf]  ;;  %v8003_v48 = vor.u32 %v9929_v47, %v8000_v3  ;;  %v8112_v18 = vld [vmem:[#allocation3 + $0xd78] sm:$0xf0]  ;;  %v7987_v5 = vor.u32 %v9925_v54, %v7984_v58 }
 0x2c1   :  { %5868 = vmatpush.bf16.msrb.mxu1 %v8179_v12  ;;  %5837 = vmatmul.bf16.vlgmr.msra.gmra.mxu2 %v10533_v8  ;;  %v8256_v8 = vld [vmem:[#allocation3 + $0xe98] sm:$0xf0]  ;;  %v9957_v57 = vld [vmem:[#allocation3 + $0xd6c] sm:$0xf]  ;;  %v8387_v32 = vor.u32 %v10025_v14, %v8384_v51 }
 0x2c2   :  { %5881 = vmatpush.bf16.msrb.mxu2 %v8307_v28  ;;  %5850 = vmatmul.bf16.vlgmr.msra.gmra.mxu3 %v10537_v15  ;;  %v5605_v15 = vadd.f32 %v5604_v29, %v10684_v39  ;;  %v8259_v53 = vor.u32 %v9993_v50, %v8256_v8  ;;  %v9989_v59 = vld [vmem:[#allocation3 + $0xe6c] sm:$0xf]  ;;  %v8240_v4 = vld [vmem:[#allocation3 + $0xe78] sm:$0xf0]  ;;  %v8115_v39 = vor.u32 %v9957_v57, %v8112_v18 }
 0x2c3   :  { %5894 = vmatpush.bf16.msrb.mxu3 %v8435_v25  ;;  %v10021_v61 = vld [vmem:[#allocation3 + $0xf6c] sm:$0xf]  ;;  %v8368_v63 = vld [vmem:[#allocation3 + $0xf78] sm:$0xf0]  ;;  %v8243_v6 = vor.u32 %v9989_v59, %v8240_v4 }
 0x2c4   :  { %5856 = vmatpush.bf16.msrb.mxu0 %v8035_v42  ;;  %v5618_v36 = vadd.f32 %v5617_v52, %v5605_v15  ;;  %v9921_v62 = vld [vmem:[#allocation3 + $0xc4c] sm:$0xf]  ;;  %v7968_v7 = vld [vmem:[#allocation3 + $0xc58] sm:$0xf0]  ;;  %v8371_v12 = vor.u32 %v10021_v61, %v8368_v63  ;;  %v5630_v28 = vpop.f32.mrf.mxu2  ;;  %v5606_v38 = vpop.f32.mrf.mxu0 }
 0x2c5   :  { %5869 = vmatpush.bf16.msrb.mxu1 %v8163_v17  ;;  %v9953_v11 = vld [vmem:[#allocation3 + $0xd4c] sm:$0xf]  ;;  %v8096_v19 = vld [vmem:[#allocation3 + $0xd58] sm:$0xf0]  ;;  %v5643_v33 = vpop.f32.mrf.mxu3  ;;  %v7971_v44 = vor.u32 %v9921_v62, %v7968_v7  ;;  %v5619_v42 = vpop.f32.mrf.mxu1 }
 0x2c6   :  { %5882 = vmatpush.bf16.msrb.mxu2 %v8291_v31  ;;  %v9985_v16 = vld [vmem:[#allocation3 + $0xe4c] sm:$0xf]  ;;  %v8224_v20 = vld [vmem:[#allocation3 + $0xe58] sm:$0xf0]  ;;  %v5631_v25 = vadd.f32 %v5630_v28, %v5618_v36  ;;  %v8099_v31 = vor.u32 %v9953_v11, %v8096_v19 }
 0x2c7   :  { %5895 = vmatpush.bf16.msrb.mxu3 %v8419_v41  ;;  %v10017_v34 = vld [vmem:[#allocation3 + $0xf4c] sm:$0xf]  ;;  %v8352_v49 = vld [vmem:[#allocation3 + $0xf58] sm:$0xf0]  ;;  %v8227_v40 = vor.u32 %v9985_v16, %v8224_v20 }
 0x2c8   :  { %5857 = vmatpush.bf16.msrb.mxu0 %v8019_v27  ;;  %v10691_v17 = vadd.f32 %v5643_v33, %v5631_v25  ;;  %v9917_v23 = vld [vmem:[#allocation3 + $0xc2c] sm:$0xf]  ;;  %v7952_v0 = vld [vmem:[#allocation3 + $0xc38] sm:$0xf0]  ;;  %v8355_v24 = vor.u32 %v10017_v34, %v8352_v49 }
 0x2c9   :  { %5870 = vmatpush.bf16.msrb.mxu1 %v8147_v46  ;;  %v9949_v41 = vld [vmem:[#allocation3 + $0xd2c] sm:$0xf]  ;;  %v8080_v43 = vld [vmem:[#allocation3 + $0xd38] sm:$0xf0]  ;;  %v7955_v46 = vor.u32 %v9917_v23, %v7952_v0 }
 0x2ca   :  { %5883 = vmatpush.bf16.msrb.mxu2 %v8275_v21  ;;  %v9981_v26 = vld [vmem:[#allocation3 + $0xe2c] sm:$0xf]  ;;  %v8208_v55 = vld [vmem:[#allocation3 + $0xe38] sm:$0xf0]  ;;  %v8083_v3 = vor.u32 %v9949_v41, %v8080_v43 }
 0x2cb   :  { %5896 = vmatpush.bf16.msrb.mxu3 %v8403_v56  ;;  %v10013_v45 = vld [vmem:[#allocation3 + $0xf2c] sm:$0xf]  ;;  %v8336_v27 = vld [vmem:[#allocation3 + $0xf38] sm:$0xf0]  ;;  %v8211_v37 = vor.u32 %v9981_v26, %v8208_v55 }
 0x2cc   :  { %5858 = vmatpush.bf16.msrb.mxu0 %v8003_v48  ;;  %v9913_v21 = vld [vmem:[#allocation3 + $0xc0c] sm:$0xf]  ;;  %v7936_v47 = vld [vmem:[#allocation3 + $0xc18] sm:$0xf0]  ;;  %v8339_v8 = vor.u32 %v10013_v45, %v8336_v27  ;;  %v5632_v15 = vpop.f32.mrf.mxu2 }
 0x2cd   :  { %5871 = vmatpush.bf16.msrb.mxu1 %v8131_v30  ;;  %v9945_v56 = vld [vmem:[#allocation3 + $0xd0c] sm:$0xf]  ;;  %v8064_v22 = vld [vmem:[#allocation3 + $0xd18] sm:$0xf0]  ;;  %v7939_v54 = vor.u32 %v9913_v21, %v7936_v47 }
 0x2ce   :  { %5884 = vmatpush.bf16.msrb.mxu2 %v8259_v53  ;;  %v9977_v50 = vld [vmem:[#allocation3 + $0xe0c] sm:$0xf]  ;;  %v8192_v29 = vld [vmem:[#allocation3 + $0xe18] sm:$0xf0]  ;;  %v5645_v53 = vpop.f32.mrf.mxu3  ;;  %v8067_v36 = vor.u32 %v9945_v56, %v8064_v22 }
 0x2cf   :  { %5897 = vmatpush.bf16.msrb.mxu3 %v8387_v32  ;;  %v10009_v14 = vld [vmem:[#allocation3 + $0xf0c] sm:$0xf]  ;;  %v8320_v51 = vld [vmem:[#allocation3 + $0xf18] sm:$0xf0]  ;;  %v8195_v18 = vor.u32 %v9977_v50, %v8192_v29 }
 0x2d0   :  { %5859 = vmatpush.bf16.msrb.mxu0 %v7987_v5  ;;  %v10069_v48 = vld [vmem:[#allocation3 + $0x10ec] sm:$0xf]  ;;  %v8560_v52 = vld [vmem:[#allocation3 + $0x10f8] sm:$0xf0]  ;;  %v8323_v61 = vor.u32 %v10009_v14, %v8320_v51 }
 0x2d1   :  { %5872 = vmatpush.bf16.msrb.mxu1 %v8115_v39  ;;  %v10101_v30 = vld [vmem:[#allocation3 + $0x11ec] sm:$0xf]  ;;  %v8688_v58 = vld [vmem:[#allocation3 + $0x11f8] sm:$0xf0]  ;;  %v8563_v63 = vor.u32 %v10069_v48, %v8560_v52 }
 0x2d2   :  { %5885 = vmatpush.bf16.msrb.mxu2 %v8243_v6  ;;  %v10133_v57 = vld [vmem:[#allocation3 + $0x12ec] sm:$0xf]  ;;  %v8816_v32 = vld [vmem:[#allocation3 + $0x12f8] sm:$0xf0]  ;;  %v8691_v5 = vor.u32 %v10101_v30, %v8688_v58 }
 0x2d3   :  { %5898 = vmatpush.bf16.msrb.mxu3 %v8371_v12  ;;  %v10165_v59 = vld [vmem:[#allocation3 + $0x13ec] sm:$0xf]  ;;  %v8944_v4 = vld [vmem:[#allocation3 + $0x13f8] sm:$0xf0]  ;;  %v8819_v39 = vor.u32 %v10133_v57, %v8816_v32 }
 0x2d4   :  { %5860 = vmatpush.bf16.msrb.mxu0 %v7971_v44  ;;  %v10065_v6 = vld [vmem:[#allocation3 + $0x10cc] sm:$0xf]  ;;  %v8544_v62 = vld [vmem:[#allocation3 + $0x10d8] sm:$0xf0]  ;;  %v8947_v11 = vor.u32 %v10165_v59, %v8944_v4 }
 0x2d5   :  { %5873 = vmatpush.bf16.msrb.mxu1 %v8099_v31  ;;  %v10097_v7 = vld [vmem:[#allocation3 + $0x11cc] sm:$0xf]  ;;  %v8672_v12 = vld [vmem:[#allocation3 + $0x11d8] sm:$0xf0]  ;;  %v8547_v25 = vor.u32 %v10065_v6, %v8544_v62 }
 0x2d6   :  { %5886 = vmatpush.bf16.msrb.mxu2 %v8227_v40  ;;  %v10129_v28 = vld [vmem:[#allocation3 + $0x12cc] sm:$0xf]  ;;  %v8800_v19 = vld [vmem:[#allocation3 + $0x12d8] sm:$0xf0]  ;;  %v8675_v33 = vor.u32 %v10097_v7, %v8672_v12 }
 0x2d7   :  { %5899 = vmatpush.bf16.msrb.mxu3 %v8355_v24  ;;  %v10161_v16 = vld [vmem:[#allocation3 + $0x13cc] sm:$0xf]  ;;  %v8928_v20 = vld [vmem:[#allocation3 + $0x13d8] sm:$0xf0]  ;;  %v8803_v34 = vor.u32 %v10129_v28, %v8800_v19 }
 0x2d8   :  { %5861 = vmatpush.bf16.msrb.mxu0 %v7955_v46  ;;  %v10061_v49 = vld [vmem:[#allocation3 + $0x10ac] sm:$0xf]  ;;  %v8528_v38 = vld [vmem:[#allocation3 + $0x10b8] sm:$0xf0]  ;;  %v8931_v42 = vor.u32 %v10161_v16, %v8928_v20 }
 0x2d9   :  { %5874 = vmatpush.bf16.msrb.mxu1 %v8083_v3  ;;  %v10093_v44 = vld [vmem:[#allocation3 + $0x11ac] sm:$0xf]  ;;  %v8656_v31 = vld [vmem:[#allocation3 + $0x11b8] sm:$0xf0]  ;;  %v8531_v24 = vor.u32 %v10061_v49, %v8528_v38 }
 0x2da   :  { %5887 = vmatpush.bf16.msrb.mxu2 %v8211_v37  ;;  %v10125_v40 = vld [vmem:[#allocation3 + $0x12ac] sm:$0xf]  ;;  %v8784_v23 = vld [vmem:[#allocation3 + $0x12b8] sm:$0xf0]  ;;  %v8659_v43 = vor.u32 %v10093_v44, %v8656_v31 }
 0x2db   :  { %5900 = vmatpush.bf16.msrb.mxu3 %v8339_v8  ;;  %v10157_v0 = vld [vmem:[#allocation3 + $0x13ac] sm:$0xf]  ;;  %v8912_v41 = vld [vmem:[#allocation3 + $0x13b8] sm:$0xf0]  ;;  %v8787_v26 = vor.u32 %v10125_v40, %v8784_v23 }
 0x2dc   :  { %5862 = vmatpush.bf16.msrb.mxu0 %v7939_v54  ;;  %v10057_v55 = vld [vmem:[#allocation3 + $0x108c] sm:$0xf]  ;;  %v8915_v27 = vor.u32 %v10157_v0, %v8912_v41  ;;  %v8640_v46 = vld [vmem:[#allocation3 + $0x1198] sm:$0xf0]  ;;  %v5656_v47 = vpop.f32.mrf.mxu0 }
 0x2dd   :  { %5875 = vmatpush.bf16.msrb.mxu1 %v8067_v36  ;;  %v10089_v45 = vld [vmem:[#allocation3 + $0x118c] sm:$0xf]  ;;  %v8896_v3 = vld [vmem:[#allocation3 + $0x1398] sm:$0xf0]  ;;  %v5669_v56 = vpop.f32.mrf.mxu1 }
 0x2de   :  { %5888 = vmatpush.bf16.msrb.mxu2 %v8195_v18  ;;  %v10121_v21 = vld [vmem:[#allocation3 + $0x128c] sm:$0xf]  ;;  %v8643_v22 = vor.u32 %v10089_v45, %v8640_v46  ;;  %v8496_v29 = vld [vmem:[#allocation3 + $0x1078] sm:$0xf0] }
 0x2df   :  { %5901 = vmatpush.bf16.msrb.mxu3 %v8323_v61  ;;  %5863 = vmatmul.bf16.vlgmr.msrb.gmra.mxu0 %v10546_v60  ;;  %v8512_v60 = vld [vmem:[#allocation3 + $0x1098] sm:$0xf0]  ;;  %v10053_v8 = vld [vmem:[#allocation3 + $0x106c] sm:$0xf] }
 0x2e0   :  { %5907 = vmatpush.bf16.msra.mxu0 %v8563_v63  ;;  %5876 = vmatmul.bf16.vlgmr.msrb.gmra.mxu1 %v10550_v9  ;;  %v10153_v9 = vld [vmem:[#allocation3 + $0x138c] sm:$0xf]  ;;  %v8515_v37 = vor.u32 %v10057_v55, %v8512_v60  ;;  %v8624_v48 = vld [vmem:[#allocation3 + $0x1178] sm:$0xf0]  ;;  %v8499_v58 = vor.u32 %v10053_v8, %v8496_v29 }
 0x2e1   :  { %5920 = vmatpush.bf16.msra.mxu1 %v8691_v5  ;;  %5889 = vmatmul.bf16.vlgmr.msrb.gmra.mxu2 %v10548_v1  ;;  %v8768_v1 = vld [vmem:[#allocation3 + $0x1298] sm:$0xf0]  ;;  %v10085_v14 = vld [vmem:[#allocation3 + $0x116c] sm:$0xf]  ;;  %v8899_v51 = vor.u32 %v10153_v9, %v8896_v3 }
 0x2e2   :  { %5933 = vmatpush.bf16.msra.mxu2 %v8819_v39  ;;  %5902 = vmatmul.bf16.vlgmr.msrb.gmra.mxu3 %v10552_v10  ;;  %v5657_v10 = vadd.f32 %v5656_v47, %v10691_v17  ;;  %v8771_v50 = vor.u32 %v10121_v21, %v8768_v1  ;;  %v10117_v52 = vld [vmem:[#allocation3 + $0x126c] sm:$0xf]  ;;  %v8752_v30 = vld [vmem:[#allocation3 + $0x1278] sm:$0xf0]  ;;  %v8627_v17 = vor.u32 %v10085_v14, %v8624_v48 }
 0x2e3   :  { %5946 = vmatpush.bf16.msra.mxu3 %v8947_v11  ;;  %v10149_v53 = vld [vmem:[#allocation3 + $0x136c] sm:$0xf]  ;;  %v8880_v54 = vld [vmem:[#allocation3 + $0x1378] sm:$0xf0]  ;;  %v8755_v57 = vor.u32 %v10117_v52, %v8752_v30 }
 0x2e4   :  { %5908 = vmatpush.bf16.msra.mxu0 %v8547_v25  ;;  %v5670_v15 = vadd.f32 %v5669_v56, %v5657_v10  ;;  %v10049_v32 = vld [vmem:[#allocation3 + $0x104c] sm:$0xf]  ;;  %v8480_v36 = vld [vmem:[#allocation3 + $0x1058] sm:$0xf0]  ;;  %v8883_v59 = vor.u32 %v10149_v53, %v8880_v54  ;;  %v5682_v4 = vpop.f32.mrf.mxu2  ;;  %v5658_v11 = vpop.f32.mrf.mxu0 }
 0x2e5   :  { %5921 = vmatpush.bf16.msra.mxu1 %v8675_v33  ;;  %v10081_v18 = vld [vmem:[#allocation3 + $0x114c] sm:$0xf]  ;;  %v8608_v61 = vld [vmem:[#allocation3 + $0x1158] sm:$0xf0]  ;;  %v5695_v6 = vpop.f32.mrf.mxu3  ;;  %v8483_v12 = vor.u32 %v10049_v32, %v8480_v36  ;;  %v5671_v28 = vpop.f32.mrf.mxu1 }
 0x2e6   :  { %5934 = vmatpush.bf16.msra.mxu2 %v8803_v34  ;;  %v10113_v63 = vld [vmem:[#allocation3 + $0x124c] sm:$0xf]  ;;  %v8736_v5 = vld [vmem:[#allocation3 + $0x1258] sm:$0xf0]  ;;  %v5683_v39 = vadd.f32 %v5682_v4, %v5670_v15  ;;  %v8611_v16 = vor.u32 %v10081_v18, %v8608_v61 }
 0x2e7   :  { %5947 = vmatpush.bf16.msra.mxu3 %v8931_v42  ;;  %v10145_v62 = vld [vmem:[#allocation3 + $0x134c] sm:$0xf]  ;;  %v8864_v7 = vld [vmem:[#allocation3 + $0x1358] sm:$0xf0]  ;;  %v8739_v20 = vor.u32 %v10113_v63, %v8736_v5 }
 0x2e8   :  { %5909 = vmatpush.bf16.msra.mxu0 %v8531_v24  ;;  %v10698_v19 = vadd.f32 %v5695_v6, %v5683_v39  ;;  %v10045_v25 = vld [vmem:[#allocation3 + $0x102c] sm:$0xf]  ;;  %v8464_v33 = vld [vmem:[#allocation3 + $0x1038] sm:$0xf0]  ;;  %v8867_v49 = vor.u32 %v10145_v62, %v8864_v7 }
 0x2e9   :  { %5922 = vmatpush.bf16.msra.mxu1 %v8659_v43  ;;  %v10077_v34 = vld [vmem:[#allocation3 + $0x112c] sm:$0xf]  ;;  %v8592_v38 = vld [vmem:[#allocation3 + $0x1138] sm:$0xf0]  ;;  %v8467_v23 = vor.u32 %v10045_v25, %v8464_v33 }
 0x2ea   :  { %5935 = vmatpush.bf16.msra.mxu2 %v8787_v26  ;;  %v10109_v44 = vld [vmem:[#allocation3 + $0x122c] sm:$0xf]  ;;  %v8720_v42 = vld [vmem:[#allocation3 + $0x1238] sm:$0xf0]  ;;  %v8595_v24 = vor.u32 %v10077_v34, %v8592_v38 }
 0x2eb   :  { %5948 = vmatpush.bf16.msra.mxu3 %v8915_v27  ;;  %v10141_v31 = vld [vmem:[#allocation3 + $0x132c] sm:$0xf]  ;;  %v8848_v40 = vld [vmem:[#allocation3 + $0x1338] sm:$0xf0]  ;;  %v8723_v43 = vor.u32 %v10109_v44, %v8720_v42 }
 0x2ec   :  { %5910 = vmatpush.bf16.msra.mxu0 %v8515_v37  ;;  %v10041_v0 = vld [vmem:[#allocation3 + $0x100c] sm:$0xf]  ;;  %v8448_v41 = vld [vmem:[#allocation3 + $0x1018] sm:$0xf0]  ;;  %v8851_v45 = vor.u32 %v10141_v31, %v8848_v40  ;;  %v5684_v1 = vpop.f32.mrf.mxu2 }
 0x2ed   :  { %5923 = vmatpush.bf16.msra.mxu1 %v8643_v22  ;;  %v10073_v26 = vld [vmem:[#allocation3 + $0x110c] sm:$0xf]  ;;  %v8576_v55 = vld [vmem:[#allocation3 + $0x1118] sm:$0xf0]  ;;  %v5697_v10 = vpop.f32.mrf.mxu3  ;;  %v8451_v37 = vor.u32 %v10041_v0, %v8448_v41 }
 0x2ee   :  { %5936 = vmatpush.bf16.msra.mxu2 %v8771_v50  ;;  %v10105_v60 = vld [vmem:[#allocation3 + $0x120c] sm:$0xf]  ;;  %v8704_v27 = vld [vmem:[#allocation3 + $0x1218] sm:$0xf0]  ;;  %v8579_v8 = vor.u32 %v10073_v26, %v8576_v55 }
 0x2ef   :  { %5949 = vmatpush.bf16.msra.mxu3 %v8899_v51  ;;  %v10137_v46 = vld [vmem:[#allocation3 + $0x130c] sm:$0xf]  ;;  %v8832_v21 = vld [vmem:[#allocation3 + $0x1318] sm:$0xf0]  ;;  %v8707_v29 = vor.u32 %v10105_v60, %v8704_v27 }
 0x2f0   :  { %5911 = vmatpush.bf16.msra.mxu0 %v8499_v58  ;;  %v10197_v47 = vld [vmem:[#allocation3 + $0x14ec] sm:$0xf]  ;;  %v9072_v9 = vld [vmem:[#allocation3 + $0x14f8] sm:$0xf0]  ;;  %v8835_v15 = vor.u32 %v10137_v46, %v8832_v21 }
 0x2f1   :  { %5924 = vmatpush.bf16.msra.mxu1 %v8627_v17  ;;  %v10229_v3 = vld [vmem:[#allocation3 + $0x15ec] sm:$0xf]  ;;  %v9200_v56 = vld [vmem:[#allocation3 + $0x15f8] sm:$0xf0]  ;;  %v9075_v48 = vor.u32 %v10197_v47, %v9072_v9 }
 0x2f2   :  { %5937 = vmatpush.bf16.msra.mxu2 %v8755_v57  ;;  %v10261_v22 = vld [vmem:[#allocation3 + $0x16ec] sm:$0xf]  ;;  %v9328_v50 = vld [vmem:[#allocation3 + $0x16f8] sm:$0xf0]  ;;  %v9203_v52 = vor.u32 %v10229_v3, %v9200_v56 }
 0x2f3   :  { %5950 = vmatpush.bf16.msra.mxu3 %v8883_v59  ;;  %v10293_v14 = vld [vmem:[#allocation3 + $0x17ec] sm:$0xf]  ;;  %v9456_v51 = vld [vmem:[#allocation3 + $0x17f8] sm:$0xf0]  ;;  %v9331_v30 = vor.u32 %v10261_v22, %v9328_v50 }
 0x2f4   :  { %5912 = vmatpush.bf16.msra.mxu0 %v8483_v12  ;;  %v10193_v53 = vld [vmem:[#allocation3 + $0x14cc] sm:$0xf]  ;;  %v9056_v54 = vld [vmem:[#allocation3 + $0x14d8] sm:$0xf0]  ;;  %v9459_v17 = vor.u32 %v10293_v14, %v9456_v51 }
 0x2f5   :  { %5925 = vmatpush.bf16.msra.mxu1 %v8611_v16  ;;  %v10225_v58 = vld [vmem:[#allocation3 + $0x15cc] sm:$0xf]  ;;  %v9184_v57 = vld [vmem:[#allocation3 + $0x15d8] sm:$0xf0]  ;;  %v9059_v4 = vor.u32 %v10193_v53, %v9056_v54 }
 0x2f6   :  { %5938 = vmatpush.bf16.msra.mxu2 %v8739_v20  ;;  %v10257_v32 = vld [vmem:[#allocation3 + $0x16cc] sm:$0xf]  ;;  %v9312_v36 = vld [vmem:[#allocation3 + $0x16d8] sm:$0xf0]  ;;  %v9187_v61 = vor.u32 %v10225_v58, %v9184_v57 }
 0x2f7   :  { %5951 = vmatpush.bf16.msra.mxu3 %v8867_v49  ;;  %v10289_v18 = vld [vmem:[#allocation3 + $0x17cc] sm:$0xf]  ;;  %v9440_v59 = vld [vmem:[#allocation3 + $0x17d8] sm:$0xf0]  ;;  %v9315_v63 = vor.u32 %v10257_v32, %v9312_v36 }
 0x2f8   :  { %5913 = vmatpush.bf16.msra.mxu0 %v8467_v23  ;;  %v10189_v5 = vld [vmem:[#allocation3 + $0x14ac] sm:$0xf]  ;;  %v9040_v39 = vld [vmem:[#allocation3 + $0x14b8] sm:$0xf0]  ;;  %v9443_v62 = vor.u32 %v10289_v18, %v9440_v59 }
 0x2f9   :  { %5926 = vmatpush.bf16.msra.mxu1 %v8595_v24  ;;  %v10221_v6 = vld [vmem:[#allocation3 + $0x15ac] sm:$0xf]  ;;  %v9168_v7 = vld [vmem:[#allocation3 + $0x15b8] sm:$0xf0]  ;;  %v9043_v33 = vor.u32 %v10189_v5, %v9040_v39 }
 0x2fa   :  { %5939 = vmatpush.bf16.msra.mxu2 %v8723_v43  ;;  %v10253_v11 = vld [vmem:[#allocation3 + $0x16ac] sm:$0xf]  ;;  %v9296_v12 = vld [vmem:[#allocation3 + $0x16b8] sm:$0xf0]  ;;  %v9171_v34 = vor.u32 %v10221_v6, %v9168_v7 }
 0x2fb   :  { %5952 = vmatpush.bf16.msra.mxu3 %v8851_v45  ;;  %v10337_v28 = vld.sshfl [vmem:[#allocation1 + $0x10] sm:$0xff pattern:$0x73625140]  ;;  %v9424_v20 = vld [vmem:[#allocation3 + $0x17b8] sm:$0xf0]  ;;  %v9299_v49 = vor.u32 %v10253_v11, %v9296_v12 }
 0x2fc   :  { %5914 = vmatpush.bf16.msra.mxu0 %v8451_v37  ;;  %v10285_v16 = vld [vmem:[#allocation3 + $0x17ac] sm:$0xf]  ;;  %v10338_v25 = vld.sshfl [vmem:[#allocation1 + $0x18] sm:$0xff pattern:$0x73625140]  ;;  %v5708_v24 = vpop.f32.mrf.mxu0 }
 0x2fd   :  { %5927 = vmatpush.bf16.msra.mxu1 %v8579_v8  ;;  %v10185_v38 = vld [vmem:[#allocation3 + $0x148c] sm:$0xf]  ;;  %v9427_v42 = vor.u32 %v10285_v16, %v9424_v20  ;;  %v9152_v31 = vld [vmem:[#allocation3 + $0x1598] sm:$0xf0]  ;;  %v5721_v27 = vpop.f32.mrf.mxu1 }
 0x2fe   :  { %5940 = vmatpush.bf16.msra.mxu2 %v8707_v29  ;;  %v10217_v44 = vld [vmem:[#allocation3 + $0x158c] sm:$0xf]  ;;  %v9280_v23 = vld [vmem:[#allocation3 + $0x1698] sm:$0xf0]  ;;  %v5722_v9 = vadd.f32 %v5721_v27, %v5708_v24  ;;  %v9520_v24 = vld [vmem:[#allocation8 + $0x78] sm:$0xf0] }
 0x2ff   :  { %5953 = vmatpush.bf16.msra.mxu3 %v8835_v15  ;;  %5915 = vmatmul.bf16.vlgmr.msra.gmra.mxu0 %v10594_v2  ;;  %v9024_v2 = vld [vmem:[#allocation3 + $0x1498] sm:$0xf0]  ;;  %v10249_v40 = vld [vmem:[#allocation3 + $0x168c] sm:$0xf]  ;;  %v9155_v43 = vor.u32 %v10217_v44, %v9152_v31  ;;  %v10310_v27 = vld [vmem:[#allocation8 + $0x6c] sm:$0xf0] }
 0x300   :  { %5959 = vmatpush.bf16.msrb.mxu0 %v9075_v48  ;;  %5928 = vmatmul.bf16.vlgmr.msra.gmra.mxu1 %v10597_v13  ;;  %v10281_v0 = vld [vmem:[#allocation3 + $0x178c] sm:$0xf]  ;;  %v9408_v13 = vld [vmem:[#allocation3 + $0x1798] sm:$0xf0]  ;;  %v9027_v41 = vor.u32 %v10185_v38, %v9024_v2  ;;  %v9283_v26 = vor.u32 %v10249_v40, %v9280_v23 }
 0x301   :  { %5972 = vmatpush.bf16.msrb.mxu1 %v9203_v52  ;;  %5941 = vmatmul.bf16.vlgmr.msra.gmra.mxu2 %v10337_v28  ;;  %v10181_v55 = vld [vmem:[#allocation3 + $0x146c] sm:$0xf]  ;;  %v9008_v60 = vld [vmem:[#allocation3 + $0x1478] sm:$0xf0]  ;;  %v9411_v46 = vor.u32 %v10281_v0, %v9408_v13 }
 0x302   :  { %5985 = vmatpush.bf16.msrb.mxu2 %v9331_v30  ;;  %5954 = vmatmul.bf16.vlgmr.msra.gmra.mxu3 %v10338_v25  ;;  %v10213_v45 = vld [vmem:[#allocation3 + $0x156c] sm:$0xf]  ;;  %v9136_v21 = vld [vmem:[#allocation3 + $0x1578] sm:$0xf0]  ;;  %v9011_v37 = vor.u32 %v10181_v55, %v9008_v60 }
 0x303   :  { %5998 = vmatpush.bf16.msrb.mxu3 %v9459_v17  ;;  %v10245_v1 = vld [vmem:[#allocation3 + $0x166c] sm:$0xf]  ;;  %v9264_v47 = vld [vmem:[#allocation3 + $0x1678] sm:$0xf0]  ;;  %v9139_v56 = vor.u32 %v10213_v45, %v9136_v21  ;;  %v9510_v45 = vld [vmem:[#allocation8 + $0x60] sm:$0xf] }
 0x304   :  { %5960 = vmatpush.bf16.msrb.mxu0 %v9059_v4  ;;  %v10277_v3 = vld [vmem:[#allocation3 + $0x176c] sm:$0xf]  ;;  %v9392_v10 = vld [vmem:[#allocation3 + $0x1778] sm:$0xf0]  ;;  %v9267_v22 = vor.u32 %v10245_v1, %v9264_v47  ;;  %v5734_v14 = vpop.f32.mrf.mxu2  ;;  %v5710_v32 = vpop.f32.mrf.mxu0 }
 0x305   :  { %5973 = vmatpush.bf16.msrb.mxu1 %v9187_v61  ;;  %v10177_v50 = vld [vmem:[#allocation3 + $0x144c] sm:$0xf]  ;;  %v8992_v8 = vld [vmem:[#allocation3 + $0x1458] sm:$0xf0]  ;;  %v9395_v51 = vor.u32 %v10277_v3, %v9392_v10  ;;  %v5735_v30 = vadd.f32 %v5734_v14, %v5722_v9  ;;  %v5747_v53 = vpop.f32.mrf.mxu3  ;;  %v10305_v3 = vld [vmem:[#allocation8 + $0x4c] sm:$0xf] }
 0x306   :  { %5986 = vmatpush.bf16.msrb.mxu2 %v9315_v63  ;;  %v10209_v29 = vld [vmem:[#allocation3 + $0x154c] sm:$0xf]  ;;  %v9120_v15 = vld [vmem:[#allocation3 + $0x1558] sm:$0xf0]  ;;  %v8995_v17 = vor.u32 %v10177_v50, %v8992_v8  ;;  %v5723_v63 = vpop.f32.mrf.mxu1  ;;  %v9504_v10 = vld [vmem:[#allocation8 + $0x58] sm:$0xf0] }
 0x307   :  { %5999 = vmatpush.bf16.msrb.mxu3 %v9443_v62  ;;  %v10241_v48 = vld [vmem:[#allocation3 + $0x164c] sm:$0xf]  ;;  %v9248_v52 = vld [vmem:[#allocation3 + $0x1658] sm:$0xf0]  ;;  %v10702_v57 = vadd.f32 %v5747_v53, %v5735_v30  ;;  %v9123_v36 = vor.u32 %v10209_v29, %v9120_v15  ;;  %v9494_v50 = vld [vmem:[#allocation8 + $0x40] sm:$0xf] }
 0x308   :  { %5961 = vmatpush.bf16.msrb.mxu0 %v9043_v33  ;;  %v10273_v54 = vld [vmem:[#allocation3 + $0x174c] sm:$0xf]  ;;  %v9376_v58 = vld [vmem:[#allocation3 + $0x1758] sm:$0xf0]  ;;  %v9251_v18 = vor.u32 %v10241_v48, %v9248_v52  ;;  %v10306_v8 = vld [vmem:[#allocation8 + $0x4c] sm:$0xf0] }
 0x309   :  { %5974 = vmatpush.bf16.msrb.mxu1 %v9171_v34  ;;  %v10173_v59 = vld [vmem:[#allocation3 + $0x142c] sm:$0xf]  ;;  %v8976_v4 = vld [vmem:[#allocation3 + $0x1438] sm:$0xf0]  ;;  %v9379_v5 = vor.u32 %v10273_v54, %v9376_v58  ;;  %v10301_v54 = vld [vmem:[#allocation8 + $0x2c] sm:$0xf]  ;;  %v9495_v32 = vor.u32 %v10306_v8, %v9494_v50 }
 0x30a   :  { %5987 = vmatpush.bf16.msrb.mxu2 %v9299_v49  ;;  %v10205_v61 = vld [vmem:[#allocation3 + $0x152c] sm:$0xf]  ;;  %v9104_v39 = vld [vmem:[#allocation3 + $0x1538] sm:$0xf0]  ;;  %v8979_v12 = vor.u32 %v10173_v59, %v8976_v4  ;;  %v9488_v58 = vld [vmem:[#allocation8 + $0x38] sm:$0xf0] }
 0x30b   :  { %6000 = vmatpush.bf16.msrb.mxu3 %v9427_v42  ;;  %v10237_v6 = vld [vmem:[#allocation3 + $0x162c] sm:$0xf]  ;;  %v9232_v62 = vld [vmem:[#allocation3 + $0x1638] sm:$0xf0]  ;;  %v9107_v16 = vor.u32 %v10205_v61, %v9104_v39  ;;  %v9478_v59 = vld [vmem:[#allocation8 + $0x20] sm:$0xf]  ;;  %v9491_v63 = vor.u32 %v10301_v54, %v9488_v58 }
 0x30c   :  { %5962 = vmatpush.bf16.msrb.mxu0 %v9027_v41  ;;  %v10269_v7 = vld [vmem:[#allocation3 + $0x172c] sm:$0xf]  ;;  %v9360_v11 = vld [vmem:[#allocation3 + $0x1738] sm:$0xf0]  ;;  %v9235_v20 = vor.u32 %v10237_v6, %v9232_v62  ;;  %v5736_v49 = vpop.f32.mrf.mxu2  ;;  %v10309_v41 = vld [vmem:[#allocation8 + $0x6c] sm:$0xf] }
 0x30d   :  { %5975 = vmatpush.bf16.msrb.mxu1 %v9155_v43  ;;  %v10169_v28 = vld [vmem:[#allocation3 + $0x140c] sm:$0xf]  ;;  %v8960_v25 = vld [vmem:[#allocation3 + $0x1418] sm:$0xf0]  ;;  %v9363_v38 = vor.u32 %v10269_v7, %v9360_v11  ;;  %v5749_v31 = vpop.f32.mrf.mxu3  ;;  %v9523_v21 = vor.u32 %v10309_v41, %v9520_v24  ;;  %v10302_v4 = vld [vmem:[#allocation8 + $0x2c] sm:$0xf0] }
 0x30e   :  { %5988 = vmatpush.bf16.msrb.mxu2 %v9283_v26  ;;  %v10201_v33 = vld [vmem:[#allocation3 + $0x150c] sm:$0xf]  ;;  %v9088_v34 = vld [vmem:[#allocation3 + $0x1518] sm:$0xf0]  ;;  %v8963_v13 = vor.u32 %v10169_v28, %v8960_v25  ;;  %v10297_v62 = vld [vmem:[#allocation8 + $0xc] sm:$0xf]  ;;  %v9479_v11 = vor.u32 %v10302_v4, %v9478_v59 }
 0x30f   :  { %6001 = vmatpush.bf16.msrb.mxu3 %v9411_v46  ;;  %v10233_v2 = vld [vmem:[#allocation3 + $0x160c] sm:$0xf]  ;;  %v9216_v44 = vld [vmem:[#allocation3 + $0x1618] sm:$0xf0]  ;;  %v9091_v43 = vor.u32 %v10201_v33, %v9088_v34  ;;  %v9472_v7 = vld [vmem:[#allocation8 + $0x18] sm:$0xf0] }
 0x310   :  { %5963 = vmatpush.bf16.msrb.mxu0 %v9011_v37  ;;  %v10265_v42 = vld [vmem:[#allocation3 + $0x170c] sm:$0xf]  ;;  %v9344_v40 = vld [vmem:[#allocation3 + $0x1718] sm:$0xf0]  ;;  %v9219_v26 = vor.u32 %v10233_v2, %v9216_v44  ;;  %v9511_v37 = vor.u32 %v10310_v27, %v9510_v45  ;;  %v10298_v25 = vld [vmem:[#allocation8 + $0xc] sm:$0xf0]  ;;  %v9475_v49 = vor.u32 %v10297_v62, %v9472_v7 }
 0x311   :  { %5976 = vmatpush.bf16.msrb.mxu1 %v9139_v56  ;;  %v9518_v23 = vld [vmem:[#allocation8 + $0x68] sm:$0xf]  ;;  %v10311_v0 = vld [vmem:[#allocation8 + $0x74] sm:$0xf0]  ;;  %v9347_v55 = vor.u32 %v10265_v42, %v9344_v40  ;;  %v10308_v46 = vld [vmem:[#allocation8 + $0x64] sm:$0xf] }
 0x312   :  { %5989 = vmatpush.bf16.msrb.mxu2 %v9267_v22  ;;  %v9519_v60 = vor.u32 %v10311_v0, %v9518_v23  ;;  %v9512_v1 = vld [vmem:[#allocation8 + $0x70] sm:$0xf0]  ;;  %v9502_v47 = vld [vmem:[#allocation8 + $0x48] sm:$0xf]  ;;  %v10307_v9 = vld [vmem:[#allocation8 + $0x54] sm:$0xf0] }
 0x313   :  { %6002 = vmatpush.bf16.msrb.mxu3 %v9395_v51  ;;  %v9515_v56 = vor.u32 %v10308_v46, %v9512_v1  ;;  %v9503_v22 = vor.u32 %v10307_v9, %v9502_v47  ;;  %v10304_v29 = vld [vmem:[#allocation8 + $0x44] sm:$0xf]  ;;  %v10339_v14 = vld.sshfl [vmem:[#allocation1 + $0x20] sm:$0xff pattern:$0x73625140]  ;;  %v9507_v51 = vor.u32 %v10305_v3, %v9504_v10 }
 0x314   :  { %5964 = vmatpush.bf16.msrb.mxu0 %v8995_v17  ;;  %v9496_v15 = vld [vmem:[#allocation8 + $0x50] sm:$0xf0]  ;;  %v9486_v48 = vld [vmem:[#allocation8 + $0x28] sm:$0xf]  ;;  %v10303_v52 = vld [vmem:[#allocation8 + $0x34] sm:$0xf0] }
 0x315   :  { %5977 = vmatpush.bf16.msrb.mxu1 %v9123_v36  ;;  %v10340_v30 = vld.sshfl [vmem:[#allocation1 + $0x28] sm:$0xff pattern:$0x73625140]  ;;  %v10341_v53 = vld.sshfl [vmem:[#allocation1 + $0x30] sm:$0xff pattern:$0x73625140]  ;;  %v9499_v36 = vor.u32 %v10304_v29, %v9496_v15 }
 0x316   :  { %5990 = vmatpush.bf16.msrb.mxu2 %v9251_v18  ;;  %v10342_v17 = vld.sshfl [vmem:[#allocation1 + $0x38] sm:$0xff pattern:$0x73625140]  ;;  %v9487_v18 = vor.u32 %v10303_v52, %v9486_v48  ;;  %v10300_v61 = vld [vmem:[#allocation8 + $0x24] sm:$0xf] }
 0x317   :  { %6003 = vmatpush.bf16.msrb.mxu3 %v9379_v5  ;;  %v9480_v5 = vld [vmem:[#allocation8 + $0x30] sm:$0xf0]  ;;  %v9470_v39 = vld [vmem:[#allocation8 + $0x8] sm:$0xf]  ;;  %v10299_v6 = vld [vmem:[#allocation8 + $0x14] sm:$0xf0] }
 0x318   :  { %5965 = vmatpush.bf16.msrb.mxu0 %v8979_v12  ;;  %v9483_v28 = vor.u32 %v10300_v61, %v9480_v5  ;;  %v9464_v2 = vld [vmem:[#allocation8 + $0x10] sm:$0xf0] }
 0x319   :  { %5978 = vmatpush.bf16.msrb.mxu1 %v9107_v16  ;;  %v9471_v16 = vor.u32 %v10299_v6, %v9470_v39 }
 0x31a   :  { %5991 = vmatpush.bf16.msrb.mxu2 %v9235_v20  ;;  %v9462_v20 = vld [vmem:[#allocation8] sm:$0xf] }
 0x31b   :  { %6004 = vmatpush.bf16.msrb.mxu3 %v9363_v38  ;;  %v10296_v38 = vld [vmem:[#allocation8 + $0x4] sm:$0xf]  ;;  %v9463_v42 = vor.u32 %v10298_v25, %v9462_v20 }
 0x31c   :  { %5966 = vmatpush.bf16.msrb.mxu0 %v8963_v13  ;;  %v5760_v12 = vpop.f32.mrf.mxu0  ;;  %v9467_v31 = vor.u32 %v10296_v38, %v9464_v2  ;;  %v6045_v13 = vld [vmem:[#allocation7] sm:$0x1] }
 0x31d   :  { %5979 = vmatpush.bf16.msrb.mxu1 %v9091_v43  ;;  %v5761_v33 = vadd.f32 %v5760_v12, %v10702_v57  ;;  %v5773_v34 = vpop.f32.mrf.mxu1 }
 0x31e   :  { %5992 = vmatpush.bf16.msrb.mxu2 %v9219_v26 }
 0x31f   :  { %6005 = vmatpush.bf16.msrb.mxu3 %v9347_v55  ;;  %5967 = vmatmul.bf16.vlgmr.msrb.gmra.mxu0 %v10339_v14  ;;  %v5774_v44 = vadd.f32 %v5773_v34, %v5761_v33 }
 0x320   :  { %5980 = vmatmul.bf16.vlgmr.msrb.gmra.mxu1 %v10340_v30  ;;  %6150 = vmatpush.bf16.msra.mxu0 %v9511_v37 }
 0x321   :  { %5993 = vmatmul.bf16.vlgmr.msrb.gmra.mxu2 %v10341_v53  ;;  %6163 = vmatpush.bf16.msra.mxu1 %v9515_v56 }
 0x322   :  { %6176 = vmatpush.bf16.msra.mxu2 %v9519_v60  ;;  %6006 = vmatmul.bf16.vlgmr.msrb.gmra.mxu3 %v10342_v17 }
 0x323   :  { %6189 = vmatpush.bf16.msra.mxu3 %v9523_v21 }
 0x324   :  { %6151 = vmatpush.bf16.msra.mxu0 %v9495_v32  ;;  %v5786_v40 = vpop.f32.mrf.mxu2  ;;  %v5762_v57 = vpop.f32.mrf.mxu0 }
 0x325   :  { %6164 = vmatpush.bf16.msra.mxu1 %v9499_v36  ;;  %v5787_v23 = vadd.f32 %v5786_v40, %v5774_v44  ;;  %v5799_v0 = vpop.f32.mrf.mxu3  ;;  %v5775_v24 = vpop.f32.mrf.mxu1 }
 0x326   :  { %6177 = vmatpush.bf16.msra.mxu2 %v9503_v22  ;;  %v6205_v24 = vld.sshfl [vmem:[#allocation1] sm:$0xff pattern:$0x75316420] }
 0x327   :  { %6190 = vmatpush.bf16.msra.mxu3 %v9507_v51  ;;  %v5800_v41 = vadd.f32 %v5799_v0, %v5787_v23 }
 0x328   :  { %6152 = vmatpush.bf16.msra.mxu0 %v9479_v11  ;;  %v10343_v11 = vld [vmem:[#allocation5] sm:$0xf] }
 0x329   :  { %6165 = vmatpush.bf16.msra.mxu1 %v9483_v28  ;;  %v6036_v12 = vperm.slane %v10343_v11, 3  ;;  %v6035_v33 = vperm.slane %v10343_v11, 2 }
 0x32a   :  { %6178 = vmatpush.bf16.msra.mxu2 %v9487_v18 }
 0x32b   :  { %6191 = vmatpush.bf16.msra.mxu3 %v9491_v63  ;;  %v6038_v34 = vrot.slane %v6036_v12, 4 }
 0x32c   :  { %6153 = vmatpush.bf16.msra.mxu0 %v9463_v42  ;;  %v5788_v43 = vpop.f32.mrf.mxu2 }
 0x32d   :  { %6166 = vmatpush.bf16.msra.mxu1 %v9467_v31  ;;  %v5801_v26 = vpop.f32.mrf.mxu3  ;;  %v6040_v42 = vsel %vm6017_vm0, %v6035_v33, %v6038_v34  ;;  %v6206_v43 = vld.sshfl [vmem:[#allocation1 + $0x8] sm:$0xff pattern:$0x75316420] }
 0x32e   :  { %6179 = vmatpush.bf16.msra.mxu2 %v9471_v16 }
 0x32f   :  { %6192 = vmatpush.bf16.msra.mxu3 %v9475_v49  ;;  %9524 = vmatmul.msk.bf16.vlgmr.msra.gmra.mxu0 %vm6142_vm1, %v6045_v13 }
 0x330   :  { %9525 = vmatmul.msk.bf16.vlgmr.msra.gmra.mxu1 %vm6142_vm1, %v6045_v13 }
 0x331   :  { %9526 = vmatmul.msk.bf16.vlgmr.msra.gmra.mxu2 %vm6142_vm1, %v6045_v13 }
 0x332   :  { %9527 = vmatmul.msk.bf16.vlgmr.msra.gmra.mxu3 %vm6142_vm1, %v6045_v13 }
 0x33c   :  { %v5812_v55 = vpop.f32.mrf.mxu0 }
 0x33d   :  { %v5813_v60 = vadd.f32 %v5812_v55, %v5800_v41  ;;  %v5825_v45 = vpop.f32.mrf.mxu1 }
 0x33f   :  { %v5826_v27 = vadd.f32 %v5825_v45, %v5813_v60  ;;  %v6213_v60 = vsel %vm6017_vm0, %v6205_v24, 0.0  ;;  %v6214_v45 = vsel %vm6017_vm0, %v6206_v43, 0.0 }
 0x344   :  { %v5838_v46 = vpop.f32.mrf.mxu2  ;;  %v5814_v47 = vpop.f32.mrf.mxu0 }
 0x345   :  { %v5839_v21 = vadd.f32 %v5838_v46, %v5826_v27  ;;  %v5851_v1 = vpop.f32.mrf.mxu3  ;;  %v5827_v9 = vpop.f32.mrf.mxu1 }
 0x347   :  { %v5852_v3 = vadd.f32 %v5851_v1, %v5839_v21 }
 0x34c   :  { %v5840_v10 = vpop.f32.mrf.mxu2 }
 0x34d   :  { %v5853_v37 = vpop.f32.mrf.mxu3  ;;  %v6215_v10 = vadd.f32 %v6214_v45, %v6213_v60 }
 0x35c   :  { %v5864_v56 = vpop.f32.mrf.mxu0 }
 0x35d   :  { %v5877_v22 = vpop.f32.mrf.mxu1  ;;  %v5865_v30 = vadd.f32 %v5864_v56, %v5852_v3 }
 0x35f   :  { %v5878_v32 = vadd.f32 %v5877_v22, %v5865_v30 }
 0x364   :  { %v5890_v50 = vpop.f32.mrf.mxu2  ;;  %v5866_v29 = vpop.f32.mrf.mxu0 }
 0x365   :  { %v5903_v8 = vpop.f32.mrf.mxu3  ;;  %v5879_v14 = vpop.f32.mrf.mxu1  ;;  %v5891_v36 = vadd.f32 %v5890_v50, %v5878_v32 }
 0x367   :  { %v5904_v4 = vadd.f32 %v5903_v8, %v5891_v36 }
 0x36c   :  { %v5892_v51 = vpop.f32.mrf.mxu2 }
 0x36d   :  { %v5905_v15 = vpop.f32.mrf.mxu3 }
 0x37c   :  { %v5916_v48 = vpop.f32.mrf.mxu0 }
 0x37d   :  { %v5929_v52 = vpop.f32.mrf.mxu1  ;;  %v5917_v61 = vadd.f32 %v5916_v48, %v5904_v4  ;;  %v10452_v4 = vmov 839922192  }
 0x37f   :  { %v5930_v63 = vadd.f32 %v5929_v52, %v5917_v61  ;;  %v6235_v61 = vunpack.c.l.s4 %v10452_v4 }
 0x384   :  { %v5942_v53 = vpop.f32.mrf.mxu2  ;;  %v5918_v58 = vpop.f32.mrf.mxu0 }
 0x385   :  { %v5955_v54 = vpop.f32.mrf.mxu3  ;;  %v5931_v17 = vpop.f32.mrf.mxu1  ;;  %v5943_v5 = vadd.f32 %v5942_v53, %v5930_v63 }
 0x387   :  { %v5956_v39 = vadd.f32 %v5955_v54, %v5943_v5 }
 0x38c   :  { %v5944_v18 = vpop.f32.mrf.mxu2 }
 0x38d   :  { %v5957_v59 = vpop.f32.mrf.mxu3 }
 0x39c   :  { %v5968_v6 = vpop.f32.mrf.mxu0 }
 0x39d   :  { %v5981_v62 = vpop.f32.mrf.mxu1  ;;  %v5969_v7 = vadd.f32 %v5968_v6, %v5956_v39  ;;  %v6236_v6 = vunpack.c.0.s8 %v6235_v61 }
 0x39f   :  { %v5982_v28 = vadd.f32 %v5981_v62, %v5969_v7 }
 0x3a4   :  { %v5994_v16 = vpop.f32.mrf.mxu2  ;;  %v5970_v49 = vpop.f32.mrf.mxu0 }
 0x3a5   :  { %v5995_v20 = vadd.f32 %v5994_v16, %v5982_v28  ;;  %v6007_v25 = vpop.f32.mrf.mxu3  ;;  %v5983_v38 = vpop.f32.mrf.mxu1 }
 0x3a7   :  { %v6008_v2 = vadd.f32 %v6007_v25, %v5995_v20 }
 0x3a9   :  { %v6016_v44 = vrot.slane %v6008_v2, 4 }
 0x3ab   :  { %v6019_v31 = vsel %vm6017_vm0, %v10698_v19, %v6016_v44 }
 0x3ac   :  { %v10708_v40 = vadd.f32 %v6040_v42, %v6019_v31  ;;  %v5996_v23 = vpop.f32.mrf.mxu2  ;;  %v10712_v41 = vpop.f32.mrf.mxu0 }
 0x3ad   :  { %v6009_v0 = vpop.f32.mrf.mxu3  ;;  %v10714_v57 = vpop.f32.mrf.mxu1  ;;  %v6241_v26 = vmul.f32 %v10712_v41, %v10712_v41 }
 0x3ae   :  { %v6199_v13 = vmul.f32 %v10708_v40, %v10708_v40  ;;  %v6242_v19 = vmul.f32 %v10714_v57, %v10714_v57 }
 0x3af   :  { %v6246_v46 = vsel %vm6245_vm2, %v6241_v26, 0.0 }
 0x3b0   :  { %6204 = vst [vmem:[#allocation1 + $0x10] ss:$2 sm:$0xff] %v6199_v13  ;;  %v6247_v21 = vsel %vm6245_vm2, %v6242_v19, 0.0 }
 0x3b1   :  { %v6248_v22 = vadd.f32 %v6247_v21, %v6246_v46 }
 0x3b4   :  { %v10720_v55 = vpop.f32.mrf.mxu2  ;;  %v6157_v47 = vpop.f32.mrf.mxu0 }
 0x3b5   :  { %v10724_v27 = vpop.f32.mrf.mxu3  ;;  %v6243_v1 = vmul.f32 %v10720_v55, %v10720_v55  ;;  %v6170_v9 = vpop.f32.mrf.mxu1 }
 0x3b6   :  { %v6244_v29 = vmul.f32 %v10724_v27, %v10724_v27 }
 0x3b7   :  { %v6207_v3 = vld.sshfl [vmem:[#allocation1 + $0x10] sm:$0xff pattern:$0x75316420]  ;;  %v6208_v37 = vld.sshfl [vmem:[#allocation1 + $0x18] sm:$0xff pattern:$0x75316420] }
 0x3b8   :  { %v6216_v56 = vsel %vm6017_vm0, %v6207_v3, 0.0  ;;  %v6249_v8 = vsel %vm6245_vm2, %v6243_v1, 0.0  ;;  %v6218_v14 = vsel %vm6017_vm0, %v6208_v37, 0.0  ;;  %v6251_v30 = vsel %vm6245_vm2, %v6244_v29, 0.0 }
 0x3b9   :  { %v6217_v50 = vadd.f32 %v6216_v56, %v6215_v10  ;;  %v6250_v52 = vadd.f32 %v6249_v8, %v6248_v22 }
 0x3bb   :  { %v6219_v51 = vadd.f32 %v6218_v14, %v6217_v50  ;;  %v6252_v53 = vadd.f32 %v6251_v30, %v6250_v52 }
 0x3bc   :  { %v6183_v15 = vpop.f32.mrf.mxu2 }
 0x3bd   :  { %6220 = vadd.xlane.f32.xlu0 %v6219_v51  ;;  %v6196_v48 = vpop.f32.mrf.mxu3 }
 0x3c5   :  { %6253 = vadd.xlane.f32.xlu0 %v6252_v53 }
 0x430   :  { %v6221_v54 = vpop.xlane.xlu0 %6220 }
 0x431   :  { %v6222_v58 = vmax.f32 %v6221_v54, 1e-24 }
 0x433   :  { %10319 = vrsqrt.f32 %v6222_v58  ;;  %vm6229_vm4 = vweird.f32 %v6222_v58 }
 0x438   :  { %v6254_v17 = vpop.xlane.xlu0 %6253 }
 0x439   :  { %v10320_v32 = vpop.eup %10319  ;;  %v6255_v36 = vmax.f32 %v6254_v17, 1e-24 }
 0x43a   :  { %v6224_v18 = vmul.f32 %v10320_v32, %v6222_v58  ;;  %vm6230_vm3 = vweird.f32 %v10320_v32 }
 0x43b   :  { %10321 = vrsqrt.f32 %v6255_v36  ;;  %vm6231_vm5 = vmor %vm6229_vm4, %vm6230_vm3  ;;  %vm6262_vm6 = vweird.f32 %v6255_v36 }
 0x43c   :  { %v6225_v59 = vmul.f32 %v10320_v32, %v6224_v18 }
 0x43e   :  { %v6226_v63 = vmul.f32 0.5, %v6225_v59 }
 0x440   :  { %v6227_v5 = vsub.f32 1.5, %v6226_v63 }
 0x441   :  { %v10322_v39 = vpop.eup %10321 }
 0x442   :  { %v6228_v62 = vmul.f32 %v10320_v32, %v6227_v5  ;;  %v6257_v7 = vmul.f32 %v10322_v39, %v6255_v36  ;;  %vm6263_vm7 = vweird.f32 %v10322_v39 }
 0x443   :  { %vm6264_vm8 = vmor %vm6262_vm6, %vm6263_vm7 }
 0x444   :  { %v6232_v11 = vsel %vm6231_vm5, %v10320_v32, %v6228_v62  ;;  %v6258_v12 = vmul.f32 %v10322_v39, %v6257_v7 }
 0x445   :  { %v6237_v28 = vperm.slane %v6232_v11, %v6236_v6 }
 0x446   :  { %v6259_v16 = vmul.f32 0.5, %v6258_v12 }
 0x447   :  { %v6239_v20 = vmul.f32 %v6237_v28, %v10652_v35  ;;  %v6240_v25 = vmul.f32 %v6237_v28, %v10708_v40 }
 0x448   :  { %v6260_v33 = vsub.f32 1.5, %v6259_v16 }
 0x449   :  { %6272 = vst [vmem:[#allocation1] ss:$2 sm:$0xff] %v6239_v20 }
 0x44a   :  { %6274 = vst [vmem:[#allocation1 + $0x10] ss:$2 sm:$0xff] %v6240_v25  ;;  %v6261_v34 = vmul.f32 %v10322_v39, %v6260_v33 }
 0x44c   :  { %v6265_v49 = vsel %vm6264_vm8, %v10322_v39, %v6261_v34 }
 0x44d   :  { %v6266_v38 = vmul.f32 %v6265_v49, %v10712_v41  ;;  %v6267_v2 = vmul.f32 %v6265_v49, %v10714_v57  ;;  %v6268_v31 = vmul.f32 %v6265_v49, %v10720_v55  ;;  %v6269_v0 = vmul.f32 %v6265_v49, %v10724_v27 }
 0x450   :  { %v6275_v44 = vld.sshfl [vmem:[#allocation1] sm:$0xff pattern:$0x75316420]  ;;  %v6276_v42 = vld.sshfl [vmem:[#allocation1 + $0x8] sm:$0xff pattern:$0x75316420] }
 0x451   :  { %v6283_v35 = vsel %vm6245_vm2, %v6266_v38, %v6275_v44  ;;  %v6284_v40 = vsel %vm6245_vm2, %v6267_v2, %v6276_v42  ;;  %6287 = vst [vmem:[#allocation1] ss:$2 sm:$0xff] %v6239_v20  ;;  %v6277_v23 = vld.sshfl [vmem:[#allocation1 + $0x10] sm:$0xff pattern:$0x75316420] }
 0x452   :  { %6313 = vmatpush.xpose.msrb.mxu0 %v6283_v35  ;;  %6333 = vmatpush.xpose.msrb.mxu1 %v6284_v40  ;;  %v6285_v13 = vsel %vm6245_vm2, %v6268_v31, %v6277_v23  ;;  %v6278_v24 = vld.sshfl [vmem:[#allocation1 + $0x18] sm:$0xff pattern:$0x75316420] }
 0x453   :  { %6353 = vmatpush.xpose.msrb.mxu2 %v6285_v13  ;;  %v6286_v41 = vsel %vm6245_vm2, %v6269_v0, %v6278_v24  ;;  %6289 = vst [vmem:[#allocation1 + $0x10] ss:$2 sm:$0xff] %v6240_v25 }
 0x454   :  { %6373 = vmatpush.xpose.msrb.mxu3 %v6286_v41 }
 0x458   :  { %v6290_v57 = vld.sshfl [vmem:[#allocation1] sm:$0xff pattern:$0x75316420]  ;;  %v6291_v43 = vld.sshfl [vmem:[#allocation1 + $0x8] sm:$0xff pattern:$0x75316420] }
 0x459   :  { %6314 = vmatmul.f32.vlgmr.msrb.gmra.mxu0 %v6290_v57  ;;  %6334 = vmatmul.f32.vlgmr.msrb.gmra.mxu1 %v6291_v43 }
 0x45a   :  { %v6292_v26 = vld.sshfl [vmem:[#allocation1 + $0x10] sm:$0xff pattern:$0x75316420]  ;;  %v6293_v19 = vld.sshfl [vmem:[#allocation1 + $0x18] sm:$0xff pattern:$0x75316420] }
 0x45b   :  { %6354 = vmatmul.f32.vlgmr.msrb.gmra.mxu2 %v6292_v26  ;;  %6374 = vmatmul.f32.vlgmr.msrb.gmra.mxu3 %v6293_v19 }
 0x4d6   :  { %v6315_v55 = vpop.f32.mrf.mxu0  ;;  %v6335_v60 = vpop.f32.mrf.mxu1 }
 0x4d7   :  { %v6336_v45 = vadd.f32 %v6335_v60, %v6315_v55 }
 0x4de   :  { %v6355_v27 = vpop.f32.mrf.mxu2  ;;  %v6375_v21 = vpop.f32.mrf.mxu3 }
 0x4df   :  { %v6356_v46 = vadd.f32 %v6355_v27, %v6336_v45 }
 0x4e1   :  { %v6376_v1 = vadd.f32 %v6375_v21, %v6356_v46 }
 0x4e3   :  { %v6378_v47 = vsub.f32 1.0, %v6376_v1 }
 0x4e5   :  { %6380 = vst.msk [vmem:[%s10754_s5] sm:$0x3] %vm6379_vm9, %v6378_v47 }
 0x4e6   :  { %6385 = vsyncpa [#allocation4], 1 }
 0x4e7   :  { %6386 = vsyncpa [#allocation6], 1 }
 0x4e8   :  { %6387 = vsyncpa [#allocation9], 1 }

</bundles_post_ra>
